<compile_context>
chip_gen: v6e
topology: v6e:2x2x1
jax: 0.10.0
libtpu: 0.0.40
codegen_flags: <defaults>
</compile_context>

<pallas_src>
import functools

import jax
import jax.numpy as jnp
from jax.experimental import pallas as pl
from jax.experimental.pallas import tpu as pltpu


IMG = 784          # 28 * 28 flattened image positions ("28-stride frame")
IMG_PAD = 896      # padded to a multiple of 128 lanes (7 * 128)
N_PAD = 128        # FC output padded 10 -> 128 (lane-dense, unmasked stores)


def _round_up(n, m):
    return ((n + m - 1) // m) * m


# ------------------------------ Pallas kernel -------------------------------

def fused_cnn_kernel(x_ref, wf_ref, bf_ref, wc_ref, bc_ref, o_ref):
    # x_ref : [tb, 896] f32   flat image slab; x[b, i*28+j] = pixel (i, j),
    #                         columns 784..895 are zero padding.
    # wf_ref: [8, 896, 128] bf16  FC weight, flatten permutation folded in and
    #                         re-indexed to the 28-stride frame; rows for i>=26,
    #                         j>=26 or p>=784 and columns >= 10 are exactly zero.
    # bf_ref: [1, 128] f32    FC bias, zero padded.
    # wc_ref: [8, 9]  (SMEM)  conv weight scalars, k = di*3 + dj.
    # bc_ref: [8]     (SMEM)  conv bias scalars.
    # o_ref : [tb, 128] f32   padded logits (columns >= 10 are zero).
    tb = o_ref.shape[0]
    x = x_ref[...]                                           # [tb, 896] f32

    # Build the nine 3x3 taps in-kernel on the XLU: tap_k[b, p] = x[b, p + di*28+dj]
    # (jnp.roll semantics: roll by -(off) == roll by IMG_PAD - off).
    taps = []
    for di in range(3):
        for dj in range(3):
            off = di * 28 + dj
            taps.append(x if off == 0 else pltpu.roll(x, shift=IMG_PAD - off, axis=1))

    # Accumulator starts from the broadcast FC bias (saves the trailing add).
    acc = jnp.broadcast_to(bf_ref[...], (tb, N_PAD))          # f32 [tb, 128]

    for c in range(8):
        # 3x3 conv for output channel c on the VPU: 9 scalar * vector MACs (f32).
        s = wc_ref[c, 0] * taps[0]
        for k in range(1, 9):
            s = s + wc_ref[c, k] * taps[k]
        s = jnp.maximum(s + bc_ref[c], 0.0).astype(jnp.bfloat16)   # ReLU -> bf16
        # FC contribution of channel c on the MXU (K = 896, lane aligned, f32 acc).
        acc = acc + jnp.dot(s, wf_ref[c], preferred_element_type=jnp.float32)

    o_ref[...] = acc


# ------------------------------- JAX wrapper ---------------------------------

@functools.partial(jax.jit, static_argnames=("tile_b",))
def simple_cnn_forward(x, params, tile_b=256):
    """Forward pass matching SimpleCNN.forward. x: [B, 1, 28, 28] float32."""
    B = x.shape[0]
    w_conv, b_conv, w_fc, b_fc = params

    # ---- batch-tile selection (multiple of 8 sublanes; >= 2 grid steps if possible
    #      so dimension_semantics=("parallel",) can use both v7x TensorCores) ----
    tile_b = max(8, (int(tile_b) // 8) * 8)
    bp8 = _round_up(max(B, 1), 8)
    tb = min(tile_b, bp8)
    if tb == bp8 and bp8 >= 16:
        tb = _round_up(bp8 // 2, 8)
    bp = _round_up(B, tb)

    # Conv params -> SMEM scalar tables (k = di*3 + dj matches the in-kernel taps).
    wc = w_conv.reshape(8, 9).astype(jnp.float32)             # [c, k]
    bc = b_conv.astype(jnp.float32)                           # [8]

    # FC weight: fold PyTorch's channel-major flatten (index = c*676 + i*26 + j),
    # re-index rows to the 28-stride frame (zero rows where i>=26 or j>=26 or
    # p>=784), pad out-dim 10 -> 128, store bf16 (pads stay exactly zero).
    wf = w_fc.T.reshape(8, 26, 26, 10).astype(jnp.float32)    # [c, i, j, n]
    wf = jnp.pad(wf, ((0, 0), (0, 2), (0, 2), (0, N_PAD - 10)))   # [8, 28, 28, 128]
    wf = wf.reshape(8, IMG, N_PAD)
    wf = jnp.pad(wf, ((0, 0), (0, IMG_PAD - IMG), (0, 0))).astype(jnp.bfloat16)
    bf = jnp.pad(b_fc.reshape(1, 10).astype(jnp.float32), ((0, 0), (0, N_PAD - 10)))

    # Single flat, zero-padded image slab (the ONLY per-row HBM stream).
    x_flat = x.reshape(B, IMG).astype(jnp.float32)            # [B, 784]
    x_flat = jnp.pad(x_flat, ((0, bp - B), (0, IMG_PAD - IMG)))   # [bp, 896]

    out = pl.pallas_call(
        fused_cnn_kernel,
        out_shape=jax.ShapeDtypeStruct((bp, N_PAD), jnp.float32),
        grid=(bp // tb,),
        in_specs=[
            pl.BlockSpec((tb, IMG_PAD), lambda i: (i, 0)),
            pl.BlockSpec((8, IMG_PAD, N_PAD), lambda i: (0, 0, 0),
                         pipeline_mode=pl.Buffered(1)),        # grid-invariant
            pl.BlockSpec((1, N_PAD), lambda i: (0, 0),
                         pipeline_mode=pl.Buffered(1)),        # grid-invariant
            pl.BlockSpec(memory_space=pltpu.MemorySpace.SMEM),
            pl.BlockSpec(memory_space=pltpu.MemorySpace.SMEM),
        ],
        out_specs=pl.BlockSpec((tb, N_PAD), lambda i: (i, 0)),
        compiler_params=pltpu.CompilerParams(
            dimension_semantics=("parallel",),
            vmem_limit_bytes=48 * 1024 * 1024,
        ),
    )(x_flat, wf, bf, wc, bc)

    return out[:B, :10]


# ---------------------------- init & reference -------------------------------

def init_params(key):
    """Deterministic parameter init (uniform, PyTorch-default-style bounds)."""
    k1, k2, k3, k4 = jax.random.split(key, 4)
    fan_conv = 1 * 3 * 3
    bnd_c = 1.0 / jnp.sqrt(fan_conv)
    w_conv = jax.random.uniform(k1, (8, 1, 3, 3), jnp.float32, -bnd_c, bnd_c)
    b_conv = jax.random.uniform(k2, (8,), jnp.float32, -bnd_c, bnd_c)
    fan_fc = 8 * 26 * 26
    bnd_f = 1.0 / jnp.sqrt(fan_fc)
    w_fc = jax.random.uniform(k3, (10, fan_fc), jnp.float32, -bnd_f, bnd_f)
    b_fc = jax.random.uniform(k4, (10,), jnp.float32, -bnd_f, bnd_f)
    return (w_conv, b_conv, w_fc, b_fc)


def _reference_forward(x, params):
    """Pure-JAX reference of the PyTorch forward (NCHW conv, valid padding)."""
    w_conv, b_conv, w_fc, b_fc = params
    y = jax.lax.conv_general_dilated(
        x, w_conv, window_strides=(1, 1), padding="VALID",
        dimension_numbers=("NCHW", "OIHW", "NCHW"))
    y = jnp.maximum(y + b_conv.reshape(1, 8, 1, 1), 0.0)      # [B, 8, 26, 26]
    flat = y.reshape(y.shape[0], -1)                          # channel-major flatten
    return flat @ w_fc.T + b_fc


if __name__ == "__main__":
    key = jax.random.PRNGKey(0)
    kx, kp = jax.random.split(key)
    B = 2
    x = jax.random.normal(kx, (B, 1, 28, 28), jnp.float32)
    params = init_params(kp)

    out = jax.block_until_ready(simple_cnn_forward(x, params))
    ref = _reference_forward(x, params)

    assert out.shape == (B, 10)
    # bf16 FC weights/activations on the MXU (f32 accumulate) -> ~1e-3 level error,
    # so the parity tolerance is relaxed from 1e-4 to 1e-2 per the review.
    err = float(jnp.max(jnp.abs(out - ref)))
    assert jnp.allclose(out, ref, atol=1e-2, rtol=1e-2), err

    print("KERNEL_OK")
</pallas_src>

<mosaic_0001>
module attributes {stable_mosaic.version = 11 : i64} {
  func.func @fused_cnn_kernel(%arg0: i32, %arg1: memref<8x896xf32, #tpu.memory_space<vmem>>, %arg2: memref<8x896x128xbf16, #tpu.memory_space<vmem>>, %arg3: memref<1x128xf32, #tpu.memory_space<vmem>>, %arg4: memref<8x9xf32, #tpu.memory_space<smem>>, %arg5: memref<8xf32, #tpu.memory_space<smem>>, %arg6: memref<8x128xf32, #tpu.memory_space<vmem>>) attributes {dimension_semantics = [#tpu.dimension_semantics<parallel>], iteration_bounds = array<i64: 1>, scalar_prefetch = 0 : i64, scratch_operands = 0 : i64, tpu.core_type = #tpu.core_type<tc>, window_params = [{transform_indices = @transform_0, window_bounds = array<i64: 8, 896>}, {pipeline_mode = #tpu.pipeline_mode<synchronous>, transform_indices = @transform_1, window_bounds = array<i64: 8, 896, 128>}, {pipeline_mode = #tpu.pipeline_mode<synchronous>, transform_indices = @transform_2, window_bounds = array<i64: 1, 128>}, {transform_indices = @transform_3, window_bounds = array<i64: 8, 9>}, {transform_indices = @transform_4, window_bounds = array<i64: 8>}, {transform_indices = @transform_5, window_bounds = array<i64: 8, 128>}]} {
    %c0 = arith.constant 0 : index
    %c0_0 = arith.constant 0 : index
    %0 = vector.load %arg1[%c0, %c0_0] : memref<8x896xf32, #tpu.memory_space<vmem>>, vector<8x896xf32>
    %c895_i32 = arith.constant 895 : i32
    %1 = tpu.dynamic_rotate %0 by %c895_i32 dim 1 : vector<8x896xf32>, i32 -> vector<8x896xf32>
    %c894_i32 = arith.constant 894 : i32
    %2 = tpu.dynamic_rotate %0 by %c894_i32 dim 1 : vector<8x896xf32>, i32 -> vector<8x896xf32>
    %c868_i32 = arith.constant 868 : i32
    %3 = tpu.dynamic_rotate %0 by %c868_i32 dim 1 : vector<8x896xf32>, i32 -> vector<8x896xf32>
    %c867_i32 = arith.constant 867 : i32
    %4 = tpu.dynamic_rotate %0 by %c867_i32 dim 1 : vector<8x896xf32>, i32 -> vector<8x896xf32>
    %c866_i32 = arith.constant 866 : i32
    %5 = tpu.dynamic_rotate %0 by %c866_i32 dim 1 : vector<8x896xf32>, i32 -> vector<8x896xf32>
    %c840_i32 = arith.constant 840 : i32
    %6 = tpu.dynamic_rotate %0 by %c840_i32 dim 1 : vector<8x896xf32>, i32 -> vector<8x896xf32>
    %c839_i32 = arith.constant 839 : i32
    %7 = tpu.dynamic_rotate %0 by %c839_i32 dim 1 : vector<8x896xf32>, i32 -> vector<8x896xf32>
    %c838_i32 = arith.constant 838 : i32
    %8 = tpu.dynamic_rotate %0 by %c838_i32 dim 1 : vector<8x896xf32>, i32 -> vector<8x896xf32>
    %c0_1 = arith.constant 0 : index
    %c0_2 = arith.constant 0 : index
    %9 = vector.load %arg3[%c0_1, %c0_2] : memref<1x128xf32, #tpu.memory_space<vmem>>, vector<1x128xf32>
    %10 = vector.shape_cast %9 : vector<1x128xf32> to vector<1x128xf32>
    %11 = vector.broadcast %10 : vector<1x128xf32> to vector<8x128xf32>
    %c0_3 = arith.constant 0 : index
    %c0_4 = arith.constant 0 : index
    %12 = memref.load %arg4[%c0_3, %c0_4] : memref<8x9xf32, #tpu.memory_space<smem>>
    %13 = vector.broadcast %12 : f32 to vector<8x896xf32>
    %14 = arith.mulf %13, %0 : vector<8x896xf32>
    %c0_5 = arith.constant 0 : index
    %c1 = arith.constant 1 : index
    %15 = memref.load %arg4[%c0_5, %c1] : memref<8x9xf32, #tpu.memory_space<smem>>
    %16 = vector.broadcast %15 : f32 to vector<8x896xf32>
    %17 = arith.mulf %16, %1 : vector<8x896xf32>
    %18 = arith.addf %14, %17 : vector<8x896xf32>
    %c0_6 = arith.constant 0 : index
    %c2 = arith.constant 2 : index
    %19 = memref.load %arg4[%c0_6, %c2] : memref<8x9xf32, #tpu.memory_space<smem>>
    %20 = vector.broadcast %19 : f32 to vector<8x896xf32>
    %21 = arith.mulf %20, %2 : vector<8x896xf32>
    %22 = arith.addf %18, %21 : vector<8x896xf32>
    %c0_7 = arith.constant 0 : index
    %c3 = arith.constant 3 : index
    %23 = memref.load %arg4[%c0_7, %c3] : memref<8x9xf32, #tpu.memory_space<smem>>
    %24 = vector.broadcast %23 : f32 to vector<8x896xf32>
    %25 = arith.mulf %24, %3 : vector<8x896xf32>
    %26 = arith.addf %22, %25 : vector<8x896xf32>
    %c0_8 = arith.constant 0 : index
    %c4 = arith.constant 4 : index
    %27 = memref.load %arg4[%c0_8, %c4] : memref<8x9xf32, #tpu.memory_space<smem>>
    %28 = vector.broadcast %27 : f32 to vector<8x896xf32>
    %29 = arith.mulf %28, %4 : vector<8x896xf32>
    %30 = arith.addf %26, %29 : vector<8x896xf32>
    %c0_9 = arith.constant 0 : index
    %c5 = arith.constant 5 : index
    %31 = memref.load %arg4[%c0_9, %c5] : memref<8x9xf32, #tpu.memory_space<smem>>
    %32 = vector.broadcast %31 : f32 to vector<8x896xf32>
    %33 = arith.mulf %32, %5 : vector<8x896xf32>
    %34 = arith.addf %30, %33 : vector<8x896xf32>
    %c0_10 = arith.constant 0 : index
    %c6 = arith.constant 6 : index
    %35 = memref.load %arg4[%c0_10, %c6] : memref<8x9xf32, #tpu.memory_space<smem>>
    %36 = vector.broadcast %35 : f32 to vector<8x896xf32>
    %37 = arith.mulf %36, %6 : vector<8x896xf32>
    %38 = arith.addf %34, %37 : vector<8x896xf32>
    %c0_11 = arith.constant 0 : index
    %c7 = arith.constant 7 : index
    %39 = memref.load %arg4[%c0_11, %c7] : memref<8x9xf32, #tpu.memory_space<smem>>
    %40 = vector.broadcast %39 : f32 to vector<8x896xf32>
    %41 = arith.mulf %40, %7 : vector<8x896xf32>
    %42 = arith.addf %38, %41 : vector<8x896xf32>
    %c0_12 = arith.constant 0 : index
    %c8 = arith.constant 8 : index
    %43 = memref.load %arg4[%c0_12, %c8] : memref<8x9xf32, #tpu.memory_space<smem>>
    %44 = vector.broadcast %43 : f32 to vector<8x896xf32>
    %45 = arith.mulf %44, %8 : vector<8x896xf32>
    %46 = arith.addf %42, %45 : vector<8x896xf32>
    %c0_13 = arith.constant 0 : index
    %47 = memref.load %arg5[%c0_13] : memref<8xf32, #tpu.memory_space<smem>>
    %48 = vector.broadcast %47 : f32 to vector<8x896xf32>
    %49 = arith.addf %46, %48 : vector<8x896xf32>
    %cst = arith.constant 0.000000e+00 : f32
    %50 = vector.broadcast %cst : f32 to vector<8x896xf32>
    %51 = arith.maximumf %49, %50 : vector<8x896xf32>
    %52 = arith.truncf %51 : vector<8x896xf32> to vector<8x896xbf16>
    %c0_14 = arith.constant 0 : index
    %c0_15 = arith.constant 0 : index
    %c0_16 = arith.constant 0 : index
    %53 = vector.load %arg2[%c0_14, %c0_15, %c0_16] : memref<8x896x128xbf16, #tpu.memory_space<vmem>>, vector<1x896x128xbf16>
    %54 = vector.shape_cast %53 : vector<1x896x128xbf16> to vector<896x128xbf16>
    %cst_17 = arith.constant dense<0.000000e+00> : vector<8x128xf32>
    %55 = tpu.matmul %52, %54, %cst_17 {dimension_numbers = #tpu.dot_dimension_numbers<[1], [0], [0], [1], [0, 0, 1, 1], [], []>} : vector<8x896xbf16>, vector<896x128xbf16>, vector<8x128xf32> -> vector<8x128xf32>
    %56 = arith.addf %11, %55 : vector<8x128xf32>
    %c1_18 = arith.constant 1 : index
    %c0_19 = arith.constant 0 : index
    %57 = memref.load %arg4[%c1_18, %c0_19] : memref<8x9xf32, #tpu.memory_space<smem>>
    %58 = vector.broadcast %57 : f32 to vector<8x896xf32>
    %59 = arith.mulf %58, %0 : vector<8x896xf32>
    %c1_20 = arith.constant 1 : index
    %c1_21 = arith.constant 1 : index
    %60 = memref.load %arg4[%c1_20, %c1_21] : memref<8x9xf32, #tpu.memory_space<smem>>
    %61 = vector.broadcast %60 : f32 to vector<8x896xf32>
    %62 = arith.mulf %61, %1 : vector<8x896xf32>
    %63 = arith.addf %59, %62 : vector<8x896xf32>
    %c1_22 = arith.constant 1 : index
    %c2_23 = arith.constant 2 : index
    %64 = memref.load %arg4[%c1_22, %c2_23] : memref<8x9xf32, #tpu.memory_space<smem>>
    %65 = vector.broadcast %64 : f32 to vector<8x896xf32>
    %66 = arith.mulf %65, %2 : vector<8x896xf32>
    %67 = arith.addf %63, %66 : vector<8x896xf32>
    %c1_24 = arith.constant 1 : index
    %c3_25 = arith.constant 3 : index
    %68 = memref.load %arg4[%c1_24, %c3_25] : memref<8x9xf32, #tpu.memory_space<smem>>
    %69 = vector.broadcast %68 : f32 to vector<8x896xf32>
    %70 = arith.mulf %69, %3 : vector<8x896xf32>
    %71 = arith.addf %67, %70 : vector<8x896xf32>
    %c1_26 = arith.constant 1 : index
    %c4_27 = arith.constant 4 : index
    %72 = memref.load %arg4[%c1_26, %c4_27] : memref<8x9xf32, #tpu.memory_space<smem>>
    %73 = vector.broadcast %72 : f32 to vector<8x896xf32>
    %74 = arith.mulf %73, %4 : vector<8x896xf32>
    %75 = arith.addf %71, %74 : vector<8x896xf32>
    %c1_28 = arith.constant 1 : index
    %c5_29 = arith.constant 5 : index
    %76 = memref.load %arg4[%c1_28, %c5_29] : memref<8x9xf32, #tpu.memory_space<smem>>
    %77 = vector.broadcast %76 : f32 to vector<8x896xf32>
    %78 = arith.mulf %77, %5 : vector<8x896xf32>
    %79 = arith.addf %75, %78 : vector<8x896xf32>
    %c1_30 = arith.constant 1 : index
    %c6_31 = arith.constant 6 : index
    %80 = memref.load %arg4[%c1_30, %c6_31] : memref<8x9xf32, #tpu.memory_space<smem>>
    %81 = vector.broadcast %80 : f32 to vector<8x896xf32>
    %82 = arith.mulf %81, %6 : vector<8x896xf32>
    %83 = arith.addf %79, %82 : vector<8x896xf32>
    %c1_32 = arith.constant 1 : index
    %c7_33 = arith.constant 7 : index
    %84 = memref.load %arg4[%c1_32, %c7_33] : memref<8x9xf32, #tpu.memory_space<smem>>
    %85 = vector.broadcast %84 : f32 to vector<8x896xf32>
    %86 = arith.mulf %85, %7 : vector<8x896xf32>
    %87 = arith.addf %83, %86 : vector<8x896xf32>
    %c1_34 = arith.constant 1 : index
    %c8_35 = arith.constant 8 : index
    %88 = memref.load %arg4[%c1_34, %c8_35] : memref<8x9xf32, #tpu.memory_space<smem>>
    %89 = vector.broadcast %88 : f32 to vector<8x896xf32>
    %90 = arith.mulf %89, %8 : vector<8x896xf32>
    %91 = arith.addf %87, %90 : vector<8x896xf32>
    %c1_36 = arith.constant 1 : index
    %92 = memref.load %arg5[%c1_36] : memref<8xf32, #tpu.memory_space<smem>>
    %93 = vector.broadcast %92 : f32 to vector<8x896xf32>
    %94 = arith.addf %91, %93 : vector<8x896xf32>
    %cst_37 = arith.constant 0.000000e+00 : f32
    %95 = vector.broadcast %cst_37 : f32 to vector<8x896xf32>
    %96 = arith.maximumf %94, %95 : vector<8x896xf32>
    %97 = arith.truncf %96 : vector<8x896xf32> to vector<8x896xbf16>
    %c1_38 = arith.constant 1 : index
    %c0_39 = arith.constant 0 : index
    %c0_40 = arith.constant 0 : index
    %98 = vector.load %arg2[%c1_38, %c0_39, %c0_40] : memref<8x896x128xbf16, #tpu.memory_space<vmem>>, vector<1x896x128xbf16>
    %99 = vector.shape_cast %98 : vector<1x896x128xbf16> to vector<896x128xbf16>
    %cst_41 = arith.constant dense<0.000000e+00> : vector<8x128xf32>
    %100 = tpu.matmul %97, %99, %cst_41 {dimension_numbers = #tpu.dot_dimension_numbers<[1], [0], [0], [1], [0, 0, 1, 1], [], []>} : vector<8x896xbf16>, vector<896x128xbf16>, vector<8x128xf32> -> vector<8x128xf32>
    %101 = arith.addf %56, %100 : vector<8x128xf32>
    %c2_42 = arith.constant 2 : index
    %c0_43 = arith.constant 0 : index
    %102 = memref.load %arg4[%c2_42, %c0_43] : memref<8x9xf32, #tpu.memory_space<smem>>
    %103 = vector.broadcast %102 : f32 to vector<8x896xf32>
    %104 = arith.mulf %103, %0 : vector<8x896xf32>
    %c2_44 = arith.constant 2 : index
    %c1_45 = arith.constant 1 : index
    %105 = memref.load %arg4[%c2_44, %c1_45] : memref<8x9xf32, #tpu.memory_space<smem>>
    %106 = vector.broadcast %105 : f32 to vector<8x896xf32>
    %107 = arith.mulf %106, %1 : vector<8x896xf32>
    %108 = arith.addf %104, %107 : vector<8x896xf32>
    %c2_46 = arith.constant 2 : index
    %c2_47 = arith.constant 2 : index
    %109 = memref.load %arg4[%c2_46, %c2_47] : memref<8x9xf32, #tpu.memory_space<smem>>
    %110 = vector.broadcast %109 : f32 to vector<8x896xf32>
    %111 = arith.mulf %110, %2 : vector<8x896xf32>
    %112 = arith.addf %108, %111 : vector<8x896xf32>
    %c2_48 = arith.constant 2 : index
    %c3_49 = arith.constant 3 : index
    %113 = memref.load %arg4[%c2_48, %c3_49] : memref<8x9xf32, #tpu.memory_space<smem>>
    %114 = vector.broadcast %113 : f32 to vector<8x896xf32>
    %115 = arith.mulf %114, %3 : vector<8x896xf32>
    %116 = arith.addf %112, %115 : vector<8x896xf32>
    %c2_50 = arith.constant 2 : index
    %c4_51 = arith.constant 4 : index
    %117 = memref.load %arg4[%c2_50, %c4_51] : memref<8x9xf32, #tpu.memory_space<smem>>
    %118 = vector.broadcast %117 : f32 to vector<8x896xf32>
    %119 = arith.mulf %118, %4 : vector<8x896xf32>
    %120 = arith.addf %116, %119 : vector<8x896xf32>
    %c2_52 = arith.constant 2 : index
    %c5_53 = arith.constant 5 : index
    %121 = memref.load %arg4[%c2_52, %c5_53] : memref<8x9xf32, #tpu.memory_space<smem>>
    %122 = vector.broadcast %121 : f32 to vector<8x896xf32>
    %123 = arith.mulf %122, %5 : vector<8x896xf32>
    %124 = arith.addf %120, %123 : vector<8x896xf32>
    %c2_54 = arith.constant 2 : index
    %c6_55 = arith.constant 6 : index
    %125 = memref.load %arg4[%c2_54, %c6_55] : memref<8x9xf32, #tpu.memory_space<smem>>
    %126 = vector.broadcast %125 : f32 to vector<8x896xf32>
    %127 = arith.mulf %126, %6 : vector<8x896xf32>
    %128 = arith.addf %124, %127 : vector<8x896xf32>
    %c2_56 = arith.constant 2 : index
    %c7_57 = arith.constant 7 : index
    %129 = memref.load %arg4[%c2_56, %c7_57] : memref<8x9xf32, #tpu.memory_space<smem>>
    %130 = vector.broadcast %129 : f32 to vector<8x896xf32>
    %131 = arith.mulf %130, %7 : vector<8x896xf32>
    %132 = arith.addf %128, %131 : vector<8x896xf32>
    %c2_58 = arith.constant 2 : index
    %c8_59 = arith.constant 8 : index
    %133 = memref.load %arg4[%c2_58, %c8_59] : memref<8x9xf32, #tpu.memory_space<smem>>
    %134 = vector.broadcast %133 : f32 to vector<8x896xf32>
    %135 = arith.mulf %134, %8 : vector<8x896xf32>
    %136 = arith.addf %132, %135 : vector<8x896xf32>
    %c2_60 = arith.constant 2 : index
    %137 = memref.load %arg5[%c2_60] : memref<8xf32, #tpu.memory_space<smem>>
    %138 = vector.broadcast %137 : f32 to vector<8x896xf32>
    %139 = arith.addf %136, %138 : vector<8x896xf32>
    %cst_61 = arith.constant 0.000000e+00 : f32
    %140 = vector.broadcast %cst_61 : f32 to vector<8x896xf32>
    %141 = arith.maximumf %139, %140 : vector<8x896xf32>
    %142 = arith.truncf %141 : vector<8x896xf32> to vector<8x896xbf16>
    %c2_62 = arith.constant 2 : index
    %c0_63 = arith.constant 0 : index
    %c0_64 = arith.constant 0 : index
    %143 = vector.load %arg2[%c2_62, %c0_63, %c0_64] : memref<8x896x128xbf16, #tpu.memory_space<vmem>>, vector<1x896x128xbf16>
    %144 = vector.shape_cast %143 : vector<1x896x128xbf16> to vector<896x128xbf16>
    %cst_65 = arith.constant dense<0.000000e+00> : vector<8x128xf32>
    %145 = tpu.matmul %142, %144, %cst_65 {dimension_numbers = #tpu.dot_dimension_numbers<[1], [0], [0], [1], [0, 0, 1, 1], [], []>} : vector<8x896xbf16>, vector<896x128xbf16>, vector<8x128xf32> -> vector<8x128xf32>
    %146 = arith.addf %101, %145 : vector<8x128xf32>
    %c3_66 = arith.constant 3 : index
    %c0_67 = arith.constant 0 : index
    %147 = memref.load %arg4[%c3_66, %c0_67] : memref<8x9xf32, #tpu.memory_space<smem>>
    %148 = vector.broadcast %147 : f32 to vector<8x896xf32>
    %149 = arith.mulf %148, %0 : vector<8x896xf32>
    %c3_68 = arith.constant 3 : index
    %c1_69 = arith.constant 1 : index
    %150 = memref.load %arg4[%c3_68, %c1_69] : memref<8x9xf32, #tpu.memory_space<smem>>
    %151 = vector.broadcast %150 : f32 to vector<8x896xf32>
    %152 = arith.mulf %151, %1 : vector<8x896xf32>
    %153 = arith.addf %149, %152 : vector<8x896xf32>
    %c3_70 = arith.constant 3 : index
    %c2_71 = arith.constant 2 : index
    %154 = memref.load %arg4[%c3_70, %c2_71] : memref<8x9xf32, #tpu.memory_space<smem>>
    %155 = vector.broadcast %154 : f32 to vector<8x896xf32>
    %156 = arith.mulf %155, %2 : vector<8x896xf32>
    %157 = arith.addf %153, %156 : vector<8x896xf32>
    %c3_72 = arith.constant 3 : index
    %c3_73 = arith.constant 3 : index
    %158 = memref.load %arg4[%c3_72, %c3_73] : memref<8x9xf32, #tpu.memory_space<smem>>
    %159 = vector.broadcast %158 : f32 to vector<8x896xf32>
    %160 = arith.mulf %159, %3 : vector<8x896xf32>
    %161 = arith.addf %157, %160 : vector<8x896xf32>
    %c3_74 = arith.constant 3 : index
    %c4_75 = arith.constant 4 : index
    %162 = memref.load %arg4[%c3_74, %c4_75] : memref<8x9xf32, #tpu.memory_space<smem>>
    %163 = vector.broadcast %162 : f32 to vector<8x896xf32>
    %164 = arith.mulf %163, %4 : vector<8x896xf32>
    %165 = arith.addf %161, %164 : vector<8x896xf32>
    %c3_76 = arith.constant 3 : index
    %c5_77 = arith.constant 5 : index
    %166 = memref.load %arg4[%c3_76, %c5_77] : memref<8x9xf32, #tpu.memory_space<smem>>
    %167 = vector.broadcast %166 : f32 to vector<8x896xf32>
    %168 = arith.mulf %167, %5 : vector<8x896xf32>
    %169 = arith.addf %165, %168 : vector<8x896xf32>
    %c3_78 = arith.constant 3 : index
    %c6_79 = arith.constant 6 : index
    %170 = memref.load %arg4[%c3_78, %c6_79] : memref<8x9xf32, #tpu.memory_space<smem>>
    %171 = vector.broadcast %170 : f32 to vector<8x896xf32>
    %172 = arith.mulf %171, %6 : vector<8x896xf32>
    %173 = arith.addf %169, %172 : vector<8x896xf32>
    %c3_80 = arith.constant 3 : index
    %c7_81 = arith.constant 7 : index
    %174 = memref.load %arg4[%c3_80, %c7_81] : memref<8x9xf32, #tpu.memory_space<smem>>
    %175 = vector.broadcast %174 : f32 to vector<8x896xf32>
    %176 = arith.mulf %175, %7 : vector<8x896xf32>
    %177 = arith.addf %173, %176 : vector<8x896xf32>
    %c3_82 = arith.constant 3 : index
    %c8_83 = arith.constant 8 : index
    %178 = memref.load %arg4[%c3_82, %c8_83] : memref<8x9xf32, #tpu.memory_space<smem>>
    %179 = vector.broadcast %178 : f32 to vector<8x896xf32>
    %180 = arith.mulf %179, %8 : vector<8x896xf32>
    %181 = arith.addf %177, %180 : vector<8x896xf32>
    %c3_84 = arith.constant 3 : index
    %182 = memref.load %arg5[%c3_84] : memref<8xf32, #tpu.memory_space<smem>>
    %183 = vector.broadcast %182 : f32 to vector<8x896xf32>
    %184 = arith.addf %181, %183 : vector<8x896xf32>
    %cst_85 = arith.constant 0.000000e+00 : f32
    %185 = vector.broadcast %cst_85 : f32 to vector<8x896xf32>
    %186 = arith.maximumf %184, %185 : vector<8x896xf32>
    %187 = arith.truncf %186 : vector<8x896xf32> to vector<8x896xbf16>
    %c3_86 = arith.constant 3 : index
    %c0_87 = arith.constant 0 : index
    %c0_88 = arith.constant 0 : index
    %188 = vector.load %arg2[%c3_86, %c0_87, %c0_88] : memref<8x896x128xbf16, #tpu.memory_space<vmem>>, vector<1x896x128xbf16>
    %189 = vector.shape_cast %188 : vector<1x896x128xbf16> to vector<896x128xbf16>
    %cst_89 = arith.constant dense<0.000000e+00> : vector<8x128xf32>
    %190 = tpu.matmul %187, %189, %cst_89 {dimension_numbers = #tpu.dot_dimension_numbers<[1], [0], [0], [1], [0, 0, 1, 1], [], []>} : vector<8x896xbf16>, vector<896x128xbf16>, vector<8x128xf32> -> vector<8x128xf32>
    %191 = arith.addf %146, %190 : vector<8x128xf32>
    %c4_90 = arith.constant 4 : index
    %c0_91 = arith.constant 0 : index
    %192 = memref.load %arg4[%c4_90, %c0_91] : memref<8x9xf32, #tpu.memory_space<smem>>
    %193 = vector.broadcast %192 : f32 to vector<8x896xf32>
    %194 = arith.mulf %193, %0 : vector<8x896xf32>
    %c4_92 = arith.constant 4 : index
    %c1_93 = arith.constant 1 : index
    %195 = memref.load %arg4[%c4_92, %c1_93] : memref<8x9xf32, #tpu.memory_space<smem>>
    %196 = vector.broadcast %195 : f32 to vector<8x896xf32>
    %197 = arith.mulf %196, %1 : vector<8x896xf32>
    %198 = arith.addf %194, %197 : vector<8x896xf32>
    %c4_94 = arith.constant 4 : index
    %c2_95 = arith.constant 2 : index
    %199 = memref.load %arg4[%c4_94, %c2_95] : memref<8x9xf32, #tpu.memory_space<smem>>
    %200 = vector.broadcast %199 : f32 to vector<8x896xf32>
    %201 = arith.mulf %200, %2 : vector<8x896xf32>
    %202 = arith.addf %198, %201 : vector<8x896xf32>
    %c4_96 = arith.constant 4 : index
    %c3_97 = arith.constant 3 : index
    %203 = memref.load %arg4[%c4_96, %c3_97] : memref<8x9xf32, #tpu.memory_space<smem>>
    %204 = vector.broadcast %203 : f32 to vector<8x896xf32>
    %205 = arith.mulf %204, %3 : vector<8x896xf32>
    %206 = arith.addf %202, %205 : vector<8x896xf32>
    %c4_98 = arith.constant 4 : index
    %c4_99 = arith.constant 4 : index
    %207 = memref.load %arg4[%c4_98, %c4_99] : memref<8x9xf32, #tpu.memory_space<smem>>
    %208 = vector.broadcast %207 : f32 to vector<8x896xf32>
    %209 = arith.mulf %208, %4 : vector<8x896xf32>
    %210 = arith.addf %206, %209 : vector<8x896xf32>
    %c4_100 = arith.constant 4 : index
    %c5_101 = arith.constant 5 : index
    %211 = memref.load %arg4[%c4_100, %c5_101] : memref<8x9xf32, #tpu.memory_space<smem>>
    %212 = vector.broadcast %211 : f32 to vector<8x896xf32>
    %213 = arith.mulf %212, %5 : vector<8x896xf32>
    %214 = arith.addf %210, %213 : vector<8x896xf32>
    %c4_102 = arith.constant 4 : index
    %c6_103 = arith.constant 6 : index
    %215 = memref.load %arg4[%c4_102, %c6_103] : memref<8x9xf32, #tpu.memory_space<smem>>
    %216 = vector.broadcast %215 : f32 to vector<8x896xf32>
    %217 = arith.mulf %216, %6 : vector<8x896xf32>
    %218 = arith.addf %214, %217 : vector<8x896xf32>
    %c4_104 = arith.constant 4 : index
    %c7_105 = arith.constant 7 : index
    %219 = memref.load %arg4[%c4_104, %c7_105] : memref<8x9xf32, #tpu.memory_space<smem>>
    %220 = vector.broadcast %219 : f32 to vector<8x896xf32>
    %221 = arith.mulf %220, %7 : vector<8x896xf32>
    %222 = arith.addf %218, %221 : vector<8x896xf32>
    %c4_106 = arith.constant 4 : index
    %c8_107 = arith.constant 8 : index
    %223 = memref.load %arg4[%c4_106, %c8_107] : memref<8x9xf32, #tpu.memory_space<smem>>
    %224 = vector.broadcast %223 : f32 to vector<8x896xf32>
    %225 = arith.mulf %224, %8 : vector<8x896xf32>
    %226 = arith.addf %222, %225 : vector<8x896xf32>
    %c4_108 = arith.constant 4 : index
    %227 = memref.load %arg5[%c4_108] : memref<8xf32, #tpu.memory_space<smem>>
    %228 = vector.broadcast %227 : f32 to vector<8x896xf32>
    %229 = arith.addf %226, %228 : vector<8x896xf32>
    %cst_109 = arith.constant 0.000000e+00 : f32
    %230 = vector.broadcast %cst_109 : f32 to vector<8x896xf32>
    %231 = arith.maximumf %229, %230 : vector<8x896xf32>
    %232 = arith.truncf %231 : vector<8x896xf32> to vector<8x896xbf16>
    %c4_110 = arith.constant 4 : index
    %c0_111 = arith.constant 0 : index
    %c0_112 = arith.constant 0 : index
    %233 = vector.load %arg2[%c4_110, %c0_111, %c0_112] : memref<8x896x128xbf16, #tpu.memory_space<vmem>>, vector<1x896x128xbf16>
    %234 = vector.shape_cast %233 : vector<1x896x128xbf16> to vector<896x128xbf16>
    %cst_113 = arith.constant dense<0.000000e+00> : vector<8x128xf32>
    %235 = tpu.matmul %232, %234, %cst_113 {dimension_numbers = #tpu.dot_dimension_numbers<[1], [0], [0], [1], [0, 0, 1, 1], [], []>} : vector<8x896xbf16>, vector<896x128xbf16>, vector<8x128xf32> -> vector<8x128xf32>
    %236 = arith.addf %191, %235 : vector<8x128xf32>
    %c5_114 = arith.constant 5 : index
    %c0_115 = arith.constant 0 : index
    %237 = memref.load %arg4[%c5_114, %c0_115] : memref<8x9xf32, #tpu.memory_space<smem>>
    %238 = vector.broadcast %237 : f32 to vector<8x896xf32>
    %239 = arith.mulf %238, %0 : vector<8x896xf32>
    %c5_116 = arith.constant 5 : index
    %c1_117 = arith.constant 1 : index
    %240 = memref.load %arg4[%c5_116, %c1_117] : memref<8x9xf32, #tpu.memory_space<smem>>
    %241 = vector.broadcast %240 : f32 to vector<8x896xf32>
    %242 = arith.mulf %241, %1 : vector<8x896xf32>
    %243 = arith.addf %239, %242 : vector<8x896xf32>
    %c5_118 = arith.constant 5 : index
    %c2_119 = arith.constant 2 : index
    %244 = memref.load %arg4[%c5_118, %c2_119] : memref<8x9xf32, #tpu.memory_space<smem>>
    %245 = vector.broadcast %244 : f32 to vector<8x896xf32>
    %246 = arith.mulf %245, %2 : vector<8x896xf32>
    %247 = arith.addf %243, %246 : vector<8x896xf32>
    %c5_120 = arith.constant 5 : index
    %c3_121 = arith.constant 3 : index
    %248 = memref.load %arg4[%c5_120, %c3_121] : memref<8x9xf32, #tpu.memory_space<smem>>
    %249 = vector.broadcast %248 : f32 to vector<8x896xf32>
    %250 = arith.mulf %249, %3 : vector<8x896xf32>
    %251 = arith.addf %247, %250 : vector<8x896xf32>
    %c5_122 = arith.constant 5 : index
    %c4_123 = arith.constant 4 : index
    %252 = memref.load %arg4[%c5_122, %c4_123] : memref<8x9xf32, #tpu.memory_space<smem>>
    %253 = vector.broadcast %252 : f32 to vector<8x896xf32>
    %254 = arith.mulf %253, %4 : vector<8x896xf32>
    %255 = arith.addf %251, %254 : vector<8x896xf32>
    %c5_124 = arith.constant 5 : index
    %c5_125 = arith.constant 5 : index
    %256 = memref.load %arg4[%c5_124, %c5_125] : memref<8x9xf32, #tpu.memory_space<smem>>
    %257 = vector.broadcast %256 : f32 to vector<8x896xf32>
    %258 = arith.mulf %257, %5 : vector<8x896xf32>
    %259 = arith.addf %255, %258 : vector<8x896xf32>
    %c5_126 = arith.constant 5 : index
    %c6_127 = arith.constant 6 : index
    %260 = memref.load %arg4[%c5_126, %c6_127] : memref<8x9xf32, #tpu.memory_space<smem>>
    %261 = vector.broadcast %260 : f32 to vector<8x896xf32>
    %262 = arith.mulf %261, %6 : vector<8x896xf32>
    %263 = arith.addf %259, %262 : vector<8x896xf32>
    %c5_128 = arith.constant 5 : index
    %c7_129 = arith.constant 7 : index
    %264 = memref.load %arg4[%c5_128, %c7_129] : memref<8x9xf32, #tpu.memory_space<smem>>
    %265 = vector.broadcast %264 : f32 to vector<8x896xf32>
    %266 = arith.mulf %265, %7 : vector<8x896xf32>
    %267 = arith.addf %263, %266 : vector<8x896xf32>
    %c5_130 = arith.constant 5 : index
    %c8_131 = arith.constant 8 : index
    %268 = memref.load %arg4[%c5_130, %c8_131] : memref<8x9xf32, #tpu.memory_space<smem>>
    %269 = vector.broadcast %268 : f32 to vector<8x896xf32>
    %270 = arith.mulf %269, %8 : vector<8x896xf32>
    %271 = arith.addf %267, %270 : vector<8x896xf32>
    %c5_132 = arith.constant 5 : index
    %272 = memref.load %arg5[%c5_132] : memref<8xf32, #tpu.memory_space<smem>>
    %273 = vector.broadcast %272 : f32 to vector<8x896xf32>
    %274 = arith.addf %271, %273 : vector<8x896xf32>
    %cst_133 = arith.constant 0.000000e+00 : f32
    %275 = vector.broadcast %cst_133 : f32 to vector<8x896xf32>
    %276 = arith.maximumf %274, %275 : vector<8x896xf32>
    %277 = arith.truncf %276 : vector<8x896xf32> to vector<8x896xbf16>
    %c5_134 = arith.constant 5 : index
    %c0_135 = arith.constant 0 : index
    %c0_136 = arith.constant 0 : index
    %278 = vector.load %arg2[%c5_134, %c0_135, %c0_136] : memref<8x896x128xbf16, #tpu.memory_space<vmem>>, vector<1x896x128xbf16>
    %279 = vector.shape_cast %278 : vector<1x896x128xbf16> to vector<896x128xbf16>
    %cst_137 = arith.constant dense<0.000000e+00> : vector<8x128xf32>
    %280 = tpu.matmul %277, %279, %cst_137 {dimension_numbers = #tpu.dot_dimension_numbers<[1], [0], [0], [1], [0, 0, 1, 1], [], []>} : vector<8x896xbf16>, vector<896x128xbf16>, vector<8x128xf32> -> vector<8x128xf32>
    %281 = arith.addf %236, %280 : vector<8x128xf32>
    %c6_138 = arith.constant 6 : index
    %c0_139 = arith.constant 0 : index
    %282 = memref.load %arg4[%c6_138, %c0_139] : memref<8x9xf32, #tpu.memory_space<smem>>
    %283 = vector.broadcast %282 : f32 to vector<8x896xf32>
    %284 = arith.mulf %283, %0 : vector<8x896xf32>
    %c6_140 = arith.constant 6 : index
    %c1_141 = arith.constant 1 : index
    %285 = memref.load %arg4[%c6_140, %c1_141] : memref<8x9xf32, #tpu.memory_space<smem>>
    %286 = vector.broadcast %285 : f32 to vector<8x896xf32>
    %287 = arith.mulf %286, %1 : vector<8x896xf32>
    %288 = arith.addf %284, %287 : vector<8x896xf32>
    %c6_142 = arith.constant 6 : index
    %c2_143 = arith.constant 2 : index
    %289 = memref.load %arg4[%c6_142, %c2_143] : memref<8x9xf32, #tpu.memory_space<smem>>
    %290 = vector.broadcast %289 : f32 to vector<8x896xf32>
    %291 = arith.mulf %290, %2 : vector<8x896xf32>
    %292 = arith.addf %288, %291 : vector<8x896xf32>
    %c6_144 = arith.constant 6 : index
    %c3_145 = arith.constant 3 : index
    %293 = memref.load %arg4[%c6_144, %c3_145] : memref<8x9xf32, #tpu.memory_space<smem>>
    %294 = vector.broadcast %293 : f32 to vector<8x896xf32>
    %295 = arith.mulf %294, %3 : vector<8x896xf32>
    %296 = arith.addf %292, %295 : vector<8x896xf32>
    %c6_146 = arith.constant 6 : index
    %c4_147 = arith.constant 4 : index
    %297 = memref.load %arg4[%c6_146, %c4_147] : memref<8x9xf32, #tpu.memory_space<smem>>
    %298 = vector.broadcast %297 : f32 to vector<8x896xf32>
    %299 = arith.mulf %298, %4 : vector<8x896xf32>
    %300 = arith.addf %296, %299 : vector<8x896xf32>
    %c6_148 = arith.constant 6 : index
    %c5_149 = arith.constant 5 : index
    %301 = memref.load %arg4[%c6_148, %c5_149] : memref<8x9xf32, #tpu.memory_space<smem>>
    %302 = vector.broadcast %301 : f32 to vector<8x896xf32>
    %303 = arith.mulf %302, %5 : vector<8x896xf32>
    %304 = arith.addf %300, %303 : vector<8x896xf32>
    %c6_150 = arith.constant 6 : index
    %c6_151 = arith.constant 6 : index
    %305 = memref.load %arg4[%c6_150, %c6_151] : memref<8x9xf32, #tpu.memory_space<smem>>
    %306 = vector.broadcast %305 : f32 to vector<8x896xf32>
    %307 = arith.mulf %306, %6 : vector<8x896xf32>
    %308 = arith.addf %304, %307 : vector<8x896xf32>
    %c6_152 = arith.constant 6 : index
    %c7_153 = arith.constant 7 : index
    %309 = memref.load %arg4[%c6_152, %c7_153] : memref<8x9xf32, #tpu.memory_space<smem>>
    %310 = vector.broadcast %309 : f32 to vector<8x896xf32>
    %311 = arith.mulf %310, %7 : vector<8x896xf32>
    %312 = arith.addf %308, %311 : vector<8x896xf32>
    %c6_154 = arith.constant 6 : index
    %c8_155 = arith.constant 8 : index
    %313 = memref.load %arg4[%c6_154, %c8_155] : memref<8x9xf32, #tpu.memory_space<smem>>
    %314 = vector.broadcast %313 : f32 to vector<8x896xf32>
    %315 = arith.mulf %314, %8 : vector<8x896xf32>
    %316 = arith.addf %312, %315 : vector<8x896xf32>
    %c6_156 = arith.constant 6 : index
    %317 = memref.load %arg5[%c6_156] : memref<8xf32, #tpu.memory_space<smem>>
    %318 = vector.broadcast %317 : f32 to vector<8x896xf32>
    %319 = arith.addf %316, %318 : vector<8x896xf32>
    %cst_157 = arith.constant 0.000000e+00 : f32
    %320 = vector.broadcast %cst_157 : f32 to vector<8x896xf32>
    %321 = arith.maximumf %319, %320 : vector<8x896xf32>
    %322 = arith.truncf %321 : vector<8x896xf32> to vector<8x896xbf16>
    %c6_158 = arith.constant 6 : index
    %c0_159 = arith.constant 0 : index
    %c0_160 = arith.constant 0 : index
    %323 = vector.load %arg2[%c6_158, %c0_159, %c0_160] : memref<8x896x128xbf16, #tpu.memory_space<vmem>>, vector<1x896x128xbf16>
    %324 = vector.shape_cast %323 : vector<1x896x128xbf16> to vector<896x128xbf16>
    %cst_161 = arith.constant dense<0.000000e+00> : vector<8x128xf32>
    %325 = tpu.matmul %322, %324, %cst_161 {dimension_numbers = #tpu.dot_dimension_numbers<[1], [0], [0], [1], [0, 0, 1, 1], [], []>} : vector<8x896xbf16>, vector<896x128xbf16>, vector<8x128xf32> -> vector<8x128xf32>
    %326 = arith.addf %281, %325 : vector<8x128xf32>
    %c7_162 = arith.constant 7 : index
    %c0_163 = arith.constant 0 : index
    %327 = memref.load %arg4[%c7_162, %c0_163] : memref<8x9xf32, #tpu.memory_space<smem>>
    %328 = vector.broadcast %327 : f32 to vector<8x896xf32>
    %329 = arith.mulf %328, %0 : vector<8x896xf32>
    %c7_164 = arith.constant 7 : index
    %c1_165 = arith.constant 1 : index
    %330 = memref.load %arg4[%c7_164, %c1_165] : memref<8x9xf32, #tpu.memory_space<smem>>
    %331 = vector.broadcast %330 : f32 to vector<8x896xf32>
    %332 = arith.mulf %331, %1 : vector<8x896xf32>
    %333 = arith.addf %329, %332 : vector<8x896xf32>
    %c7_166 = arith.constant 7 : index
    %c2_167 = arith.constant 2 : index
    %334 = memref.load %arg4[%c7_166, %c2_167] : memref<8x9xf32, #tpu.memory_space<smem>>
    %335 = vector.broadcast %334 : f32 to vector<8x896xf32>
    %336 = arith.mulf %335, %2 : vector<8x896xf32>
    %337 = arith.addf %333, %336 : vector<8x896xf32>
    %c7_168 = arith.constant 7 : index
    %c3_169 = arith.constant 3 : index
    %338 = memref.load %arg4[%c7_168, %c3_169] : memref<8x9xf32, #tpu.memory_space<smem>>
    %339 = vector.broadcast %338 : f32 to vector<8x896xf32>
    %340 = arith.mulf %339, %3 : vector<8x896xf32>
    %341 = arith.addf %337, %340 : vector<8x896xf32>
    %c7_170 = arith.constant 7 : index
    %c4_171 = arith.constant 4 : index
    %342 = memref.load %arg4[%c7_170, %c4_171] : memref<8x9xf32, #tpu.memory_space<smem>>
    %343 = vector.broadcast %342 : f32 to vector<8x896xf32>
    %344 = arith.mulf %343, %4 : vector<8x896xf32>
    %345 = arith.addf %341, %344 : vector<8x896xf32>
    %c7_172 = arith.constant 7 : index
    %c5_173 = arith.constant 5 : index
    %346 = memref.load %arg4[%c7_172, %c5_173] : memref<8x9xf32, #tpu.memory_space<smem>>
    %347 = vector.broadcast %346 : f32 to vector<8x896xf32>
    %348 = arith.mulf %347, %5 : vector<8x896xf32>
    %349 = arith.addf %345, %348 : vector<8x896xf32>
    %c7_174 = arith.constant 7 : index
    %c6_175 = arith.constant 6 : index
    %350 = memref.load %arg4[%c7_174, %c6_175] : memref<8x9xf32, #tpu.memory_space<smem>>
    %351 = vector.broadcast %350 : f32 to vector<8x896xf32>
    %352 = arith.mulf %351, %6 : vector<8x896xf32>
    %353 = arith.addf %349, %352 : vector<8x896xf32>
    %c7_176 = arith.constant 7 : index
    %c7_177 = arith.constant 7 : index
    %354 = memref.load %arg4[%c7_176, %c7_177] : memref<8x9xf32, #tpu.memory_space<smem>>
    %355 = vector.broadcast %354 : f32 to vector<8x896xf32>
    %356 = arith.mulf %355, %7 : vector<8x896xf32>
    %357 = arith.addf %353, %356 : vector<8x896xf32>
    %c7_178 = arith.constant 7 : index
    %c8_179 = arith.constant 8 : index
    %358 = memref.load %arg4[%c7_178, %c8_179] : memref<8x9xf32, #tpu.memory_space<smem>>
    %359 = vector.broadcast %358 : f32 to vector<8x896xf32>
    %360 = arith.mulf %359, %8 : vector<8x896xf32>
    %361 = arith.addf %357, %360 : vector<8x896xf32>
    %c7_180 = arith.constant 7 : index
    %362 = memref.load %arg5[%c7_180] : memref<8xf32, #tpu.memory_space<smem>>
    %363 = vector.broadcast %362 : f32 to vector<8x896xf32>
    %364 = arith.addf %361, %363 : vector<8x896xf32>
    %cst_181 = arith.constant 0.000000e+00 : f32
    %365 = vector.broadcast %cst_181 : f32 to vector<8x896xf32>
    %366 = arith.maximumf %364, %365 : vector<8x896xf32>
    %367 = arith.truncf %366 : vector<8x896xf32> to vector<8x896xbf16>
    %c7_182 = arith.constant 7 : index
    %c0_183 = arith.constant 0 : index
    %c0_184 = arith.constant 0 : index
    %368 = vector.load %arg2[%c7_182, %c0_183, %c0_184] : memref<8x896x128xbf16, #tpu.memory_space<vmem>>, vector<1x896x128xbf16>
    %369 = vector.shape_cast %368 : vector<1x896x128xbf16> to vector<896x128xbf16>
    %cst_185 = arith.constant dense<0.000000e+00> : vector<8x128xf32>
    %370 = tpu.matmul %367, %369, %cst_185 {dimension_numbers = #tpu.dot_dimension_numbers<[1], [0], [0], [1], [0, 0, 1, 1], [], []>} : vector<8x896xbf16>, vector<896x128xbf16>, vector<8x128xf32> -> vector<8x128xf32>
    %371 = arith.addf %326, %370 : vector<8x128xf32>
    %c0_186 = arith.constant 0 : index
    %c0_187 = arith.constant 0 : index
    %372 = vector.load %arg6[%c0_186, %c0_187] : memref<8x128xf32, #tpu.memory_space<vmem>>, vector<8x128xf32>
    tpu.vector_store %arg6[%c0_186, %c0_187], %371 {strides = array<i32>} : memref<8x128xf32, #tpu.memory_space<vmem>>, vector<8x128xf32>,
    return
  }
  func.func @transform_0(%arg0: i32) -> (i32, i32) {
    %c0_i32 = arith.constant 0 : i32
    %c0_i32_0 = arith.constant 0 : i32
    return %arg0, %c0_i32 : i32, i32
  }
  func.func @transform_1(%arg0: i32) -> (i32, i32, i32) {
    %c0_i32 = arith.constant 0 : i32
    %c0_i32_0 = arith.constant 0 : i32
    %c0_i32_1 = arith.constant 0 : i32
    %c0_i32_2 = arith.constant 0 : i32
    return %c0_i32, %c0_i32_0, %c0_i32_1 : i32, i32, i32
  }
  func.func @transform_2(%arg0: i32) -> (i32, i32) {
    %c0_i32 = arith.constant 0 : i32
    %c0_i32_0 = arith.constant 0 : i32
    %c0_i32_1 = arith.constant 0 : i32
    return %c0_i32, %c0_i32_0 : i32, i32
  }
  func.func @transform_3(%arg0: i32) -> (i32, i32) {
    %c0_i32 = arith.constant 0 : i32
    %c0_i32_0 = arith.constant 0 : i32
    %c0_i32_1 = arith.constant 0 : i32
    return %c0_i32, %c0_i32_0 : i32, i32
  }
  func.func @transform_4(%arg0: i32) -> i32 {
    %c0_i32 = arith.constant 0 : i32
    %c0_i32_0 = arith.constant 0 : i32
    return %c0_i32 : i32
  }
  func.func @transform_5(%arg0: i32) -> (i32, i32) {
    %c0_i32 = arith.constant 0 : i32
    %c0_i32_0 = arith.constant 0 : i32
    return %arg0, %c0_i32 : i32, i32
  }
}

</mosaic_0001>

<bundles_post_ra>
// kernel: simple_cnn_forward.1
= control target key start
LH: loop header
LB: loop body
LE: loop exit
PB: predicated region body
PF: predicated region fallthrough
CT: control target
= control target key end

     0   :  { %10 = vsyncpa [#allocation3], 0  ;;  %s12871_s0 = inlined_call_operand.vmem [shape: f32[8,896], index: 0, kind: input, shape index: {}]   ;;  %s12872_s1 = inlined_call_operand.vmem [shape: bf16[8,896,128], index: 1, kind: input, shape index: {}]   ;;  %s12873_s2 = inlined_call_operand.vmem [shape: f32[1,128], index: 2, kind: input, shape index: {}]   ;;  %s12874_s3 = inlined_call_operand.vmem [shape: f32[8,9], index: 3, kind: input, shape index: {}]   ;;  %s12875_s4 = inlined_call_operand.vmem [shape: f32[8], index: 4, kind: input, shape index: {}]   ;;  %s12876_s5 = inlined_call_operand.vmem [shape: f32[8,128], index: 5, kind: output, shape index: {}]  }
   0x1   :  { %s24_s20 = sshll.u32 %s12874_s3, 4  ;;  %s25_s20 = int_to_ptr.vmem [resolvable:$true] %s24_s20 }
   0x2   :  { %11 = vsyncpa [#allocation5], 0  ;;  %s34_s23 = sshll.u32 %s12875_s4, 4  ;;  %s8941_s24 = scalar_lea.vmem %s25_s20, 128  ;;  %s35_s23 = int_to_ptr.vmem [resolvable:$true] %s34_s23 }
   0x3   :  { %p8942_p0 = scmp.ne.s32.totalorder %s25_s20, %s8941_s24  ;;  %p8946_p1 = scmp.lt.s32.totalorder %s25_s20, %s25_s20 }
   0x4   :  { %p8947_p2 = scmp.lt.s32.totalorder %s8941_s24, %s8941_s24 }
   0x6   :  { %p8948_p3 = por %p8947_p2, %p8946_p1 }
   0x8   :  { %p8949_p4 = pnand %p8948_p3, %p8942_p0 }
   0xa   :  { %8952 = shalt.err (!%p8949_p4)
}
   0xb   :  { %s8969_s25 = smov [#allocation2]   ;;  %s8953_s26 = scalar_lea.vmem %s35_s23, 16 }
   0xc   :  { %27 = dma.vmem_to_smem %s25_s20, 128, %s8969_s25, [#allocation3]  }
   0xd   :  { %p8954_p5 = scmp.ne.s32.totalorder %s35_s23, %s8953_s26  ;;  %p8958_p6 = scmp.lt.s32.totalorder %s35_s23, %s35_s23 }
   0xe   :  { %p8959_p7 = scmp.lt.s32.totalorder %s8953_s26, %s8953_s26 }
  0x10   :  { %p8960_p8 = por %p8959_p7, %p8958_p6 }
  0x12   :  { %p8961_p9 = pnand %p8960_p8, %p8954_p5 }
  0x14   :  { %8964 = shalt.err (!%p8961_p9)
}
  0x15   :  { %s8970_s3 = smov [#allocation4]  }
  0x16   :  { %37 = dma.vmem_to_smem %s35_s23, 16, %s8970_s3, [#allocation5]  }
  0x17   :  { %8965 = dma.done.wait [#allocation3], 128  }
  0x18   :  { %8966 = vsyncadd [#allocation3], 4294967168 }
  0x19   :  { %8967 = dma.done.wait [#allocation5], 16  }
  0x1a   :  { %8968 = vsyncadd [#allocation5], 4294967280 }
  0x1b   :  { %44 = sfence }
  0x1c   :  { %v9020_v0 = vld [vmem:[%s12871_s0 + $0x8] sm:$0xff]  ;;  %v9025_v1 = vld [vmem:[%s12871_s0] sm:$0xff]  ;;  %s8971_s30 = smov 127   ;;  %v9034_v2 = vld [vmem:[%s12871_s0 + $0x10] sm:$0xff]  ;;  %s8972_s8 = smov 126   ;;  %v67_v56 = vlaneseq  ;;  %v12877_v60 = vmov 0.0  }
  0x1d   :  { %55 = vrot.lane.b32.xlu0 %v9020_v0, %s8971_s30  ;;  %53 = vrot.lane.b32.xlu1 %v9025_v1, %s8971_s30  ;;  %s8973_s9 = smov 100   ;;  %v9051_v3 = vld [vmem:[%s12871_s0 + $0x18] sm:$0xff]  ;;  %v9056_v4 = vld [vmem:[%s12871_s0 + $0x20] sm:$0xff]  ;;  %s8974_s14 = smov 99   ;;  %vm8980_vm8 = vmmov 0  }
  0x1e   :  { %s8975_s15 = smov 98   ;;  %v8487_v5 = vld [vmem:[%s12872_s1 + $0x78] sm:$0xff]   ;;  %v8489_v7 = vld [vmem:[%s12872_s1 + $0x70] sm:$0xff]   ;;  %s8976_s26 = smov 72   ;;  %v8491_v10 = vld [vmem:[%s12872_s1 + $0x68] sm:$0xff]   ;;  %v9314_v57 = vand.u32 127, %v67_v56 }
  0x1f   :  { %v8488_v6 = vld [vmem:[%s12872_s1 + $0x38] sm:$0xff]   ;;  %7715 = vmatprep.subr.bf16.mxu0 %v8487_v5  ;;  %v8490_v8 = vld [vmem:[%s12872_s1 + $0x30] sm:$0xff]   ;;  %v8493_v11 = vld [vmem:[%s12872_s1 + $0x28] sm:$0xff]   ;;  %s9136_s23 = sld [smem:[#allocation2]]  ;;  %s8977_s27 = smov 71  }
  0x20   :  { %7716 = vmatpush3.bf16.msra.mxu0 %v8488_v6  ;;  %v8492_v9 = vld [vmem:[%s12872_s1 + $0xf8] sm:$0xff]   ;;  %v8495_v13 = vld [vmem:[%s12872_s1 + $0x60] sm:$0xff]   ;;  %v8496_v14 = vld [vmem:[%s12872_s1 + $0xf0] sm:$0xff]   ;;  %s9148_s28 = sld [smem:[#allocation2 + $0x80]]  ;;  %s8978_s10 = smov 70   ;;  %vm69_vm0 = vcmp.lt.s32.totalorder %v9314_v57, 127 }
  0x21   :  { %57 = vrot.lane.b32.xlu0 %v9034_v2, %s8971_s30  ;;  %79 = vrot.lane.b32.xlu1 %v9020_v0, %s8972_s8  ;;  %v8494_v12 = vld [vmem:[%s12872_s1 + $0xb8] sm:$0xff]   ;;  %v8497_v15 = vld [vmem:[%s12872_s1 + $0x20] sm:$0xff]   ;;  %s9156_s11 = sld [smem:[#allocation2 + $0x100]]  ;;  %vm91_vm1 = vcmp.lt.s32.totalorder %v9314_v57, 126  ;;  %vm113_vm2 = vcmp.lt.s32.totalorder %v9314_v57, 100  ;;  %vm135_vm3 = vcmp.lt.s32.totalorder %v9314_v57, 99 }
  0x22   :  { %7717 = vmatprep.subr.bf16.mxu0 %v8489_v7  ;;  %7737 = vmatprep.subr.bf16.mxu1 %v8492_v9  ;;  %v8498_v16 = vld [vmem:[%s12872_s1 + $0xb0] sm:$0xff]   ;;  %v8499_v17 = vld [vmem:[%s12872_s1 + $0x58] sm:$0xff]   ;;  %v8500_v18 = vld [vmem:[%s12872_s1 + $0xe8] sm:$0xff]   ;;  %s9168_s18 = sld [smem:[#allocation2 + $0x180]]  ;;  %vm157_vm4 = vcmp.lt.s32.totalorder %v9314_v57, 98  ;;  %vm179_vm5 = vcmp.lt.s32.totalorder %v9314_v57, 72 }
  0x23   :  { %7738 = vmatpush3.bf16.msra.mxu1 %v8494_v12  ;;  %v8501_v19 = vld [vmem:[%s12872_s1 + $0x18] sm:$0xff]   ;;  %v8502_v20 = vld [vmem:[%s12872_s1 + $0xa8] sm:$0xff]   ;;  %v8503_v21 = vld [vmem:[%s12872_s1 + $0x50] sm:$0xff]   ;;  %s9176_s24 = sld [smem:[#allocation2 + $0x200]]  ;;  %vm201_vm6 = vcmp.lt.s32.totalorder %v9314_v57, 71  ;;  %vm223_vm7 = vcmp.lt.s32.totalorder %v9314_v57, 70 }
  0x24   :  { %7718 = vmatpush3.bf16.msra.mxu0 %v8490_v8  ;;  %7739 = vmatprep.subr.bf16.mxu1 %v8496_v14  ;;  %v8504_v22 = vld [vmem:[%s12872_s1 + $0xe0] sm:$0xff]   ;;  %v8505_v23 = vld [vmem:[%s12872_s1 + $0x10] sm:$0xff]   ;;  %v8507_v25 = vld [vmem:[%s12872_s1 + $0x48] sm:$0xff]   ;;  %s7181_s12 = sld [smem:[#allocation2 + $0x280]] }
  0x25   :  { %81 = vrot.lane.b32.xlu0 %v9034_v2, %s8972_s8  ;;  %77 = vrot.lane.b32.xlu1 %v9025_v1, %s8972_s8  ;;  %v8506_v24 = vld [vmem:[%s12872_s1 + $0xa0] sm:$0xff]   ;;  %v8508_v26 = vld [vmem:[%s12872_s1 + $0xd8] sm:$0xff]   ;;  %s9197_s17 = sld [smem:[#allocation2 + $0x300]] }
  0x26   :  { %7719 = vmatprep.subr.bf16.mxu0 %v8491_v10  ;;  %v8509_v27 = vld [vmem:[%s12872_s1 + $0x8] sm:$0xff]   ;;  %v8510_v28 = vld [vmem:[%s12872_s1 + $0x98] sm:$0xff]   ;;  %v8511_v29 = vld [vmem:[%s12872_s1 + $0x40] sm:$0xff]   ;;  %v9195_v31 = vstv %s9136_s23  ;;  %s7537_s23 = sld [smem:[#allocation2 + $0x380]] }
  0x27   :  { %7740 = vmatpush3.bf16.msra.mxu1 %v8498_v16  ;;  %v8512_v30 = vld [vmem:[%s12872_s1 + $0xd0] sm:$0xff]   ;;  %13081 = vst [vmem:[#allocation8_spill] sm:$0xff] %v9195_v31  ;;  %v8513_v32 = vld [vmem:[%s12872_s1] sm:$0xff]   ;;  %v9207_v34 = vmul.f32 %v9195_v31, %v9056_v4  ;;  %v8515_v35 = vld [vmem:[%s12872_s1 + $0xc8] sm:$0xff]   ;;  %v9217_v36 = vstv %s9148_s28  ;;  %s9232_s28 = sld [smem:[#allocation2 + $0x1]]  ;;  %v9360_v5 = vmul.f32 %v9195_v31, %v9034_v2 }
  0x28   :  { %7720 = vmatpush3.bf16.msra.mxu0 %v8493_v11  ;;  %7741 = vmatprep.subr.bf16.mxu1 %v8500_v18  ;;  %v8514_v33 = vld [vmem:[%s12872_s1 + $0x90] sm:$0xff]   ;;  %13083 = vst [vmem:[#allocation10_spill] sm:$0xff] %v9217_v36  ;;  %v9220_v37 = vstv %s9156_s11  ;;  %v51_v38 = vld [vmem:[%s12871_s0 + $0x28] sm:$0xff]  ;;  %v9235_v40 = vstv %s9168_s18  ;;  %s9252_s11 = sld [smem:[#allocation2 + $0x81]]  ;;  %v9354_v63 = vmul.f32 %v9217_v36, %v9025_v1  ;;  %v9371_v8 = vmul.f32 %v9217_v36, %v9034_v2 }
  0x29   :  { %101 = vrot.lane.b32.xlu0 %v9020_v0, %s8973_s9  ;;  %103 = vrot.lane.b32.xlu1 %v9034_v2, %s8973_s9  ;;  %13082 = vst [vmem:[#allocation9_spill] sm:$0xff] %v9207_v34  ;;  %13084 = vst [vmem:[#allocation11_spill] sm:$0xff] %v9220_v37  ;;  %v52_v39 = vld [vmem:[%s12871_s0 + $0x30] sm:$0xff]  ;;  %v9238_v41 = vstv %s9176_s24  ;;  %v9243_v43 = vmul.f32 %v9195_v31, %v51_v38  ;;  %s9277_s18 = sld [smem:[#allocation2 + $0x101]]  ;;  %v9367_v7 = vmul.f32 %v9220_v37, %v9025_v1 }
  0x2a   :  { %7721 = vmatprep.subr.bf16.mxu0 %v8495_v13  ;;  %13085 = vst [vmem:[#allocation12_spill] sm:$0xff] %v9235_v40  ;;  %13086 = vst [vmem:[#allocation13_spill] sm:$0xff] %v9238_v41  ;;  %v9240_v42 = vstv %s7181_s12  ;;  %v9246_v44 = vmul.f32 %v9195_v31, %v52_v39  ;;  %v9255_v45 = vmul.f32 %v9217_v36, %v52_v39  ;;  %s9286_s24 = sld [smem:[#allocation2 + $0x181]]  ;;  %v8516_v54 = vld [vmem:[%s12872_s1 + $0x88] sm:$0xff]   ;;  %v8517_v55 = vld [vmem:[%s12872_s1 + $0xc0] sm:$0xff]  }
  0x2b   :  { %7742 = vmatpush3.bf16.msra.mxu1 %v8502_v20  ;;  %13087 = vst [vmem:[#allocation14_spill] sm:$0xff] %v9240_v42  ;;  %13088 = vst [vmem:[#allocation15_spill] sm:$0xff] %v9243_v43  ;;  %v9258_v46 = vmul.f32 %v9220_v37, %v52_v39  ;;  %v9261_v47 = vstv %s9197_s17  ;;  %v9264_v48 = vmul.f32 %v9235_v40, %v52_v39  ;;  %s9288_s12 = sld [smem:[#allocation2 + $0x201]]  ;;  %v8518_v58 = vld [vmem:[%s12872_s1 + $0x80] sm:$0xff]   ;;  %v8519_v59 = vld [vmem:[%s12872_s1 + $0x178] sm:$0xff]  }
  0x2c   :  { %7722 = vmatpush3.bf16.msra.mxu0 %v8497_v15  ;;  %7743 = vmatprep.subr.bf16.mxu1 %v8504_v22  ;;  %13089 = vst [vmem:[#allocation16_spill] sm:$0xff] %v9246_v44  ;;  %13090 = vst [vmem:[#allocation17_spill] sm:$0xff] %v9255_v45  ;;  %v9267_v49 = vmul.f32 %v9238_v41, %v52_v39  ;;  %v9269_v50 = vstv %s7537_s23  ;;  %v9272_v51 = vmul.f32 %v9240_v42, %v52_v39  ;;  %s9298_s20 = sld [smem:[#allocation2 + $0x281]] }
  0x2d   :  { %59 = vrot.lane.b32.xlu0 %v9051_v3, %s8971_s30  ;;  %61 = vrot.lane.b32.xlu1 %v9056_v4, %s8971_s30  ;;  %13091 = vst [vmem:[#allocation18_spill] sm:$0xff] %v9258_v46  ;;  %13092 = vst [vmem:[#allocation19_spill] sm:$0xff] %v9264_v48  ;;  %v9275_v52 = vmul.f32 %v9261_v47, %v52_v39  ;;  %v9280_v53 = vmul.f32 %v9269_v50, %v52_v39  ;;  %s9302_s21 = sld [smem:[#allocation2 + $0x301]]  ;;  %v9345_v61 = vstv %s9232_s28 }
  0x2e   :  { %7723 = vmatprep.subr.bf16.mxu0 %v8499_v17  ;;  %13093 = vst [vmem:[#allocation20_spill] sm:$0xff] %v9267_v49  ;;  %13094 = vst [vmem:[#allocation21_spill] sm:$0xff] %v9272_v51  ;;  %s9304_s22 = sld [smem:[#allocation2 + $0x381]]  ;;  %v9350_v62 = vstv %s9252_s11  ;;  %v9375_v9 = vmul.f32 %v9217_v36, %v9051_v3  ;;  %v1780_v11 = vmul.f32 %v9220_v37, %v9020_v0 }
  0x2f   :  { %7744 = vmatpush3.bf16.msra.mxu1 %v8506_v24  ;;  %13095 = vst [vmem:[#allocation22_spill] sm:$0xff] %v9275_v52  ;;  %13096 = vst [vmem:[#allocation23_spill] sm:$0xff] %v9280_v53  ;;  %s9308_s23 = sld [smem:[#allocation2 + $0x82]]  ;;  %v9363_v6 = vstv %s9277_s18  ;;  %v9384_v12 = vmul.f32 %v9220_v37, %v9034_v2  ;;  %v9388_v13 = vmul.f32 %v9220_v37, %v9051_v3 }
  0x30   :  { %7724 = vmatpush3.bf16.msra.mxu0 %v8501_v19  ;;  %7745 = vmatprep.subr.bf16.mxu1 %v8508_v26  ;;  %s9335_s6 = sld [smem:[#allocation2 + $0x302]]  ;;  %13097 = vst [vmem:[#allocation24_spill] sm:$0xff] %v9345_v61  ;;  %13098 = vst [vmem:[#allocation25_spill] sm:$0xff] %v9350_v62  ;;  %v9378_v10 = vstv %s9286_s24  ;;  %v2549_v16 = vmul.f32 %v9235_v40, %v9025_v1  ;;  %v2550_v17 = vmul.f32 %v9235_v40, %v9020_v0 }
  0x31   :  { %99 = vrot.lane.b32.xlu0 %v9025_v1, %s8973_s9  ;;  %123 = vrot.lane.b32.xlu1 %v9020_v0, %s8974_s14  ;;  %s9337_s7 = sld [smem:[#allocation2 + $0x382]]  ;;  %13099 = vst [vmem:[#allocation26_spill] sm:$0xff] %v9363_v6  ;;  %13100 = vst [vmem:[#allocation27_spill] sm:$0xff] %v9375_v9  ;;  %v9391_v14 = vstv %s9288_s12  ;;  %v9411_v22 = vmul.f32 %v9235_v40, %v9034_v2  ;;  %v9425_v26 = vmul.f32 %v9238_v41, %v9034_v2 }
  0x32   :  { %7725 = vmatprep.subr.bf16.mxu0 %v8503_v21  ;;  %13101 = vst [vmem:[#allocation28_spill] sm:$0xff] %v9378_v10  ;;  %13102 = vst [vmem:[#allocation29_spill] sm:$0xff] %v9384_v12  ;;  %v9394_v15 = vstv %s9298_s20  ;;  %v3319_v21 = vmul.f32 %v9238_v41, %v9025_v1  ;;  %v4860_v56 = vmul.f32 %v9261_v47, %v9020_v0  ;;  %s9498_s28 = sld [smem:[#allocation2 + $0x283]] }
  0x33   :  { %7746 = vmatpush3.bf16.msra.mxu1 %v8510_v28  ;;  %13103 = vst [vmem:[#allocation30_spill] sm:$0xff] %v9388_v13  ;;  %13104 = vst [vmem:[#allocation31_spill] sm:$0xff] %v9391_v14  ;;  %v9403_v19 = vstv %s9302_s21  ;;  %v5630_v44 = vmul.f32 %v9269_v50, %v9020_v0  ;;  %s9567_s11 = sld [smem:[#allocation2 + $0x303]] }
  0x34   :  { %7726 = vmatpush3.bf16.msra.mxu0 %v8505_v23  ;;  %7747 = vmatprep.subr.bf16.mxu1 %v8512_v30  ;;  %13105 = vst [vmem:[#allocation32_spill] sm:$0xff] %v9394_v15  ;;  %13106 = vst [vmem:[#allocation33_spill] sm:$0xff] %v9403_v19  ;;  %v9415_v23 = vmul.f32 %v9235_v40, %v9051_v3  ;;  %v9418_v24 = vstv %s9304_s22  ;;  %v4090_v30 = vmul.f32 %v9240_v42, %v9020_v0  ;;  %s9595_s12 = sld [smem:[#allocation2 + $0x383]] }
  0x35   :  { %125 = vrot.lane.b32.xlu0 %v9034_v2, %s8974_s14  ;;  %83 = vrot.lane.b32.xlu1 %v9051_v3, %s8972_s8  ;;  %13108 = vst [vmem:[#allocation35_spill] sm:$0xff] %v9411_v22  ;;  %13110 = vst [vmem:[#allocation37_spill] sm:$0xff] %v9418_v24  ;;  %s9745_s17 = sld [smem:[#allocation2 + $0x2]] }
  0x36   :  { %7727 = vmatprep.subr.bf16.mxu0 %v8507_v25  ;;  %13109 = vst [vmem:[#allocation36_spill] sm:$0xff] %v9415_v23  ;;  %v3320_v25 = vmul.f32 %v9238_v41, %v9020_v0  ;;  %13111 = vst [vmem:[#allocation38_spill] sm:$0xff] %v9425_v26  ;;  %s9751_s19 = sld [smem:[#allocation2 + $0x3]] }
  0x37   :  { %7748 = vmatpush3.bf16.msra.mxu1 %v8514_v33  ;;  %v9477_v53 = vstv %s9337_s7  ;;  %s9753_s20 = sld [smem:[#allocation2 + $0x84]] }
  0x38   :  { %7728 = vmatpush3.bf16.msra.mxu0 %v8509_v27  ;;  %7749 = vmatprep.subr.bf16.mxu1 %v8515_v35  ;;  %v9429_v27 = vmul.f32 %v9238_v41, %v9051_v3  ;;  %13118 = vst [vmem:[#allocation45_spill] sm:$0xff] %v9477_v53  ;;  %s9759_s21 = sld [smem:[#allocation2 + $0x85]] }
  0x39   :  { %85 = vrot.lane.b32.xlu0 %v9056_v4, %s8972_s8  ;;  %121 = vrot.lane.b32.xlu1 %v9025_v1, %s8974_s14  ;;  %s9772_s22 = sld [smem:[#allocation2 + $0x4]] }
  0x3a   :  { %7729 = vmatprep.subr.bf16.mxu0 %v8511_v29  ;;  %13112 = vst [vmem:[#allocation39_spill] sm:$0xff] %v9429_v27  ;;  %v4089_v29 = vmul.f32 %v9240_v42, %v9025_v1  ;;  %s9818_s3 = sld [smem:[#allocation2 + $0x7]] }
  0x3b   :  { %7750 = vmatpush3.bf16.msra.mxu1 %v8516_v54  ;;  %v5629_v54 = vmul.f32 %v9269_v50, %v9025_v1  ;;  %s10366_s18 = sld [smem:[#allocation2 + $0x86]] }
  0x3c   :  { %7730 = vmatpush3.bf16.msra.mxu0 %v8513_v32  ;;  %7751 = vmatprep.subr.bf16.mxu1 %v8517_v55  ;;  %v9441_v32 = vstv %s9308_s23  ;;  %s9780_s23 = sld [smem:[#allocation2 + $0x5]] }
  0x3d   :  { %145 = vrot.lane.b32.xlu0 %v9020_v0, %s8975_s15  ;;  %147 = vrot.lane.b32.xlu1 %v9034_v2, %s8975_s15  ;;  %s10377_s24 = sld [smem:[#allocation2 + $0x87]] }
  0x3e   :  { %7759 = vmatprep.subr.bf16.mxu0 %v8519_v59  ;;  %v9468_v59 = vstv %s9335_s6  ;;  %s10630_s4 = sld [smem:[#allocation2 + $0x104]] }
  0x3f   :  { %7752 = vmatpush3.bf16.msra.mxu1 %v8518_v58  ;;  %13117 = vst [vmem:[#allocation44_spill] sm:$0xff] %v9468_v59  ;;  %s10745_s7 = sld [smem:[#allocation2 + $0x107]] }
  0x40   :  { %8315 = vmatprep.subr.bf16.mxu1 %v12877_v60  ;;  %s10787_s13 = sld [smem:[#allocation2 + $0x185]] }
  0x41   :  { %105 = vrot.lane.b32.xlu0 %v9051_v3, %s8973_s9  ;;  %107 = vrot.lane.b32.xlu1 %v9056_v4, %s8973_s9  ;;  %s11059_s25 = sld [smem:[#allocation2 + $0x284]] }
  0x42   :  { %s11070_s29 = sld [smem:[#allocation2 + $0x285]] }
  0x43   :  { %s11127_s16 = sld [smem:[#allocation2 + $0x207]] }
  0x45   :  { %143 = vrot.lane.b32.xlu0 %v9025_v1, %s8975_s15  ;;  %167 = vrot.lane.b32.xlu1 %v9020_v0, %s8976_s26 }
  0x49   :  { %169 = vrot.lane.b32.xlu0 %v9034_v2, %s8976_s26  ;;  %127 = vrot.lane.b32.xlu1 %v9051_v3, %s8974_s14 }
  0x4d   :  { %129 = vrot.lane.b32.xlu0 %v9056_v4, %s8974_s14  ;;  %165 = vrot.lane.b32.xlu1 %v9025_v1, %s8976_s26 }
  0x51   :  { %189 = vrot.lane.b32.xlu0 %v9020_v0, %s8977_s27  ;;  %191 = vrot.lane.b32.xlu1 %v9034_v2, %s8977_s27 }
  0x55   :  { %149 = vrot.lane.b32.xlu0 %v9051_v3, %s8975_s15  ;;  %151 = vrot.lane.b32.xlu1 %v9056_v4, %s8975_s15 }
  0x59   :  { %187 = vrot.lane.b32.xlu0 %v9025_v1, %s8977_s27  ;;  %211 = vrot.lane.b32.xlu1 %v9020_v0, %s8978_s10 }
  0x5d   :  { %213 = vrot.lane.b32.xlu0 %v9034_v2, %s8978_s10  ;;  %171 = vrot.lane.b32.xlu1 %v9051_v3, %s8976_s26 }
  0x61   :  { %173 = vrot.lane.b32.xlu0 %v9056_v4, %s8976_s26  ;;  %209 = vrot.lane.b32.xlu1 %v9025_v1, %s8978_s10 }
  0x65   :  { %193 = vrot.lane.b32.xlu0 %v9051_v3, %s8977_s27  ;;  %195 = vrot.lane.b32.xlu1 %v9056_v4, %s8977_s27 }
  0x69   :  { %215 = vrot.lane.b32.xlu0 %v9051_v3, %s8978_s10  ;;  %217 = vrot.lane.b32.xlu1 %v9056_v4, %s8978_s10  ;;  %v1010_v4 = vmul.f32 %v9217_v36, %v9020_v0 }
  0x6d   :  { %63 = vrot.lane.b32.xlu0 %v51_v38, %s8971_s30  ;;  %65 = vrot.lane.b32.xlu1 %v52_v39, %s8971_s30  ;;  %s9310_s30 = sld [smem:[#allocation2 + $0x102]] }
  0x71   :  { %87 = vrot.lane.b32.xlu0 %v51_v38, %s8972_s8  ;;  %89 = vrot.lane.b32.xlu1 %v52_v39, %s8972_s8  ;;  %s9316_s8 = sld [smem:[#allocation2 + $0x182]] }
  0x73   :  { %v9444_v2 = vstv %s9310_s30  ;;  %s9794_s30 = sld [smem:[#allocation2 + $0x6]] }
  0x75   :  { %109 = vrot.lane.b32.xlu0 %v51_v38, %s8973_s9  ;;  %111 = vrot.lane.b32.xlu1 %v52_v39, %s8973_s9  ;;  %s9327_s9 = sld [smem:[#allocation2 + $0x202]] }
  0x77   :  { %v9447_v33 = vstv %s9316_s8 }
  0x78   :  { %13114 = vst [vmem:[#allocation41_spill] sm:$0xff] %v9447_v33 }
  0x79   :  { %131 = vrot.lane.b32.xlu0 %v51_v38, %s8974_s14  ;;  %133 = vrot.lane.b32.xlu1 %v52_v39, %s8974_s14  ;;  %s9331_s14 = sld [smem:[#allocation2 + $0x282]] }
  0x7b   :  { %v9450_v35 = vstv %s9327_s9  ;;  %s9857_s9 = sld [smem:[#allocation2 + $0x8]] }
  0x7c   :  { %13115 = vst [vmem:[#allocation42_spill] sm:$0xff] %v9450_v35 }
  0x7d   :  { %153 = vrot.lane.b32.xlu0 %v51_v38, %s8975_s15  ;;  %155 = vrot.lane.b32.xlu1 %v52_v39, %s8975_s15  ;;  %s9341_s15 = sld [smem:[#allocation2 + $0x83]] }
  0x81   :  { %175 = vrot.lane.b32.xlu0 %v51_v38, %s8976_s26  ;;  %177 = vrot.lane.b32.xlu1 %v52_v39, %s8976_s26  ;;  %s9347_s26 = sld [smem:[#allocation2 + $0x103]] }
  0x85   :  { %197 = vrot.lane.b32.xlu0 %v51_v38, %s8977_s27  ;;  %199 = vrot.lane.b32.xlu1 %v52_v39, %s8977_s27  ;;  %s9400_s27 = sld [smem:[#allocation2 + $0x183]] }
  0x89   :  { %219 = vrot.lane.b32.xlu0 %v51_v38, %s8978_s10  ;;  %221 = vrot.lane.b32.xlu1 %v52_v39, %s8978_s10  ;;  %v9453_v38 = vstv %s9331_s14  ;;  %s9455_s10 = sld [smem:[#allocation2 + $0x203]]  ;;  %v4859_v39 = vmul.f32 %v9261_v47, %v9025_v1 }
  0x8a   :  { %13116 = vst [vmem:[#allocation43_spill] sm:$0xff] %v9453_v38  ;;  %s9951_s14 = sld [smem:[#allocation4]] }
  0x8f   :  { %v56_v18 = vpop.permute.xlu0 %55  ;;  %v9405_v20 = vpop.permute.xlu1 %53 }
  0x90   :  { %13107 = vst [vmem:[#allocation34_spill] sm:$0xff] %v9405_v20  ;;  %v9434_v28 = vsel %vm69_vm0, %v9405_v20, %v56_v18 }
  0x91   :  { %13113 = vst [vmem:[#allocation40_spill] sm:$0xff] %v9434_v28  ;;  %v1018_v60 = vmul.f32 %v9350_v62, %v9434_v28  ;;  %v1788_v43 = vmul.f32 %v9363_v6, %v9434_v28  ;;  %v2558_v1 = vmul.f32 %v9378_v10, %v9434_v28  ;;  %v3328_v52 = vmul.f32 %v9391_v14, %v9434_v28 }
  0x92   :  { %v4098_v51 = vmul.f32 %v9394_v15, %v9434_v28  ;;  %v4868_v48 = vmul.f32 %v9403_v19, %v9434_v28  ;;  %v5638_v36 = vmul.f32 %v9418_v24, %v9434_v28  ;;  %v9531_v28 = vstv %s9341_s15  ;;  %s10854_s15 = sld [smem:[#allocation2 + $0x204]] }
  0x93   :  { %v9461_v55 = vpop.permute.xlu0 %57  ;;  %v9465_v58 = vpop.permute.xlu1 %79  ;;  %v1795_v22 = vadd.f32 %v1788_v43, %v9367_v7  ;;  %v2565_v12 = vadd.f32 %v2558_v1, %v2549_v16  ;;  %13129 = vst [vmem:[#allocation56_spill] sm:$0xff] %v9531_v28  ;;  %v4092_v1 = vmul.f32 %v9240_v42, %v9051_v3 }
  0x94   :  { %v9488_v49 = vsel %vm69_vm0, %v56_v18, %v9461_v55 }
  0x95   :  { %13119 = vst [vmem:[#allocation46_spill] sm:$0xff] %v9488_v49  ;;  %v1019_v0 = vmul.f32 %v9350_v62, %v9488_v49  ;;  %v1789_v46 = vmul.f32 %v9363_v6, %v9488_v49  ;;  %v2559_v45 = vmul.f32 %v9378_v10, %v9488_v49  ;;  %v3329_v34 = vmul.f32 %v9391_v14, %v9488_v49 }
  0x96   :  { %v4099_v18 = vmul.f32 %v9394_v15, %v9488_v49  ;;  %v4869_v20 = vmul.f32 %v9403_v19, %v9488_v49  ;;  %v5639_v41 = vmul.f32 %v9418_v24, %v9488_v49 }
  0x97   :  { %v9508_v40 = vpop.permute.xlu0 %81  ;;  %v9510_v37 = vpop.permute.xlu1 %77  ;;  %v9514_v31 = vadd.f32 %v1019_v0, %v1010_v4  ;;  %v9516_v27 = vadd.f32 %v1789_v46, %v1780_v11  ;;  %v9518_v23 = vadd.f32 %v2559_v45, %v2550_v17  ;;  %v9520_v13 = vadd.f32 %v3329_v34, %v3320_v25 }
  0x98   :  { %13120 = vst [vmem:[#allocation47_spill] sm:$0xff] %v9508_v40  ;;  %13121 = vst [vmem:[#allocation48_spill] sm:$0xff] %v9510_v37  ;;  %v9522_v9 = vadd.f32 %v4099_v18, %v4090_v30  ;;  %v9524_v26 = vadd.f32 %v4869_v20, %v4860_v56  ;;  %v9526_v49 = vadd.f32 %v5639_v41, %v5630_v44  ;;  %v9565_v20 = vstv %s9347_s26  ;;  %s11599_s26 = sld [smem:[#allocation2 + $0x386]] }
  0x99   :  { %13122 = vst [vmem:[#allocation49_spill] sm:$0xff] %v9514_v31  ;;  %13123 = vst [vmem:[#allocation50_spill] sm:$0xff] %v9516_v27  ;;  %v1025_v40 = vadd.f32 %v1018_v60, %v9354_v63  ;;  %v3335_v4 = vadd.f32 %v3328_v52, %v3319_v21  ;;  %v4105_v46 = vadd.f32 %v4098_v51, %v4089_v29  ;;  %v9590_v0 = vstv %s9455_s10  ;;  %s11283_s10 = sld [smem:[#allocation2 + $0x286]] }
  0x9a   :  { %13124 = vst [vmem:[#allocation51_spill] sm:$0xff] %v9518_v23  ;;  %13125 = vst [vmem:[#allocation52_spill] sm:$0xff] %v9520_v13  ;;  %v4875_v11 = vadd.f32 %v4868_v48, %v4859_v39  ;;  %v9537_v34 = vsel %vm91_vm1, %v9510_v37, %v9465_v58  ;;  %v5645_v44 = vadd.f32 %v5638_v36, %v5629_v54  ;;  %v8935_v39 = vld [vmem:[%s12871_s0 + $0x10] sm:$0xff]  ;;  %v9593_v18 = vstv %s9498_s28  ;;  %s10765_s28 = sld [smem:[#allocation2 + $0x108]] }
  0x9b   :  { %13126 = vst [vmem:[#allocation53_spill] sm:$0xff] %v9522_v9  ;;  %13127 = vst [vmem:[#allocation54_spill] sm:$0xff] %v9524_v26  ;;  %v9539_v45 = vpop.permute.xlu0 %101  ;;  %v9541_v41 = vpop.permute.xlu1 %103  ;;  %v1034_v43 = vmul.f32 %v9441_v32, %v9537_v34  ;;  %v1804_v52 = vmul.f32 %v9444_v2, %v9537_v34  ;;  %v2574_v48 = vmul.f32 %v9447_v33, %v9537_v34  ;;  %v13138_v9 = vld [vmem:[#allocation35_spill] sm:$0xff]  ;;  %v13139_v23 = vld [vmem:[#allocation38_spill] sm:$0xff] }
  0x9c   :  { %13128 = vst [vmem:[#allocation55_spill] sm:$0xff] %v9526_v49  ;;  %13130 = vst [vmem:[#allocation57_spill] sm:$0xff] %v9537_v34  ;;  %v3344_v51 = vmul.f32 %v9450_v35, %v9537_v34  ;;  %v4114_v60 = vmul.f32 %v9453_v38, %v9537_v34  ;;  %v4884_v63 = vmul.f32 %v9468_v59, %v9537_v34  ;;  %v13137_v49 = vld [vmem:[#allocation29_spill] sm:$0xff] }
  0x9d   :  { %v5654_v36 = vmul.f32 %v9477_v53, %v9537_v34  ;;  %v9557_v7 = vadd.f32 %v1034_v43, %v1025_v40  ;;  %v9559_v16 = vadd.f32 %v1804_v52, %v1795_v22  ;;  %v9561_v17 = vadd.f32 %v2574_v48, %v2565_v12  ;;  %13131 = vst [vmem:[#allocation58_spill] sm:$0xff] %v9565_v20  ;;  %v9626_v34 = vld [vmem:[%s12871_s0 + $0x18] sm:$0xff] }
  0x9e   :  { %v9569_v21 = vadd.f32 %v3344_v51, %v3335_v4  ;;  %v9571_v25 = vadd.f32 %v4114_v60, %v4105_v46  ;;  %v9573_v29 = vadd.f32 %v4884_v63, %v4875_v11  ;;  %v9580_v12 = vstv %s9400_s27  ;;  %13134 = vst [vmem:[#allocation61_spill] sm:$0xff] %v9590_v0  ;;  %13135 = vst [vmem:[#allocation62_spill] sm:$0xff] %v9593_v18 }
  0x9f   :  { %v9575_v40 = vadd.f32 %v5654_v36, %v5645_v44  ;;  %v60_v22 = vpop.permute.xlu0 %59  ;;  %v9577_v30 = vpop.permute.xlu1 %61  ;;  %13133 = vst [vmem:[#allocation60_spill] sm:$0xff] %v9580_v12  ;;  %v4091_v54 = vmul.f32 %v8935_v39, %v9240_v42  ;;  %v4861_v56 = vmul.f32 %v8935_v39, %v9261_v47  ;;  %v5631_v4 = vmul.f32 %v8935_v39, %v9269_v50 }
  0xa0   :  { %13132 = vst [vmem:[#allocation59_spill] sm:$0xff] %v9577_v30  ;;  %v73_v46 = vsel %vm69_vm0, %v9461_v55, %v60_v22 }
  0xa1   :  { %v251_v11 = vmul.f32 %v9345_v61, %v73_v46  ;;  %v1020_v44 = vmul.f32 %v9350_v62, %v73_v46  ;;  %v1790_v43 = vmul.f32 %v9363_v6, %v73_v46  ;;  %v2560_v3 = vmul.f32 %v9378_v10, %v73_v46 }
  0xa2   :  { %v3330_v52 = vmul.f32 %v9391_v14, %v73_v46  ;;  %v4100_v48 = vmul.f32 %v9394_v15, %v73_v46  ;;  %v4870_v51 = vmul.f32 %v9403_v19, %v73_v46  ;;  %v5640_v60 = vmul.f32 %v9418_v24, %v73_v46 }
  0xa3   :  { %v9609_v63 = vpop.permute.xlu0 %99  ;;  %v9611_v55 = vpop.permute.xlu1 %123  ;;  %v9614_v36 = vadd.f32 %v251_v11, %v9360_v5  ;;  %v1027_v39 = vadd.f32 %v1020_v44, %v9371_v8  ;;  %v1797_v26 = vadd.f32 %v1790_v43, %v13137_v49  ;;  %v2567_v13 = vadd.f32 %v2560_v3, %v13138_v9 }
  0xa4   :  { %13136 = vst [vmem:[#allocation63_spill] sm:$0xff] %v9609_v63  ;;  %v3337_v37 = vadd.f32 %v3330_v52, %v13139_v23  ;;  %v4107_v27 = vadd.f32 %v4100_v48, %v4091_v54  ;;  %v4877_v42 = vadd.f32 %v4870_v51, %v4861_v56  ;;  %v5647_v31 = vadd.f32 %v5640_v60, %v5631_v4  ;;  %v13142_v48 = vld [vmem:[#allocation27_spill] sm:$0xff]  ;;  %v13143_v60 = vld [vmem:[#allocation30_spill] sm:$0xff] }
  0xa5   :  { %v9621_v46 = vstv %s9567_s11  ;;  %v4862_v5 = vmul.f32 %v9626_v34, %v9261_v47  ;;  %v5632_v49 = vmul.f32 %v9626_v34, %v9269_v50  ;;  %v9635_v8 = vsel %vm69_vm0, %v60_v22, %v9577_v30  ;;  %s10775_s11 = sld [smem:[#allocation2 + $0x184]] }
  0xa6   :  { %13140 = vst [vmem:[#allocation29_spill] sm:$0xff] %v9621_v46  ;;  %v1021_v9 = vmul.f32 %v9350_v62, %v9635_v8  ;;  %v1791_v23 = vmul.f32 %v9363_v6, %v9635_v8  ;;  %v2561_v54 = vmul.f32 %v9378_v10, %v9635_v8  ;;  %v9647_v56 = vsel %vm113_vm2, %v9609_v63, %v9539_v45  ;;  %v13145_v10 = vld [vmem:[#allocation36_spill] sm:$0xff] }
  0xa7   :  { %v9649_v4 = vpop.permute.xlu0 %125  ;;  %v9651_v11 = vpop.permute.xlu1 %83  ;;  %v3331_v22 = vmul.f32 %v9391_v14, %v9635_v8  ;;  %v4101_v44 = vmul.f32 %v9394_v15, %v9635_v8  ;;  %v4871_v43 = vmul.f32 %v9403_v19, %v9635_v8  ;;  %v5641_v3 = vmul.f32 %v9418_v24, %v9635_v8  ;;  %v13147_v14 = vld [vmem:[#allocation39_spill] sm:$0xff] }
  0xa8   :  { %v9662_v52 = vstv %s9595_s12  ;;  %v9665_v51 = vadd.f32 %v1021_v9, %v13142_v48  ;;  %v9668_v63 = vadd.f32 %v1791_v23, %v13143_v60  ;;  %v9671_v6 = vadd.f32 %v2561_v54, %v13145_v10 }
  0xa9   :  { %13141 = vst [vmem:[#allocation35_spill] sm:$0xff] %v9662_v52  ;;  %v9674_v62 = vadd.f32 %v3331_v22, %v13147_v14  ;;  %v9676_v15 = vadd.f32 %v4101_v44, %v4092_v1  ;;  %v9678_v19 = vadd.f32 %v4871_v43, %v4862_v5  ;;  %v9680_v30 = vadd.f32 %v5641_v3, %v5632_v49 }
  0xaa   :  { %13144 = vst [vmem:[#allocation38_spill] sm:$0xff] %v9668_v63  ;;  %13146 = vst [vmem:[#allocation27_spill] sm:$0xff] %v9671_v6  ;;  %v1050_v24 = vmul.f32 %v9531_v28, %v9647_v56  ;;  %v1820_v9 = vmul.f32 %v9565_v20, %v9647_v56  ;;  %v2590_v23 = vmul.f32 %v9580_v12, %v9647_v56 }
  0xab   :  { %13148 = vst [vmem:[#allocation30_spill] sm:$0xff] %v9674_v62  ;;  %13149 = vst [vmem:[#allocation36_spill] sm:$0xff] %v9676_v15  ;;  %v3360_v10 = vmul.f32 %v9590_v0, %v9647_v56  ;;  %v9690_v14 = vpop.permute.xlu0 %85  ;;  %v9692_v1 = vpop.permute.xlu1 %121  ;;  %v4130_v5 = vmul.f32 %v9593_v18, %v9647_v56  ;;  %v4900_v49 = vmul.f32 %v9621_v46, %v9647_v56 }
  0xac   :  { %13150 = vst [vmem:[#allocation39_spill] sm:$0xff] %v9678_v19  ;;  %13151 = vst [vmem:[#allocation64_spill] sm:$0xff] %v9680_v30  ;;  %v5670_v54 = vmul.f32 %v9662_v52, %v9647_v56  ;;  %v9701_v22 = vadd.f32 %v1050_v24, %v9557_v7  ;;  %v9704_v44 = vadd.f32 %v1820_v9, %v9559_v16  ;;  %v13159_v24 = vld [vmem:[#allocation47_spill] sm:$0xff] }
  0xad   :  { %13152 = vst [vmem:[#allocation65_spill] sm:$0xff] %v9692_v1  ;;  %v9707_v43 = vadd.f32 %v2590_v23, %v9561_v17  ;;  %v9710_v3 = vadd.f32 %v3360_v10, %v9569_v21  ;;  %v9713_v48 = vadd.f32 %v4130_v5, %v9571_v25  ;;  %v9716_v60 = vadd.f32 %v4900_v49, %v9573_v29 }
  0xae   :  { %13153 = vst [vmem:[#allocation66_spill] sm:$0xff] %v9704_v44  ;;  %v9719_v30 = vadd.f32 %v5670_v54, %v9575_v40  ;;  %v9725_v7 = vsel %vm91_vm1, %v13159_v24, %v9651_v11 }
  0xaf   :  { %13154 = vst [vmem:[#allocation67_spill] sm:$0xff] %v9707_v43  ;;  %13155 = vst [vmem:[#allocation68_spill] sm:$0xff] %v9710_v3  ;;  %v1036_v16 = vmul.f32 %v9441_v32, %v9725_v7  ;;  %v1806_v17 = vmul.f32 %v9444_v2, %v9725_v7  ;;  %v2576_v21 = vmul.f32 %v9447_v33, %v9725_v7  ;;  %v9733_v25 = vpop.permute.xlu0 %145  ;;  %v9735_v29 = vpop.permute.xlu1 %147 }
  0xb0   :  { %13156 = vst [vmem:[#allocation69_spill] sm:$0xff] %v9713_v48  ;;  %13157 = vst [vmem:[#allocation70_spill] sm:$0xff] %v9716_v60  ;;  %v3346_v40 = vmul.f32 %v9450_v35, %v9725_v7  ;;  %v4116_v9 = vmul.f32 %v9453_v38, %v9725_v7  ;;  %v4886_v23 = vmul.f32 %v9468_v59, %v9725_v7 }
  0xb1   :  { %13158 = vst [vmem:[#allocation71_spill] sm:$0xff] %v9719_v30  ;;  %v5656_v10 = vmul.f32 %v9477_v53, %v9725_v7  ;;  %v1043_v5 = vadd.f32 %v1036_v16, %v1027_v39  ;;  %v1813_v49 = vadd.f32 %v1806_v17, %v1797_v26  ;;  %v2583_v54 = vadd.f32 %v2576_v21, %v2567_v13 }
  0xb2   :  { %v3353_v30 = vadd.f32 %v3346_v40, %v3337_v37  ;;  %v4123_v60 = vadd.f32 %v4116_v9, %v4107_v27  ;;  %v4893_v19 = vadd.f32 %v4886_v23, %v4877_v42 }
  0xb3   :  { %v5663_v48 = vadd.f32 %v5656_v10, %v5647_v31  ;;  %v9747_v15 = vpop.permute.xlu0 %105  ;;  %v9749_v3 = vpop.permute.xlu1 %107 }
  0xb4   :  { %13160 = vst [vmem:[#allocation47_spill] sm:$0xff] %v9749_v3  ;;  %v117_v26 = vsel %vm113_vm2, %v9541_v41, %v9747_v15 }
  0xb5   :  { %v1052_v31 = vmul.f32 %v9531_v28, %v117_v26  ;;  %v1822_v42 = vmul.f32 %v9565_v20, %v117_v26  ;;  %v2592_v27 = vmul.f32 %v9580_v12, %v117_v26  ;;  %v3362_v39 = vmul.f32 %v9590_v0, %v117_v26 }
  0xb6   :  { %v4132_v16 = vmul.f32 %v9593_v18, %v117_v26  ;;  %v4902_v17 = vmul.f32 %v9621_v46, %v117_v26  ;;  %v5672_v21 = vmul.f32 %v9662_v52, %v117_v26  ;;  %v9887_v52 = vstv %s9794_s30  ;;  %s10909_s30 = sld [smem:[#allocation2 + $0x186]] }
  0xb7   :  { %v9761_v13 = vpop.permute.xlu0 %143  ;;  %v9763_v37 = vpop.permute.xlu1 %167  ;;  %v9774_v40 = vadd.f32 %v1052_v31, %v1043_v5  ;;  %v9776_v9 = vadd.f32 %v1822_v42, %v1813_v49  ;;  %v9778_v23 = vadd.f32 %v2592_v27, %v2583_v54  ;;  %v9782_v10 = vadd.f32 %v3362_v39, %v3353_v30  ;;  %v13168_v30 = vld [vmem:[#allocation46_spill] sm:$0xff]  ;;  %v8937_v54 = vld [vmem:[%s12871_s0 + $0x8] sm:$0xff]  ;;  %v13172_v31 = vld [vmem:[#allocation8_spill] sm:$0xff] }
  0xb8   :  { %13161 = vst [vmem:[#allocation72_spill] sm:$0xff] %v9761_v13  ;;  %v9784_v62 = vadd.f32 %v4132_v16, %v4123_v60  ;;  %v9786_v43 = vadd.f32 %v4902_v17, %v4893_v19  ;;  %v9788_v6 = vadd.f32 %v5672_v21, %v5663_v48  ;;  %v250_v19 = vmul.f32 %v9345_v61, %v13168_v30 }
  0xb9   :  { %13162 = vst [vmem:[#allocation73_spill] sm:$0xff] %v9776_v9  ;;  %13163 = vst [vmem:[#allocation74_spill] sm:$0xff] %v9778_v23  ;;  %v9805_v48 = vsel %vm91_vm1, %v9465_v58, %v13159_v24  ;;  %v9808_v60 = vstv %s9745_s17  ;;  %v241_v42 = vmul.f32 %v8937_v54, %v13172_v31  ;;  %v8938_v58 = vld [vmem:[%s12871_s0] sm:$0xff]  ;;  %v252_v27 = vmul.f32 %v9345_v61, %v9635_v8  ;;  %v13183_v9 = vld [vmem:[#allocation57_spill] sm:$0xff]  ;;  %s11316_s17 = sld [smem:[#allocation2 + $0x288]] }
  0xba   :  { %13164 = vst [vmem:[#allocation75_spill] sm:$0xff] %v9782_v10  ;;  %13165 = vst [vmem:[#allocation76_spill] sm:$0xff] %v9784_v62  ;;  %v240_v24 = vmul.f32 %v8938_v58, %v13172_v31  ;;  %v9830_v39 = vsel %vm91_vm1, %v9651_v11, %v9690_v14  ;;  %v243_v16 = vmul.f32 %v9626_v34, %v13172_v31  ;;  %v9835_v17 = vstv %s9751_s19  ;;  %v13179_v31 = vld [vmem:[#allocation40_spill] sm:$0xff]  ;;  %s11024_s19 = sld [smem:[#allocation4 + $0x3]] }
  0xbb   :  { %13166 = vst [vmem:[#allocation77_spill] sm:$0xff] %v9786_v43  ;;  %13167 = vst [vmem:[#allocation78_spill] sm:$0xff] %v9788_v6  ;;  %v9790_v44 = vpop.permute.xlu0 %169  ;;  %v9792_v63 = vpop.permute.xlu1 %127  ;;  %v9838_v21 = vstv %s9753_s20  ;;  %v9841_v30 = vstv %s9759_s21  ;;  %v9848_v8 = vsel %vm113_vm2, %v9539_v45, %v9541_v41  ;;  %v267_v11 = vmul.f32 %v9808_v60, %v9725_v7  ;;  %s10540_s21 = sld [smem:[#allocation4 + $0x1]] }
  0xbc   :  { %13169 = vst [vmem:[#allocation46_spill] sm:$0xff] %v9805_v48  ;;  %13173 = vst [vmem:[#allocation8_spill] sm:$0xff] %v9830_v39  ;;  %v266_v34 = vmul.f32 %v9808_v60, %v9805_v48  ;;  %v9855_v54 = vstv %s9772_s22  ;;  %v249_v58 = vmul.f32 %v9345_v61, %v13179_v31  ;;  %v1037_v6 = vmul.f32 %v9441_v32, %v9830_v39  ;;  %s11136_s20 = sld [smem:[#allocation2 + $0x208]] }
  0xbd   :  { %13174 = vst [vmem:[#allocation81_spill] sm:$0xff] %v9835_v17  ;;  %13175 = vst [vmem:[#allocation82_spill] sm:$0xff] %v9838_v21  ;;  %v257_v41 = vadd.f32 %v250_v19, %v241_v42  ;;  %v9866_v62 = vstv %s9780_s23  ;;  %v9872_v7 = vsel %vm135_vm3, %v9611_v55, %v9649_v4  ;;  %v283_v10 = vmul.f32 %v9835_v17, %v117_v26  ;;  %s10817_s23 = sld [smem:[#allocation4 + $0x2]] }
  0xbe   :  { %13176 = vst [vmem:[#allocation83_spill] sm:$0xff] %v9841_v30  ;;  %13177 = vst [vmem:[#allocation84_spill] sm:$0xff] %v9848_v8  ;;  %v9879_v31 = vsel %vm135_vm3, %v9649_v4, %v9792_v63  ;;  %v259_v23 = vadd.f32 %v252_v27, %v243_v16  ;;  %v265_v19 = vmul.f32 %v9808_v60, %v13183_v9  ;;  %s11331_s22 = sld [smem:[#allocation2 + $0x304]] }
  0xbf   :  { %v9810_v5 = vpop.permute.xlu0 %129  ;;  %v9812_v49 = vpop.permute.xlu1 %165  ;;  %13178 = vst [vmem:[#allocation85_spill] sm:$0xff] %v9855_v54  ;;  %13180 = vst [vmem:[#allocation40_spill] sm:$0xff] %v9866_v62  ;;  %v282_v42 = vmul.f32 %v9835_v17, %v9848_v8  ;;  %v268_v26 = vmul.f32 %v9808_v60, %v9830_v39  ;;  %v9895_v4 = vsel %vm157_vm4, %v9733_v25, %v9735_v29 }
  0xc0   :  { %13170 = vst [vmem:[#allocation79_spill] sm:$0xff] %v9810_v5  ;;  %13171 = vst [vmem:[#allocation80_spill] sm:$0xff] %v9812_v49  ;;  %v9901_v9 = vsel %vm179_vm5, %v9763_v37, %v9790_v44  ;;  %v273_v27 = vadd.f32 %v266_v34, %v257_v41  ;;  %v274_v16 = vadd.f32 %v267_v11, %v9614_v36  ;;  %v9924_v11 = vstv %s9818_s3  ;;  %s10918_s3 = sld [smem:[#allocation2 + $0x187]] }
  0xc1   :  { %13181 = vst [vmem:[#allocation86_spill] sm:$0xff] %v9872_v7  ;;  %13182 = vst [vmem:[#allocation87_spill] sm:$0xff] %v9879_v31  ;;  %v298_v39 = vmul.f32 %v9855_v54, %v9872_v7  ;;  %v9910_v0 = vadd.f32 %v268_v26, %v259_v23  ;;  %v299_v12 = vmul.f32 %v9855_v54, %v9879_v31  ;;  %v13227_v7 = vld [vmem:[#allocation32_spill] sm:$0xff] }
  0xc2   :  { %13184 = vst [vmem:[#allocation57_spill] sm:$0xff] %v9895_v4  ;;  %13185 = vst [vmem:[#allocation88_spill] sm:$0xff] %v9901_v9  ;;  %v9915_v20 = vadd.f32 %v1037_v6, %v9665_v51  ;;  %v256_v53 = vadd.f32 %v249_v58, %v240_v24  ;;  %v9921_v36 = vsel %vm135_vm3, %v9692_v1, %v9611_v55  ;;  %v9966_v1 = vstv %s9857_s9 }
  0xc3   :  { %v190_v43 = vpop.permute.xlu0 %189  ;;  %v9863_v45 = vpop.permute.xlu1 %191  ;;  %13188 = vst [vmem:[#allocation91_spill] sm:$0xff] %v9921_v36  ;;  %v290_v34 = vadd.f32 %v283_v10, %v274_v16  ;;  %v281_v23 = vmul.f32 %v9835_v17, %v9647_v56  ;;  %v289_v6 = vadd.f32 %v282_v42, %v273_v27  ;;  %v314_v51 = vmul.f32 %v9866_v62, %v9895_v4 }
  0xc4   :  { %13187 = vst [vmem:[#allocation90_spill] sm:$0xff] %v9915_v20  ;;  %v1035_v55 = vmul.f32 %v9441_v32, %v9805_v48  ;;  %v9942_v10 = vsel %vm157_vm4, %v9761_v13, %v9733_v25  ;;  %v9947_v56 = vsel %vm201_vm6, %v190_v43, %v9863_v45  ;;  %v272_v26 = vadd.f32 %v265_v19, %v256_v53 }
  0xc5   :  { %13190 = vst [vmem:[#allocation93_spill] sm:$0xff] %v9942_v10  ;;  %13191 = vst [vmem:[#allocation94_spill] sm:$0xff] %v9947_v56  ;;  %v305_v42 = vadd.f32 %v298_v39, %v289_v6  ;;  %v297_v27 = vmul.f32 %v9855_v54, %v9921_v36  ;;  %v306_v25 = vadd.f32 %v299_v12, %v290_v34 }
  0xc6   :  { %v1051_v16 = vmul.f32 %v9531_v28, %v9848_v8  ;;  %v9963_v13 = vsel %vm179_vm5, %v9812_v49, %v9763_v37  ;;  %13194 = vst [vmem:[#allocation97_spill] sm:$0xff] %v9966_v1  ;;  %v346_v53 = vmul.f32 %v9924_v11, %v9947_v56  ;;  %v288_v19 = vadd.f32 %v281_v23, %v272_v26  ;;  %v13197_v8 = vld [vmem:[#allocation49_spill] sm:$0xff] }
  0xc7   :  { %v9904_v46 = vpop.permute.xlu0 %149  ;;  %v9906_v18 = vpop.permute.xlu1 %151  ;;  %13193 = vst [vmem:[#allocation96_spill] sm:$0xff] %v9963_v13  ;;  %v321_v39 = vadd.f32 %v314_v51, %v305_v42  ;;  %v313_v12 = vmul.f32 %v9866_v62, %v9942_v10  ;;  %v1066_v34 = vmul.f32 %v9838_v21, %v9921_v36  ;;  %v1042_v51 = vadd.f32 %v1035_v55, %v13197_v8 }
  0xc8   :  { %13186 = vst [vmem:[#allocation89_spill] sm:$0xff] %v9906_v18  ;;  %v9932_v41 = vsel %vm157_vm4, %v9735_v29, %v9904_v46  ;;  %v330_v29 = vmul.f32 %v9887_v52, %v9901_v9  ;;  %v1068_v42 = vmul.f32 %v9838_v21, %v9879_v31  ;;  %v304_v56 = vadd.f32 %v297_v27, %v288_v19 }
  0xc9   :  { %13189 = vst [vmem:[#allocation92_spill] sm:$0xff] %v9932_v41  ;;  %v315_v9 = vmul.f32 %v9866_v62, %v9932_v41  ;;  %v329_v36 = vmul.f32 %v9887_v52, %v9963_v13  ;;  %v9999_v8 = vadd.f32 %v1051_v16, %v1042_v51  ;;  %v1084_v27 = vmul.f32 %v9841_v30, %v9932_v41 }
  0xca   :  { %v337_v49 = vadd.f32 %v330_v29, %v321_v39  ;;  %v320_v31 = vadd.f32 %v313_v12, %v304_v56  ;;  %v10008_v39 = vstv %s9951_s14  ;;  %v1073_v19 = vadd.f32 %v1066_v34, %v9701_v22  ;;  %s10648_s14 = sld [smem:[#allocation2 + $0x105]] }
  0xcb   :  { %v9953_v24 = vpop.permute.xlu0 %187  ;;  %v212_v58 = vpop.permute.xlu1 %211  ;;  %v9981_v6 = vadd.f32 %v315_v9, %v306_v25  ;;  %13200 = vst [vmem:[#allocation101_spill] sm:$0xff] %v9999_v8  ;;  %13201 = vst [vmem:[#allocation102_spill] sm:$0xff] %v10008_v39  ;;  %v13218_v8 = vld [vmem:[#allocation50_spill] sm:$0xff] }
  0xcc   :  { %13192 = vst [vmem:[#allocation95_spill] sm:$0xff] %v9953_v24  ;;  %v9979_v37 = vsel %vm201_vm6, %v9953_v24, %v190_v43  ;;  %v1082_v43 = vmul.f32 %v9841_v30, %v9942_v10  ;;  %v353_v55 = vadd.f32 %v346_v53, %v337_v49  ;;  %v336_v49 = vadd.f32 %v329_v36, %v320_v31  ;;  %v13221_v30 = vld [vmem:[#allocation59_spill] sm:$0xff] }
  0xcd   :  { %13195 = vst [vmem:[#allocation98_spill] sm:$0xff] %v9979_v37  ;;  %13196 = vst [vmem:[#allocation99_spill] sm:$0xff] %v9981_v6  ;;  %v345_v29 = vmul.f32 %v9924_v11, %v9979_v37  ;;  %v1075_v53 = vadd.f32 %v1068_v42, %v9774_v40  ;;  %v10030_v31 = vsel %vm113_vm2, %v9747_v15, %v9749_v3  ;;  %v8528_v3 = vld [vmem:[%s12872_s1 + $0x160] sm:$0xff]  }
  0xce   :  { %v10021_v12 = vadd.f32 %v1082_v43, %v1073_v19  ;;  %13206 = vst [vmem:[#allocation107_spill] sm:$0xff] %v10030_v31  ;;  %v10042_v43 = vsel %vm135_vm3, %v9792_v63, %v9810_v5  ;;  %v284_v15 = vmul.f32 %v9835_v17, %v10030_v31  ;;  %v13230_v31 = vld [vmem:[#allocation9_spill] sm:$0xff] }
  0xcf   :  { %v9986_v23 = vpop.permute.xlu0 %213  ;;  %v9988_v26 = vpop.permute.xlu1 %171  ;;  %v352_v37 = vadd.f32 %v345_v29, %v336_v49  ;;  %v10032_v40 = vadd.f32 %v1084_v27, %v1075_v53  ;;  %13208 = vst [vmem:[#allocation109_spill] sm:$0xff] %v10042_v43  ;;  %v8939_v29 = vld [vmem:[%s12871_s0 + $0x20] sm:$0xff]  ;;  %v13209_v27 = vld [vmem:[#allocation10_spill] sm:$0xff]  ;;  %v13211_v49 = vld [vmem:[#allocation11_spill] sm:$0xff] }
  0xd0   :  { %13198 = vst [vmem:[#allocation49_spill] sm:$0xff] %v9986_v23  ;;  %v9997_v9 = vsel %vm223_vm7, %v212_v58, %v9986_v23  ;;  %13205 = vst [vmem:[#allocation106_spill] sm:$0xff] %v10021_v12  ;;  %v1013_v19 = vmul.f32 %v8939_v29, %v13209_v27  ;;  %v1783_v53 = vmul.f32 %v8939_v29, %v13211_v49  ;;  %v13215_v12 = vld [vmem:[#allocation14_spill] sm:$0xff] }
  0xd1   :  { %13199 = vst [vmem:[#allocation100_spill] sm:$0xff] %v9997_v9  ;;  %v362_v25 = vmul.f32 %v9966_v1, %v9997_v9  ;;  %13207 = vst [vmem:[#allocation108_spill] sm:$0xff] %v10032_v40  ;;  %v13213_v40 = vld [vmem:[#allocation12_spill] sm:$0xff]  ;;  %v4093_v41 = vmul.f32 %v8939_v29, %v13215_v12  ;;  %v5633_v27 = vmul.f32 %v8939_v29, %v9269_v50 }
  0xd3   :  { %v10011_v13 = vpop.permute.xlu0 %173  ;;  %v10013_v10 = vpop.permute.xlu1 %209  ;;  %v369_v16 = vadd.f32 %v362_v25, %v353_v55 }
  0xd4   :  { %13202 = vst [vmem:[#allocation103_spill] sm:$0xff] %v10011_v13  ;;  %13203 = vst [vmem:[#allocation104_spill] sm:$0xff] %v10013_v10  ;;  %v10019_v56 = vsel %vm223_vm7, %v10013_v10, %v212_v58  ;;  %v291_v10 = vadd.f32 %v284_v15, %v9910_v0  ;;  %v8523_v15 = vld [vmem:[%s12872_s1 + $0x130] sm:$0xff]   ;;  %v10113_v4 = vsel %vm179_vm5, %v9988_v26, %v10011_v13 }
  0xd5   :  { %13204 = vst [vmem:[#allocation105_spill] sm:$0xff] %v10019_v56  ;;  %v378_v51 = vadd.f32 %v10008_v39, %v369_v16  ;;  %v361_v22 = vmul.f32 %v9966_v1, %v10019_v56  ;;  %13220 = vst [vmem:[#allocation50_spill] sm:$0xff] %v10113_v4 }
  0xd7   :  { %v10034_v36 = vpop.permute.xlu0 %193  ;;  %v10036_v58 = vpop.permute.xlu1 %195  ;;  %v385_v34 = vmax.f32 %v378_v51, 0.0  ;;  %v368_v42 = vadd.f32 %v361_v22, %v352_v37  ;;  %v1805_v37 = vmul.f32 %v9444_v2, %v9805_v48  ;;  %v300_v22 = vmul.f32 %v9855_v54, %v10042_v43  ;;  %v13214_v48 = vld [vmem:[#allocation13_spill] sm:$0xff]  ;;  %v8522_v54 = vld [vmem:[%s12872_s1 + $0x170] sm:$0xff]  }
  0xd8   :  { %v3323_v56 = vmul.f32 %v8939_v29, %v13214_v48 }
  0xd9   :  { %v392_v55 = vpack.c.bf16 %v385_v34, %v385_v34  ;;  %v377_v25 = vadd.f32 %v10008_v39, %v368_v42  ;;  %v8520_v34 = vld [vmem:[%s12872_s1 + $0x138] sm:$0xff]   ;;  %v10067_v42 = vsel %vm157_vm4, %v9904_v46, %v9906_v18  ;;  %v10081_v46 = vld [vmem:[%s12871_s0 + $0x28] sm:$0xff]  ;;  %v307_v9 = vadd.f32 %v300_v22, %v291_v10  ;;  %v13222_v10 = vld [vmem:[#allocation34_spill] sm:$0xff]  ;;  %s10394_s0 = sld [smem:[#allocation2 + $0x88]] }
  0xda   :  { %13212 = vst [vmem:[#allocation11_spill] sm:$0xff] %v10067_v42  ;;  %13216 = vst [vmem:[#allocation12_spill] sm:$0xff] %v10081_v46  ;;  %v1784_v18 = vmul.f32 %v10081_v46, %v13211_v49  ;;  %v2554_v5 = vmul.f32 %v10081_v46, %v13213_v40  ;;  %v10093_v0 = vmul.f32 %v10081_v46, %v13215_v12 }
  0xdb   :  { %v10053_v16 = vpop.permute.xlu0 %215  ;;  %878 = vmatprep.mubr.bf16.mxu0 %v392_v55  ;;  %v10055_v63 = vpop.permute.xlu1 %217  ;;  %v384_v51 = vmax.f32 %v377_v25, 0.0  ;;  %v2553_v55 = vmul.f32 %v8939_v29, %v13213_v40  ;;  %v4863_v25 = vmul.f32 %v8939_v29, %v9261_v47  ;;  %v10089_v29 = vmul.f32 %v10081_v46, %v13214_v48 }
  0xdc   :  { %13210 = vst [vmem:[#allocation110_spill] sm:$0xff] %v10055_v63  ;;  %v10102_v49 = vsel %vm179_vm5, %v9790_v44, %v9988_v26  ;;  %v316_v48 = vmul.f32 %v9866_v62, %v10067_v42  ;;  %v10107_v12 = vadd.f32 %v1805_v37, %v13218_v8  ;;  %v13223_v37 = vld [vmem:[#allocation25_spill] sm:$0xff]  ;;  %v13224_v26 = vld [vmem:[#allocation26_spill] sm:$0xff]  ;;  %v13225_v62 = vld [vmem:[#allocation28_spill] sm:$0xff] }
  0xdd   :  { %v391_v24 = vpack.c.bf16 %v384_v51, %v384_v51  ;;  %13217 = vst [vmem:[#allocation13_spill] sm:$0xff] %v10102_v49 }
  0xde   :  { %13219 = vst [vmem:[#allocation14_spill] sm:$0xff] %v10107_v12 }
  0xdf   :  { %v64_v51 = vpop.permute.xlu0 %63  ;;  %v66_v40 = vpop.permute.xlu1 %65  ;;  %879 = vmatmul.mubr.bf16.vlgmr.msra.gmra.mxu0 %v391_v24 }
  0xe0   :  { %v71_v44 = vsel %vm69_vm0, %v13221_v30, %v64_v51  ;;  %v10120_v24 = vsel %vm69_vm0, %v64_v51, %v66_v40  ;;  %v10125_v22 = vsel %vm69_vm0, %v66_v40, %v13222_v10  ;;  %7760 = vmatpush3.bf16.msra.mxu0 %v8520_v34  ;;  %v8525_v30 = vld [vmem:[%s12872_s1 + $0x168] sm:$0xff]   ;;  %v13226_v51 = vld [vmem:[#allocation31_spill] sm:$0xff] }
  0xe1   :  { %v253_v8 = vmul.f32 %v9345_v61, %v71_v44  ;;  %v1022_v12 = vmul.f32 %v13223_v37, %v71_v44  ;;  %v1792_v13 = vmul.f32 %v13224_v26, %v71_v44  ;;  %v2562_v42 = vmul.f32 %v13225_v62, %v71_v44  ;;  %7761 = vmatprep.subr.bf16.mxu0 %v8522_v54  ;;  %v13228_v40 = vld [vmem:[#allocation33_spill] sm:$0xff] }
  0xe2   :  { %v3332_v20 = vmul.f32 %v13226_v51, %v71_v44  ;;  %v4102_v21 = vmul.f32 %v13227_v7, %v71_v44  ;;  %v4872_v10 = vmul.f32 %v13228_v40, %v71_v44  ;;  %v13229_v34 = vld [vmem:[#allocation37_spill] sm:$0xff] }
  0xe3   :  { %v5642_v43 = vmul.f32 %v13229_v34, %v71_v44  ;;  %v8526_v61 = vld [vmem:[%s12872_s1 + $0x128] sm:$0xff]   ;;  %v10142_v39 = vadd.f32 %v253_v8, %v13230_v31  ;;  %v10144_v54 = vadd.f32 %v1022_v12, %v1013_v19  ;;  %v10146_v28 = vadd.f32 %v1792_v13, %v1783_v53  ;;  %v10202_v12 = vpop.permute.xlu1 %89  ;;  %v8529_v8 = vld [vmem:[%s12872_s1 + $0x120] sm:$0xff]  }
  0xe4   :  { %v10148_v17 = vadd.f32 %v2562_v42, %v2553_v55  ;;  %v10153_v6 = vadd.f32 %v3332_v20, %v3323_v56  ;;  %v10155_v44 = vadd.f32 %v4102_v21, %v4093_v41  ;;  %v10157_v23 = vadd.f32 %v4872_v10, %v4863_v25  ;;  %7762 = vmatpush3.bf16.msra.mxu0 %v8523_v15  ;;  %v13234_v55 = vld [vmem:[#allocation18_spill] sm:$0xff]  ;;  %v13236_v15 = vld [vmem:[#allocation19_spill] sm:$0xff] }
  0xe5   :  { %v10159_v1 = vadd.f32 %v5642_v43, %v5633_v27  ;;  %v4864_v31 = vmul.f32 %v10081_v46, %v9261_v47  ;;  %v5634_v13 = vmul.f32 %v10081_v46, %v9269_v50  ;;  %v1024_v19 = vmul.f32 %v13223_v37, %v10125_v22  ;;  %7763 = vmatprep.subr.bf16.mxu0 %v8525_v30 }
  0xe6   :  { %v10167_v53 = vadd.f32 %v316_v48, %v307_v9  ;;  %v1793_v20 = vmul.f32 %v13224_v26, %v10120_v24  ;;  %v1794_v21 = vmul.f32 %v13224_v26, %v10125_v22  ;;  %v2563_v41 = vmul.f32 %v13225_v62, %v10120_v24  ;;  %v13232_v9 = vld [vmem:[#allocation17_spill] sm:$0xff] }
  0xe7   :  { %v2564_v47 = vmul.f32 %v13225_v62, %v10125_v22  ;;  %v10181_v50 = vsel %vm201_vm6, %v10034_v36, %v10036_v58  ;;  %v10184_v56 = vadd.f32 %v1024_v19, %v13232_v9  ;;  %v332_v43 = vmul.f32 %v9887_v52, %v10113_v4  ;;  %v13240_v9 = vld [vmem:[#allocation21_spill] sm:$0xff] }
  0xe8   :  { %13231 = vst [vmem:[#allocation59_spill] sm:$0xff] %v10181_v50  ;;  %v10190_v27 = vmul.f32 %v9887_v52, %v10102_v49  ;;  %v10192_v42 = vadd.f32 %v1793_v20, %v1784_v18  ;;  %v10195_v62 = vadd.f32 %v1794_v21, %v13234_v55  ;;  %v10197_v25 = vadd.f32 %v2563_v41, %v2554_v5  ;;  %v10226_v21 = vpop.permute.xlu0 %87 }
  0xe9   :  { %v10200_v48 = vadd.f32 %v2564_v47, %v13236_v15  ;;  %7764 = vmatpush3.bf16.msra.mxu0 %v8526_v61  ;;  %v3333_v26 = vmul.f32 %v13226_v51, %v10120_v24  ;;  %v3334_v18 = vmul.f32 %v13226_v51, %v10125_v22  ;;  %v4103_v5 = vmul.f32 %v13227_v7, %v10120_v24  ;;  %v8531_v61 = vld [vmem:[%s12872_s1 + $0x158] sm:$0xff]  }
  0xea   :  { %13233 = vst [vmem:[#allocation34_spill] sm:$0xff] %v10192_v42  ;;  %13235 = vst [vmem:[#allocation26_spill] sm:$0xff] %v10197_v25  ;;  %v4104_v30 = vmul.f32 %v13227_v7, %v10125_v22  ;;  %7765 = vmatprep.subr.bf16.mxu0 %v8528_v3  ;;  %v4873_v10 = vmul.f32 %v13228_v40, %v10120_v24  ;;  %v4874_v19 = vmul.f32 %v13228_v40, %v10125_v22  ;;  %v13238_v7 = vld [vmem:[#allocation20_spill] sm:$0xff]  ;;  %v8532_v40 = vld [vmem:[%s12872_s1 + $0x118] sm:$0xff]  }
  0xeb   :  { %v5643_v51 = vmul.f32 %v13229_v34, %v10120_v24  ;;  %v5644_v20 = vmul.f32 %v13229_v34, %v10125_v22  ;;  %v10229_v3 = vadd.f32 %v3333_v26, %v10089_v29  ;;  %v3341_v41 = vadd.f32 %v3334_v18, %v13238_v7  ;;  %v13242_v25 = vld [vmem:[#allocation22_spill] sm:$0xff]  ;;  %v13244_v29 = vld [vmem:[#allocation23_spill] sm:$0xff]  ;;  %v13246_v18 = vld [vmem:[#allocation48_spill] sm:$0xff] }
  0xec   :  { %v10233_v47 = vadd.f32 %v4103_v5, %v10093_v0  ;;  %v4111_v55 = vadd.f32 %v4104_v30, %v13240_v9  ;;  %v10239_v15 = vadd.f32 %v4873_v10, %v4864_v31  ;;  %v10242_v34 = vadd.f32 %v4874_v19, %v13242_v25  ;;  %v10274_v19 = vpop.permute.xlu1 %111  ;;  %v13247_v9 = vld [vmem:[#allocation45_spill] sm:$0xff] }
  0xed   :  { %13237 = vst [vmem:[#allocation28_spill] sm:$0xff] %v10229_v3  ;;  %v10244_v49 = vadd.f32 %v5643_v51, %v5634_v13  ;;  %v10247_v26 = vadd.f32 %v5644_v20, %v13244_v29  ;;  %7766 = vmatpush3.bf16.msra.mxu0 %v8529_v8  ;;  %v10253_v0 = vsel %vm223_vm7, %v10053_v16, %v10055_v63  ;;  %v8534_v8 = vld [vmem:[%s12872_s1 + $0x150] sm:$0xff]   ;;  %v10291_v63 = vpop.permute.xlu0 %109 }
  0xee   :  { %13239 = vst [vmem:[#allocation31_spill] sm:$0xff] %v10233_v47  ;;  %13241 = vst [vmem:[#allocation32_spill] sm:$0xff] %v10239_v15  ;;  %v93_v31 = vsel %vm91_vm1, %v9690_v14, %v10226_v21  ;;  %v10263_v13 = vsel %vm91_vm1, %v10202_v12, %v13246_v18  ;;  %v348_v25 = vmul.f32 %v9924_v11, %v10181_v50  ;;  %7767 = vmatprep.subr.bf16.mxu0 %v8531_v61  ;;  %v8535_v51 = vld [vmem:[%s12872_s1 + $0x110] sm:$0xff]  }
  0xef   :  { %13243 = vst [vmem:[#allocation33_spill] sm:$0xff] %v10244_v49  ;;  %13245 = vst [vmem:[#allocation37_spill] sm:$0xff] %v10253_v0  ;;  %v269_v5 = vmul.f32 %v9808_v60, %v93_v31  ;;  %v1038_v30 = vmul.f32 %v9441_v32, %v93_v31  ;;  %v1808_v14 = vmul.f32 %v9444_v2, %v93_v31 }
  0xf0   :  { %v2578_v10 = vmul.f32 %v9447_v33, %v93_v31  ;;  %v3348_v61 = vmul.f32 %v9450_v35, %v93_v31  ;;  %v4118_v20 = vmul.f32 %v9453_v38, %v93_v31  ;;  %v4888_v7 = vmul.f32 %v9468_v59, %v93_v31 }
  0xf1   :  { %v5658_v29 = vmul.f32 %v13247_v9, %v93_v31  ;;  %v276_v18 = vadd.f32 %v269_v5, %v10142_v39  ;;  %v1045_v49 = vadd.f32 %v1038_v30, %v10144_v54  ;;  %v1815_v15 = vadd.f32 %v1808_v14, %v10146_v28  ;;  %7768 = vmatpush3.bf16.msra.mxu0 %v8532_v40  ;;  %v8537_v39 = vld [vmem:[%s12872_s1 + $0x148] sm:$0xff]   ;;  %v13253_v5 = vld [vmem:[#allocation47_spill] sm:$0xff]  ;;  %v10329_v14 = vpop.permute.xlu1 %133 }
  0xf2   :  { %v2585_v47 = vadd.f32 %v2578_v10, %v10148_v17  ;;  %v3355_v3 = vadd.f32 %v3348_v61, %v10153_v6  ;;  %v4125_v42 = vadd.f32 %v4118_v20, %v10155_v44  ;;  %v4895_v37 = vadd.f32 %v4888_v7, %v10157_v23  ;;  %7769 = vmatprep.subr.bf16.mxu0 %v8534_v8  ;;  %v8538_v54 = vld [vmem:[%s12872_s1 + $0x108] sm:$0xff]   ;;  %v8540_v20 = vld [vmem:[%s12872_s1 + $0x140] sm:$0xff]  }
  0xf3   :  { %v5665_v46 = vadd.f32 %v5658_v29, %v10159_v1  ;;  %v10300_v28 = vsel %vm201_vm6, %v9863_v45, %v10034_v36  ;;  %v1040_v17 = vmul.f32 %v9441_v32, %v10263_v13  ;;  %v339_v6 = vadd.f32 %v332_v43, %v10167_v53  ;;  %v13249_v1 = vld [vmem:[#allocation97_spill] sm:$0xff]  ;;  %v13252_v53 = vld [vmem:[#allocation99_spill] sm:$0xff] }
  0xf4   :  { %13248 = vst [vmem:[#allocation9_spill] sm:$0xff] %v10300_v28  ;;  %v364_v23 = vmul.f32 %v13249_v1, %v10253_v0  ;;  %v13250_v44 = vld [vmem:[#allocation49_spill] sm:$0xff]  ;;  %v1810_v45 = vmul.f32 %v9444_v2, %v10263_v13  ;;  %v2580_v36 = vmul.f32 %v9447_v33, %v10263_v13  ;;  %v338_v43 = vadd.f32 %v10190_v27, %v13252_v53 }
  0xf5   :  { %v10314_v40 = vsel %vm223_vm7, %v13250_v44, %v10053_v16  ;;  %v1047_v31 = vadd.f32 %v1040_v17, %v10184_v56  ;;  %v3350_v8 = vmul.f32 %v9450_v35, %v10263_v13  ;;  %v115_v16 = vsel %vm113_vm2, %v13253_v5, %v10291_v63  ;;  %7770 = vmatpush3.bf16.msra.mxu0 %v8535_v51  ;;  %v13254_v17 = vld [vmem:[#allocation81_spill] sm:$0xff]  ;;  %v13255_v44 = vld [vmem:[#allocation56_spill] sm:$0xff] }
  0xf6   :  { %13251 = vst [vmem:[#allocation17_spill] sm:$0xff] %v10314_v40  ;;  %v355_v30 = vadd.f32 %v348_v25, %v339_v6  ;;  %v1817_v10 = vadd.f32 %v1810_v45, %v10195_v62  ;;  %v2587_v61 = vadd.f32 %v2580_v36, %v10200_v48  ;;  %v4120_v27 = vmul.f32 %v9453_v38, %v10263_v13  ;;  %v8541_v48 = vld [vmem:[%s12872_s1 + $0x100] sm:$0xff]   ;;  %v13259_v38 = vld [vmem:[#allocation62_spill] sm:$0xff] }
  0xf7   :  { %v347_v56 = vmul.f32 %v9924_v11, %v10300_v28  ;;  %7771 = vmatprep.subr.bf16.mxu0 %v8537_v39  ;;  %v3357_v7 = vadd.f32 %v3350_v8, %v3341_v41  ;;  %v4890_v25 = vmul.f32 %v9468_v59, %v10263_v13  ;;  %v363_v62 = vmul.f32 %v13249_v1, %v10314_v40  ;;  %v10351_v41 = vpop.permute.xlu0 %131  ;;  %v13257_v8 = vld [vmem:[#allocation60_spill] sm:$0xff] }
  0xf8   :  { %v371_v51 = vadd.f32 %v364_v23, %v355_v30  ;;  %v4127_v29 = vadd.f32 %v4120_v27, %v4111_v55  ;;  %v5660_v39 = vmul.f32 %v13247_v9, %v10263_v13  ;;  %v285_v6 = vmul.f32 %v13254_v17, %v115_v16  ;;  %v13256_v23 = vld [vmem:[#allocation58_spill] sm:$0xff]  ;;  %v13258_v30 = vld [vmem:[#allocation61_spill] sm:$0xff] }
  0xf9   :  { %v1054_v45 = vmul.f32 %v13255_v44, %v115_v16  ;;  %v4897_v36 = vadd.f32 %v4890_v25, %v10242_v34  ;;  %v1824_v53 = vmul.f32 %v13256_v23, %v115_v16  ;;  %v2594_v5 = vmul.f32 %v13257_v8, %v115_v16  ;;  %7772 = vmatpush3.bf16.msra.mxu0 %v8538_v54  ;;  %v8543_v34 = vld [vmem:[%s12872_s1 + $0x238] sm:$0xff]  }
  0xfa   :  { %v3364_v59 = vmul.f32 %v13258_v30, %v115_v16  ;;  %v5667_v55 = vadd.f32 %v5660_v39, %v10247_v26  ;;  %v10358_v27 = vadd.f32 %v285_v6, %v276_v18  ;;  %v4134_v35 = vmul.f32 %v13259_v38, %v115_v16  ;;  %7773 = vmatprep.subr.bf16.mxu0 %v8540_v20  ;;  %v13262_v26 = vld [vmem:[#allocation29_spill] sm:$0xff]  ;;  %v10375_v39 = vpop.permute.xlu1 %155  ;;  %v13264_v20 = vld [vmem:[#allocation35_spill] sm:$0xff] }
  0xfb   :  { %v10360_v9 = vadd.f32 %v1054_v45, %v1045_v49  ;;  %v10368_v25 = vadd.f32 %v1824_v53, %v1815_v15  ;;  %v10370_v40 = vadd.f32 %v2594_v5, %v2585_v47  ;;  %v4904_v18 = vmul.f32 %v13262_v26, %v115_v16  ;;  %v13265_v45 = vld [vmem:[#allocation102_spill] sm:$0xff]  ;;  %v13267_v15 = vld [vmem:[#allocation63_spill] sm:$0xff] }
  0xfc   :  { %v10372_v54 = vadd.f32 %v3364_v59, %v3355_v3  ;;  %v10379_v49 = vadd.f32 %v4134_v35, %v4125_v42  ;;  %v5674_v6 = vmul.f32 %v13264_v20, %v115_v16  ;;  %v380_v28 = vadd.f32 %v13265_v45, %v371_v51  ;;  %v10392_v35 = vpop.permute.xlu0 %153  ;;  %v13269_v51 = vld [vmem:[#allocation107_spill] sm:$0xff] }
  0xfd   :  { %13260 = vst [vmem:[#allocation18_spill] sm:$0xff] %v10370_v40  ;;  %v10383_v33 = vadd.f32 %v4904_v18, %v4895_v37  ;;  %v120_v59 = vsel %vm113_vm2, %v10274_v19, %v13267_v15  ;;  %v354_v3 = vadd.f32 %v347_v56, %v338_v43  ;;  %7774 = vmatpush3.bf16.msra.mxu0 %v8541_v48  ;;  %v13271_v15 = vld [vmem:[#allocation109_spill] sm:$0xff] }
  0xfe   :  { %13261 = vst [vmem:[#allocation19_spill] sm:$0xff] %v10372_v54  ;;  %13263 = vst [vmem:[#allocation20_spill] sm:$0xff] %v10379_v49  ;;  %v10389_v47 = vadd.f32 %v5674_v6, %v5665_v46  ;;  %v387_v53 = vmax.f32 %v380_v28, 0.0  ;;  %v1056_v5 = vmul.f32 %v13255_v44, %v120_v59  ;;  %7790 = vmatprep.subr.bf16.mxu0 %v8543_v34  ;;  %v10407_v18 = vpop.permute.xlu1 %177  ;;  %v13279_v54 = vld [vmem:[#allocation83_spill] sm:$0xff] }
  0xff   :  { %13266 = vst [vmem:[#allocation21_spill] sm:$0xff] %v10383_v33  ;;  %v1826_v37 = vmul.f32 %v13256_v23, %v120_v59  ;;  %v2596_v42 = vmul.f32 %v13257_v8, %v120_v59  ;;  %v370_v16 = vadd.f32 %v363_v62, %v354_v3  ;;  %v1053_v43 = vmul.f32 %v13255_v44, %v13269_v51  ;;  %v13272_v3 = vld [vmem:[#allocation82_spill] sm:$0xff] }
 0x100   :  { %13268 = vst [vmem:[#allocation22_spill] sm:$0xff] %v10389_v47  ;;  %v394_v56 = vpack.c.bf16 %v387_v53, %v387_v53  ;;  %v10400_v46 = vadd.f32 %v1056_v5, %v1047_v31  ;;  %v3366_v34 = vmul.f32 %v13258_v30, %v120_v59  ;;  %v4136_v6 = vmul.f32 %v13259_v38, %v120_v59  ;;  %v13274_v5 = vld [vmem:[#allocation86_spill] sm:$0xff]  ;;  %v10426_v33 = vpop.permute.xlu0 %175  ;;  %v13278_v38 = vld [vmem:[#allocation11_spill] sm:$0xff] }
 0x101   :  { %v10402_v28 = vadd.f32 %v1826_v37, %v1817_v10  ;;  %v10404_v48 = vadd.f32 %v2596_v42, %v2587_v61  ;;  %v4906_v62 = vmul.f32 %v13262_v26, %v120_v59  ;;  %v1069_v47 = vmul.f32 %v13272_v3, %v13271_v15  ;;  %v13277_v26 = vld [vmem:[#allocation90_spill] sm:$0xff] }
 0x102   :  { %918 = vmatprep.mubr.bf16.mxu1 %v394_v56  ;;  %v10414_v53 = vstv %s10366_s18  ;;  %v10416_v31 = vadd.f32 %v3366_v34, %v3357_v7  ;;  %v5676_v10 = vmul.f32 %v13264_v20, %v120_v59  ;;  %v379_v61 = vadd.f32 %v13265_v45, %v370_v16  ;;  %v13281_v16 = vld [vmem:[#allocation57_spill] sm:$0xff]  ;;  %s10944_s18 = sld [smem:[#allocation2 + $0x188]] }
 0x103   :  { %13270 = vst [vmem:[#allocation23_spill] sm:$0xff] %v10404_v48  ;;  %v1067_v37 = vmul.f32 %v13272_v3, %v13274_v5  ;;  %v10422_v42 = vadd.f32 %v4136_v6, %v4127_v29  ;;  %v10424_v56 = vadd.f32 %v4906_v62, %v4897_v36  ;;  %v1060_v49 = vadd.f32 %v1053_v43, %v13277_v26  ;;  %v13282_v29 = vld [vmem:[#allocation24_spill] sm:$0xff]  ;;  %v8521_v36 = vld [vmem:[%s12872_s1 + $0x1b8] sm:$0xff]  }
 0x104   :  { %13273 = vst [vmem:[#allocation48_spill] sm:$0xff] %v10416_v31  ;;  %v1085_v7 = vmul.f32 %v13279_v54, %v13278_v38  ;;  %v10431_v34 = vadd.f32 %v5676_v10, %v5667_v55  ;;  %v386_v31 = vmax.f32 %v379_v61, 0.0  ;;  %v10434_v20 = vstv %s10377_s24  ;;  %v13283_v10 = vld [vmem:[#allocation101_spill] sm:$0xff]  ;;  %s11107_s24 = sld [smem:[#allocation2 + $0x206]] }
 0x105   :  { %13275 = vst [vmem:[#allocation97_spill] sm:$0xff] %v10422_v42  ;;  %13276 = vst [vmem:[#allocation49_spill] sm:$0xff] %v10424_v56  ;;  %v1083_v48 = vmul.f32 %v13279_v54, %v13281_v16  ;;  %v255_v6 = vmul.f32 %v13282_v29, %v10125_v22  ;;  %v1076_v62 = vadd.f32 %v1069_v47, %v1060_v49  ;;  %v10444_v26 = vstv %s10394_s0  ;;  %v200_v56 = vpop.permute.xlu1 %199 }
 0x106   :  { %13280 = vst [vmem:[#allocation99_spill] sm:$0xff] %v10431_v34  ;;  %v393_v43 = vpack.c.bf16 %v386_v31, %v386_v31  ;;  %v1101_v55 = vmul.f32 %v10414_v53, %v10113_v4  ;;  %v1074_v61 = vadd.f32 %v1067_v37, %v13283_v10  ;;  %v13284_v34 = vld [vmem:[#allocation88_spill] sm:$0xff]  ;;  %v271_v22 = vmul.f32 %v9808_v60, %v10263_v13  ;;  %v13285_v31 = vld [vmem:[#allocation94_spill] sm:$0xff] }
 0x107   :  { %v1099_v42 = vmul.f32 %v10414_v53, %v13284_v34  ;;  %v1092_v38 = vadd.f32 %v1085_v7, %v1076_v62  ;;  %v254_v16 = vmul.f32 %v13282_v29, %v10120_v24  ;;  %v10459_v49 = vsel %vm91_vm1, %v10226_v21, %v10202_v12  ;;  %v13286_v10 = vld [vmem:[#allocation16_spill] sm:$0xff]  ;;  %v8524_v13 = vld [vmem:[%s12872_s1 + $0x1b0] sm:$0xff]   ;;  %v198_v7 = vpop.permute.xlu0 %197 }
 0x108   :  { %919 = vmatmul.mubr.bf16.vlgmr.msra.gmra.mxu1 %v393_v43  ;;  %v1090_v47 = vadd.f32 %v1083_v48, %v1074_v61  ;;  %v1115_v37 = vmul.f32 %v10434_v20, %v13285_v31  ;;  %v262_v4 = vadd.f32 %v255_v6, %v13286_v10  ;;  %v287_v34 = vmul.f32 %v13254_v17, %v120_v59  ;;  %v13287_v29 = vld [vmem:[#allocation100_spill] sm:$0xff]  ;;  %v13289_v48 = vld [vmem:[#allocation65_spill] sm:$0xff]  ;;  %v13290_v10 = vld [vmem:[#allocation79_spill] sm:$0xff] }
 0x109   :  { %8316 = vmatpush3.bf16.msra.mxu1 %v8521_v36  ;;  %v1131_v62 = vmul.f32 %v10444_v26, %v13287_v29  ;;  %v10474_v12 = vsel %vm113_vm2, %v10291_v63, %v10274_v19  ;;  %v13288_v21 = vmov 0.0   ;;  %v10481_v59 = vsel %vm135_vm3, %v10329_v14, %v13289_v48  ;;  %v13291_v19 = vld [vmem:[#allocation89_spill] sm:$0xff] }
 0x10a   :  { %8317 = vmatprep.subr.bf16.mxu1 %v13288_v21  ;;  %v10483_v6 = vadd.f32 %v1101_v55, %v1092_v38  ;;  %v1106_v36 = vadd.f32 %v1099_v42, %v1090_v47  ;;  %v270_v43 = vmul.f32 %v9808_v60, %v10459_v49  ;;  %v278_v61 = vadd.f32 %v271_v22, %v262_v4  ;;  %v13292_v38 = vld [vmem:[#allocation15_spill] sm:$0xff]  ;;  %v13293_v60 = vld [vmem:[#allocation72_spill] sm:$0xff]  ;;  %v222_v55 = vpop.permute.xlu1 %221 }
 0x10b   :  { %v10491_v63 = vsel %vm135_vm3, %v13290_v10, %v10351_v41  ;;  %v10497_v29 = vsel %vm157_vm4, %v13291_v19, %v10392_v35  ;;  %8331 = vmatprep.mubr.msk.bf16.mxu1 %vm8980_vm8, %v13288_v21  ;;  %v261_v42 = vadd.f32 %v254_v16, %v13292_v38  ;;  %v10506_v4 = vsel %vm157_vm4, %v10375_v39, %v13293_v60  ;;  %v13295_v19 = vld [vmem:[#allocation85_spill] sm:$0xff]  ;;  %v220_v31 = vpop.permute.xlu0 %219 }
 0x10c   :  { %v1117_v22 = vmul.f32 %v10434_v20, %v10181_v50  ;;  %v1122_v47 = vadd.f32 %v1115_v37, %v1106_v36  ;;  %v286_v48 = vmul.f32 %v13254_v17, %v10474_v12  ;;  %v294_v10 = vadd.f32 %v287_v34, %v278_v61  ;;  %v8527_v60 = vld [vmem:[%s12872_s1 + $0x1a8] sm:$0xff]   ;;  %v13296_v17 = vld [vmem:[#allocation40_spill] sm:$0xff]  ;;  %v13299_v61 = vld [vmem:[#allocation103_spill] sm:$0xff] }
 0x10d   :  { %v10516_v16 = vsel %vm135_vm3, %v10351_v41, %v10329_v14  ;;  %v303_v38 = vmul.f32 %v13295_v19, %v10481_v59  ;;  %8318 = vmatpush3.bf16.msra.mxu1 %v8524_v13  ;;  %v301_v37 = vmul.f32 %v13295_v19, %v10491_v63  ;;  %v317_v34 = vmul.f32 %v13296_v17, %v10497_v29  ;;  %v13298_v41 = vld [vmem:[#allocation80_spill] sm:$0xff] }
 0x10e   :  { %13294 = vst [vmem:[#allocation47_spill] sm:$0xff] %v10516_v16  ;;  %8319 = vmatprep.subr.bf16.mxu1 %v13288_v21  ;;  %v10532_v14 = vsel %vm157_vm4, %v10392_v35, %v10375_v39  ;;  %v10538_v13 = vsel %vm179_vm5, %v10407_v18, %v13298_v41  ;;  %v319_v36 = vmul.f32 %v13296_v17, %v10506_v4  ;;  %v13301_v39 = vld [vmem:[#allocation104_spill] sm:$0xff] }
 0x10f   :  { %13297 = vst [vmem:[#allocation81_spill] sm:$0xff] %v10532_v14  ;;  %v10548_v50 = vsel %vm179_vm5, %v13299_v61, %v10426_v33  ;;  %v10553_v35 = vsel %vm223_vm7, %v222_v55, %v13301_v39  ;;  %v277_v15 = vadd.f32 %v270_v43, %v261_v42  ;;  %v10559_v41 = vsel %vm179_vm5, %v10426_v33, %v10407_v18  ;;  %v13304_v61 = vld [vmem:[#allocation95_spill] sm:$0xff]  ;;  %v8530_v43 = vld [vmem:[%s12872_s1 + $0x1a0] sm:$0xff]  }
 0x110   :  { %13300 = vst [vmem:[#allocation56_spill] sm:$0xff] %v10548_v50  ;;  %13302 = vst [vmem:[#allocation58_spill] sm:$0xff] %v10559_v41  ;;  %v10564_v40 = vsel %vm201_vm6, %v10036_v58, %v198_v7  ;;  %v10569_v5 = vsel %vm201_vm6, %v200_v56, %v13304_v61  ;;  %v302_v39 = vmul.f32 %v13295_v19, %v10516_v16  ;;  %v13306_v19 = vld [vmem:[#allocation110_spill] sm:$0xff] }
 0x111   :  { %13303 = vst [vmem:[#allocation60_spill] sm:$0xff] %v10564_v40  ;;  %8320 = vmatpush3.bf16.msra.mxu1 %v8527_v60  ;;  %v293_v33 = vadd.f32 %v286_v48, %v277_v15  ;;  %v318_v18 = vmul.f32 %v13296_v17, %v10532_v14  ;;  %v310_v42 = vadd.f32 %v303_v38, %v294_v10 }
 0x112   :  { %v335_v58 = vmul.f32 %v9887_v52, %v10538_v13  ;;  %8321 = vmatprep.subr.bf16.mxu1 %v13288_v21  ;;  %v10583_v61 = vsel %vm201_vm6, %v198_v7, %v200_v56  ;;  %v10588_v60 = vsel %vm223_vm7, %v13306_v19, %v220_v31  ;;  %v308_v15 = vadd.f32 %v301_v37, %v10358_v27  ;;  %v8533_v37 = vld [vmem:[%s12872_s1 + $0x198] sm:$0xff]  }
 0x113   :  { %13305 = vst [vmem:[#allocation102_spill] sm:$0xff] %v10583_v61  ;;  %13307 = vst [vmem:[#allocation63_spill] sm:$0xff] %v10588_v60  ;;  %v333_v48 = vmul.f32 %v9887_v52, %v10548_v50  ;;  %v309_v10 = vadd.f32 %v302_v39, %v293_v33  ;;  %v334_v38 = vmul.f32 %v9887_v52, %v10559_v41  ;;  %v10620_v33 = vstv %s10540_s21 }
 0x114   :  { %v326_v17 = vadd.f32 %v319_v36, %v310_v42  ;;  %v351_v30 = vmul.f32 %v9924_v11, %v10569_v5  ;;  %v10599_v56 = vsel %vm223_vm7, %v220_v31, %v222_v55  ;;  %v324_v7 = vadd.f32 %v317_v34, %v308_v15 }
 0x115   :  { %13308 = vst [vmem:[#allocation107_spill] sm:$0xff] %v10599_v56  ;;  %v349_v19 = vmul.f32 %v9924_v11, %v10564_v40  ;;  %v1138_v27 = vadd.f32 %v1131_v62, %v1122_v47  ;;  %8322 = vmatpush3.bf16.msra.mxu1 %v8530_v43  ;;  %v325_v52 = vadd.f32 %v318_v18, %v309_v10 }
 0x116   :  { %v350_v36 = vmul.f32 %v9924_v11, %v10583_v61  ;;  %v342_v39 = vadd.f32 %v335_v58, %v326_v17  ;;  %v367_v57 = vmul.f32 %v13249_v1, %v10553_v35  ;;  %v1070_v31 = vmul.f32 %v13272_v3, %v10491_v63  ;;  %8323 = vmatprep.subr.bf16.mxu1 %v13288_v21 }
 0x117   :  { %v340_v55 = vadd.f32 %v333_v48, %v324_v7  ;;  %v365_v62 = vmul.f32 %v13249_v1, %v10588_v60  ;;  %v1133_v47 = vmul.f32 %v10444_v26, %v10253_v0  ;;  %v341_v34 = vadd.f32 %v334_v38, %v325_v52  ;;  %v8536_v48 = vld [vmem:[%s12872_s1 + $0x190] sm:$0xff]  }
 0x118   :  { %v366_v11 = vmul.f32 %v13249_v1, %v10599_v56  ;;  %v358_v43 = vadd.f32 %v351_v30, %v342_v39  ;;  %v1086_v18 = vmul.f32 %v13279_v54, %v10497_v29  ;;  %v1124_v58 = vadd.f32 %v1117_v22, %v10483_v6 }
 0x119   :  { %v356_v42 = vadd.f32 %v349_v19, %v340_v55  ;;  %v1072_v15 = vmul.f32 %v13272_v3, %v10481_v59  ;;  %8324 = vmatpush3.bf16.msra.mxu1 %v8533_v37  ;;  %v357_v10 = vadd.f32 %v350_v36, %v341_v34  ;;  %v1147_v17 = vadd.f32 %v10620_v33, %v1138_v27  ;;  %v13309_v37 = vld [vmem:[#allocation84_spill] sm:$0xff]  ;;  %v8539_v27 = vld [vmem:[%s12872_s1 + $0x188] sm:$0xff]  }
 0x11a   :  { %v374_v38 = vadd.f32 %v367_v57, %v358_v43  ;;  %8325 = vmatprep.subr.bf16.mxu1 %v13288_v21  ;;  %v1140_v30 = vadd.f32 %v1133_v47, %v1124_v58  ;;  %v1077_v6 = vadd.f32 %v1070_v31, %v10360_v9  ;;  %v1088_v22 = vmul.f32 %v13279_v54, %v10506_v4  ;;  %v8542_v47 = vld [vmem:[%s12872_s1 + $0x180] sm:$0xff]   ;;  %v8545_v58 = vld [vmem:[%s12872_s1 + $0x1f8] sm:$0xff]  }
 0x11b   :  { %v372_v1 = vadd.f32 %v365_v62, %v356_v42  ;;  %v373_v7 = vadd.f32 %v366_v11, %v357_v10  ;;  %v1821_v52 = vmul.f32 %v13256_v23, %v13309_v37  ;;  %v1079_v57 = vadd.f32 %v1072_v15, %v10400_v46  ;;  %v13312_v15 = vld [vmem:[#allocation8_spill] sm:$0xff]  ;;  %v8544_v10 = vld [vmem:[%s12872_s1 + $0x2b8] sm:$0xff]  }
 0x11c   :  { %v383_v19 = vadd.f32 %v13265_v45, %v374_v38  ;;  %v10641_v39 = vadd.f32 %v1086_v18, %v1077_v6  ;;  %v1149_v55 = vadd.f32 %v10620_v33, %v1140_v30  ;;  %v1154_v62 = vmax.f32 %v1147_v17, 0.0  ;;  %v13311_v18 = vld [vmem:[#allocation14_spill] sm:$0xff]  ;;  %v8546_v30 = vld [vmem:[%s12872_s1 + $0x278] sm:$0xff]  }
 0x11d   :  { %v381_v36 = vadd.f32 %v13265_v45, %v372_v1  ;;  %8326 = vmatpush3.bf16.msra.mxu1 %v8536_v48  ;;  %v382_v9 = vadd.f32 %v13265_v45, %v373_v7  ;;  %v10655_v43 = vadd.f32 %v1088_v22, %v1079_v57  ;;  %v10658_v46 = vadd.f32 %v1821_v52, %v13311_v18  ;;  %v8547_v1 = vld [vmem:[%s12872_s1 + $0x230] sm:$0xff]   ;;  %v13313_v52 = vld [vmem:[#allocation91_spill] sm:$0xff]  ;;  %v13319_v18 = vld [vmem:[#allocation93_spill] sm:$0xff] }
 0x11e   :  { %8327 = vmatprep.subr.bf16.mxu1 %v13288_v21  ;;  %v390_v11 = vmax.f32 %v383_v19, 0.0  ;;  %v1807_v48 = vmul.f32 %v9444_v2, %v13312_v15  ;;  %v1156_v38 = vmax.f32 %v1149_v55, 0.0  ;;  %v10676_v17 = vstv %s10630_s4  ;;  %v8548_v19 = vld [vmem:[%s12872_s1 + $0x2b0] sm:$0xff]   ;;  %s10726_s4 = sld [smem:[#allocation2 + $0x106]] }
 0x11f   :  { %v388_v31 = vmax.f32 %v381_v36, 0.0  ;;  %v389_v34 = vmax.f32 %v382_v9, 0.0  ;;  %13310 = vst [vmem:[#allocation82_spill] sm:$0xff] %v10655_v43  ;;  %v1823_v6 = vmul.f32 %v13256_v23, %v13269_v51  ;;  %v1161_v7 = vpack.c.bf16 %v1154_v62, %v1154_v62  ;;  %v13315_v57 = vld [vmem:[#allocation10_spill] sm:$0xff]  ;;  %v13317_v62 = vld [vmem:[#allocation25_spill] sm:$0xff] }
 0x120   :  { %v397_v22 = vpack.c.bf16 %v390_v11, %v390_v11  ;;  %v1836_v36 = vmul.f32 %v10676_v17, %v13313_v52  ;;  %v10689_v9 = vstv %s10648_s14  ;;  %v8551_v11 = vld [vmem:[%s12872_s1 + $0x228] sm:$0xff]   ;;  %v1163_v43 = vpack.c.bf16 %v1156_v38, %v1156_v38  ;;  %s11356_s14 = sld [smem:[#allocation4 + $0x5]] }
 0x121   :  { %v395_v45 = vpack.c.bf16 %v388_v31, %v388_v31  ;;  %8328 = vmatpush3.bf16.msra.mxu1 %v8539_v27  ;;  %v396_v42 = vpack.c.bf16 %v389_v34, %v389_v34  ;;  %v8549_v27 = vld [vmem:[%s12872_s1 + $0x1f0] sm:$0xff]   ;;  %13314 = vst [vmem:[#allocation90_spill] sm:$0xff] %v10689_v9  ;;  %v13316_v31 = vld [vmem:[#allocation12_spill] sm:$0xff]  ;;  %v1023_v34 = vmul.f32 %v13317_v62, %v10120_v24  ;;  %v8552_v38 = vld [vmem:[%s12872_s1 + $0x2a8] sm:$0xff]  }
 0x122   :  { %8329 = vmatprep.subr.bf16.mxu1 %v13288_v21  ;;  %v1014_v55 = vmul.f32 %v13316_v31, %v13315_v57  ;;  %v13321_v57 = vld [vmem:[#allocation92_spill] sm:$0xff]  ;;  %v1055_v62 = vmul.f32 %v13255_v44, %v10474_v12 }
 0x123   :  { %958 = vmatprep.mubr.bf16.mxu0 %v396_v42  ;;  %v1852_v42 = vmul.f32 %v10689_v9, %v13319_v18  ;;  %v1854_v31 = vmul.f32 %v10689_v9, %v13321_v57  ;;  %v8556_v44 = vld [vmem:[%s12872_s1 + $0x2a0] sm:$0xff]  }
 0x124   :  { %959 = vmatmul.mubr.bf16.vlgmr.msra.gmra.mxu0 %v395_v45 }
 0x125   :  { %8330 = vmatpush3.bf16.msra.mxu1 %v8542_v47  ;;  %7791 = vmatpush3.bf16.msra.mxu0 %v8545_v58  ;;  %v13318_v47 = vld [vmem:[#allocation38_spill] sm:$0xff]  ;;  %v13320_v58 = vld [vmem:[#allocation87_spill] sm:$0xff] }
 0x126   :  { %7812 = vmatprep.subr.bf16.mxu1 %v8544_v10  ;;  %1648 = vmatprep.mubr.bf16.mxu0 %v1161_v7  ;;  %v1814_v45 = vadd.f32 %v1807_v48, %v13318_v47  ;;  %v1838_v0 = vmul.f32 %v10676_v17, %v13320_v58  ;;  %v1039_v10 = vmul.f32 %v9441_v32, %v10459_v49  ;;  %v8550_v7 = vld [vmem:[%s12872_s1 + $0x270] sm:$0xff]   ;;  %v8553_v32 = vld [vmem:[%s12872_s1 + $0x1e8] sm:$0xff]  }
 0x127   :  { %7792 = vmatprep.subr.bf16.mxu0 %v8547_v1  ;;  %v1809_v48 = vmul.f32 %v9444_v2, %v10459_v49  ;;  %v13322_v1 = vld [vmem:[#allocation66_spill] sm:$0xff]  ;;  %v8555_v2 = vld [vmem:[%s12872_s1 + $0x220] sm:$0xff]  }
 0x128   :  { %8332 = vmatmul.mubr.bf16.vlgmr.msra.gmra.mxu1 %v397_v22  ;;  %v10705_v24 = vadd.f32 %v1823_v6, %v1814_v45  ;;  %v1843_v22 = vadd.f32 %v1836_v36, %v13322_v1  ;;  %v1030_v6 = vadd.f32 %v1023_v34, %v1014_v55  ;;  %v13326_v34 = vld [vmem:[#allocation98_spill] sm:$0xff]  ;;  %v8554_v45 = vld [vmem:[%s12872_s1 + $0x268] sm:$0xff]  }
 0x129   :  { %7813 = vmatpush3.bf16.msra.mxu1 %v8546_v30  ;;  %1688 = vmatprep.mubr.bf16.mxu1 %v1163_v43  ;;  %v13323_v43 = vld [vmem:[#allocation96_spill] sm:$0xff]  ;;  %v1114_v47 = vmul.f32 %v10434_v20, %v13326_v34 }
 0x12a   :  { %7814 = vmatprep.subr.bf16.mxu1 %v8548_v19  ;;  %7793 = vmatpush3.bf16.msra.mxu0 %v8549_v27  ;;  %v1098_v30 = vmul.f32 %v10414_v53, %v13323_v43  ;;  %v1825_v19 = vmul.f32 %v13256_v23, %v10474_v12  ;;  %v10732_v36 = vadd.f32 %v1852_v42, %v1843_v22  ;;  %v13325_v27 = vld [vmem:[#allocation73_spill] sm:$0xff]  ;;  %v8557_v22 = vld [vmem:[%s12872_s1 + $0x1e0] sm:$0xff]  }
 0x12b   :  { %7794 = vmatprep.subr.bf16.mxu0 %v8551_v11  ;;  %v1845_v55 = vadd.f32 %v1838_v0, %v13325_v27  ;;  %v1046_v1 = vadd.f32 %v1039_v10, %v1030_v6  ;;  %v1071_v23 = vmul.f32 %v13272_v3, %v10516_v16  ;;  %v13328_v0 = vld [vmem:[#allocation34_spill] sm:$0xff]  ;;  %v8559_v10 = vld [vmem:[%s12872_s1 + $0x218] sm:$0xff]   ;;  %v13330_v27 = vld [vmem:[#allocation13_spill] sm:$0xff] }
 0x12c   :  { %13324 = vst [vmem:[#allocation83_spill] sm:$0xff] %v10732_v36  ;;  %v1816_v42 = vadd.f32 %v1809_v48, %v13328_v0  ;;  %v13329_v3 = vld [vmem:[#allocation106_spill] sm:$0xff]  ;;  %v13331_v48 = vld [vmem:[#allocation105_spill] sm:$0xff]  ;;  %v8561_v36 = vld [vmem:[%s12872_s1 + $0x1d8] sm:$0xff]  }
 0x12d   :  { %7815 = vmatpush3.bf16.msra.mxu1 %v8550_v7  ;;  %v10747_v11 = vadd.f32 %v1854_v31, %v1845_v55  ;;  %v1840_v7 = vmul.f32 %v10676_v17, %v10491_v63  ;;  %v1105_v6 = vadd.f32 %v1098_v30, %v13329_v3  ;;  %v1100_v31 = vmul.f32 %v10414_v53, %v13330_v27  ;;  %v13333_v3 = vld [vmem:[#allocation46_spill] sm:$0xff]  ;;  %v13334_v27 = vld [vmem:[#allocation41_spill] sm:$0xff] }
 0x12e   :  { %7816 = vmatprep.subr.bf16.mxu1 %v8552_v38  ;;  %7795 = vmatpush3.bf16.msra.mxu0 %v8553_v32  ;;  %v1130_v55 = vmul.f32 %v10444_v26, %v13331_v48  ;;  %v1062_v0 = vadd.f32 %v1055_v62, %v1046_v1  ;;  %v1087_v38 = vmul.f32 %v13279_v54, %v10532_v14  ;;  %v8558_v54 = vld [vmem:[%s12872_s1 + $0x260] sm:$0xff]   ;;  %v8560_v62 = vld [vmem:[%s12872_s1 + $0x298] sm:$0xff]   ;;  %v10804_v14 = vstv %s10726_s4 }
 0x12f   :  { %13327 = vst [vmem:[#allocation24_spill] sm:$0xff] %v10747_v11  ;;  %7796 = vmatprep.subr.bf16.mxu0 %v8555_v2  ;;  %v10767_v32 = vadd.f32 %v1825_v19, %v1816_v42  ;;  %v1842_v11 = vmul.f32 %v10676_v17, %v10481_v59  ;;  %v1856_v30 = vmul.f32 %v10689_v9, %v10497_v29 }
 0x130   :  { %v2575_v2 = vmul.f32 %v13334_v27, %v13333_v3  ;;  %v1121_v19 = vadd.f32 %v1114_v47, %v1105_v6  ;;  %v1078_v1 = vadd.f32 %v1071_v23, %v1062_v0  ;;  %v1103_v42 = vmul.f32 %v10414_v53, %v10559_v41  ;;  %v8563_v47 = vld [vmem:[%s12872_s1 + $0x210] sm:$0xff]   ;;  %v13335_v0 = vld [vmem:[#allocation108_spill] sm:$0xff] }
 0x131   :  { %13332 = vst [vmem:[#allocation101_spill] sm:$0xff] %v10767_v32  ;;  %7817 = vmatpush3.bf16.msra.mxu1 %v8554_v45  ;;  %v2591_v48 = vmul.f32 %v13257_v8, %v13309_v37  ;;  %v1858_v45 = vmul.f32 %v10689_v9, %v10506_v4  ;;  %v1847_v23 = vadd.f32 %v1840_v7, %v10368_v25  ;;  %v8562_v25 = vld [vmem:[%s12872_s1 + $0x258] sm:$0xff]  }
 0x132   :  { %7818 = vmatprep.subr.bf16.mxu1 %v8556_v44  ;;  %7797 = vmatpush3.bf16.msra.mxu0 %v8557_v22  ;;  %v1137_v6 = vadd.f32 %v1130_v55, %v1121_v19  ;;  %v1107_v41 = vadd.f32 %v1100_v31, %v13335_v0  ;;  %v1094_v32 = vadd.f32 %v1087_v38, %v1078_v1  ;;  %v13336_v22 = vld [vmem:[#allocation9_spill] sm:$0xff]  ;;  %v10815_v31 = vstv %s10745_s7 }
 0x133   :  { %7798 = vmatprep.subr.bf16.mxu0 %v8559_v10  ;;  %v1119_v44 = vmul.f32 %v10434_v20, %v10583_v61  ;;  %v1116_v34 = vmul.f32 %v10434_v20, %v13336_v22  ;;  %v10806_v43 = vadd.f32 %v1856_v30, %v1847_v23  ;;  %v1849_v16 = vadd.f32 %v1842_v11, %v10402_v28  ;;  %v8564_v28 = vld [vmem:[%s12872_s1 + $0x290] sm:$0xff]   ;;  %v13338_v38 = vld [vmem:[#allocation17_spill] sm:$0xff] }
 0x134   :  { %v1110_v7 = vadd.f32 %v1103_v42, %v1094_v32  ;;  %v1135_v10 = vmul.f32 %v10444_v26, %v10599_v56  ;;  %v1874_v55 = vmul.f32 %v10804_v14, %v10538_v13  ;;  %v8565_v11 = vld [vmem:[%s12872_s1 + $0x1d0] sm:$0xff]   ;;  %v1132_v32 = vmul.f32 %v10444_v26, %v13338_v38  ;;  %v13364_v56 = vld [vmem:[#allocation11_spill] sm:$0xff] }
 0x135   :  { %13337 = vst [vmem:[#allocation16_spill] sm:$0xff] %v10806_v43  ;;  %7819 = vmatpush3.bf16.msra.mxu1 %v8558_v54  ;;  %v1865_v30 = vadd.f32 %v1858_v45, %v1849_v16  ;;  %v1890_v54 = vmul.f32 %v10815_v31, %v10569_v5  ;;  %v10837_v1 = vstv %s10765_s28  ;;  %v1123_v42 = vadd.f32 %v1116_v34, %v1107_v41  ;;  %v13339_v45 = vld [vmem:[#allocation51_spill] sm:$0xff]  ;;  %s11182_s28 = sld [smem:[#allocation4 + $0x4]] }
 0x136   :  { %7820 = vmatprep.subr.bf16.mxu1 %v8560_v62  ;;  %7799 = vmatpush3.bf16.msra.mxu0 %v8561_v36  ;;  %v2577_v62 = vmul.f32 %v13334_v27, %v13312_v15  ;;  %v8567_v36 = vld [vmem:[%s12872_s1 + $0x208] sm:$0xff]   ;;  %v1126_v19 = vadd.f32 %v1119_v44, %v1110_v7  ;;  %v1906_v16 = vmul.f32 %v10837_v1, %v10553_v35  ;;  %v10852_v7 = vstv %s10775_s11  ;;  %s10870_s11 = sld [smem:[#allocation2 + $0x205]] }
 0x137   :  { %7800 = vmatprep.subr.bf16.mxu0 %v8563_v47  ;;  %v1881_v23 = vadd.f32 %v1874_v55, %v1865_v30  ;;  %v2582_v0 = vadd.f32 %v2575_v2, %v13339_v45  ;;  %v2593_v43 = vmul.f32 %v13257_v8, %v13269_v51  ;;  %v8566_v47 = vld [vmem:[%s12872_s1 + $0x250] sm:$0xff]   ;;  %v8568_v44 = vld [vmem:[%s12872_s1 + $0x288] sm:$0xff]   ;;  %v1146_v41 = vadd.f32 %v10620_v33, %v1137_v6 }
 0x138   :  { %v1142_v34 = vadd.f32 %v1135_v10, %v1126_v19  ;;  %13340 = vst [vmem:[#allocation65_spill] sm:$0xff] %v10852_v7  ;;  %v8569_v2 = vld [vmem:[%s12872_s1 + $0x1c8] sm:$0xff]   ;;  %v1139_v55 = vadd.f32 %v1132_v32, %v1123_v42  ;;  %v2606_v6 = vmul.f32 %v10852_v7, %v13313_v52  ;;  %v10867_v10 = vstv %s10787_s13  ;;  %v8572_v32 = vld [vmem:[%s12872_s1 + $0x280] sm:$0xff]  }
 0x139   :  { %7821 = vmatpush3.bf16.msra.mxu1 %v8562_v25  ;;  %v8571_v25 = vld [vmem:[%s12872_s1 + $0x200] sm:$0xff]   ;;  %v1897_v30 = vadd.f32 %v1890_v54, %v1881_v23  ;;  %v10862_v45 = vadd.f32 %v2591_v48, %v2582_v0  ;;  %13342 = vst [vmem:[#allocation89_spill] sm:$0xff] %v10867_v10  ;;  %v2622_v38 = vmul.f32 %v10867_v10, %v13319_v18  ;;  %v8570_v48 = vld [vmem:[%s12872_s1 + $0x248] sm:$0xff]   ;;  %v1153_v42 = vmax.f32 %v1146_v41, 0.0 }
 0x13a   :  { %7822 = vmatprep.subr.bf16.mxu1 %v8564_v28  ;;  %7801 = vmatpush3.bf16.msra.mxu0 %v8565_v11  ;;  %v13343_v11 = vld [vmem:[#allocation27_spill] sm:$0xff]  ;;  %v1151_v54 = vadd.f32 %v10620_v33, %v1142_v34  ;;  %v1148_v23 = vadd.f32 %v10620_v33, %v1139_v55  ;;  %v2579_v41 = vmul.f32 %v13334_v27, %v10459_v49  ;;  %v8574_v55 = vld [vmem:[%s12872_s1 + $0x240] sm:$0xff]  }
 0x13b   :  { %13341 = vst [vmem:[#allocation79_spill] sm:$0xff] %v10862_v45  ;;  %7802 = vmatprep.subr.bf16.mxu0 %v8567_v36  ;;  %v1913_v28 = vadd.f32 %v1906_v16, %v1897_v30  ;;  %v2584_v19 = vadd.f32 %v2577_v62, %v13343_v11  ;;  %v10882_v36 = vstv %s10817_s23  ;;  %v8573_v62 = vld [vmem:[%s12872_s1 + $0x1c0] sm:$0xff]   ;;  %v8575_v16 = vld [vmem:[%s12872_s1 + $0x338] sm:$0xff]   ;;  %v2624_v30 = vmul.f32 %v10867_v10, %v13321_v57  ;;  %v8578_v11 = vld [vmem:[%s12872_s1 + $0x330] sm:$0xff]  }
 0x13c   :  { %v13346_v34 = vld [vmem:[#allocation67_spill] sm:$0xff]  ;;  %v2595_v27 = vmul.f32 %v13257_v8, %v10474_v12  ;;  %v8579_v8 = vld [vmem:[%s12872_s1 + $0x2f0] sm:$0xff]   ;;  %v1134_v45 = vmul.f32 %v10444_v26, %v10588_v60 }
 0x13d   :  { %7823 = vmatpush3.bf16.msra.mxu1 %v8566_v47  ;;  %v10892_v0 = vadd.f32 %v10882_v36, %v1913_v28  ;;  %v10894_v47 = vadd.f32 %v2593_v43, %v2584_v19  ;;  %v8576_v43 = vld [vmem:[%s12872_s1 + $0x2f8] sm:$0xff]   ;;  %v1158_v28 = vmax.f32 %v1151_v54, 0.0  ;;  %v1160_v19 = vpack.c.bf16 %v1153_v42, %v1153_v42  ;;  %v8581_v42 = vld [vmem:[%s12872_s1 + $0x328] sm:$0xff]  }
 0x13e   :  { %7824 = vmatprep.subr.bf16.mxu1 %v8568_v44  ;;  %7803 = vmatpush3.bf16.msra.mxu0 %v8569_v2  ;;  %v2608_v44 = vmul.f32 %v10852_v7, %v13320_v58  ;;  %v2613_v2 = vadd.f32 %v2606_v6, %v13346_v34  ;;  %v1155_v6 = vmax.f32 %v1148_v23, 0.0 }
 0x13f   :  { %13344 = vst [vmem:[#allocation15_spill] sm:$0xff] %v10892_v0  ;;  %13345 = vst [vmem:[#allocation72_spill] sm:$0xff] %v10894_v47  ;;  %7804 = vmatprep.subr.bf16.mxu0 %v8571_v25  ;;  %v1165_v23 = vpack.c.bf16 %v1158_v28, %v1158_v28  ;;  %v10949_v28 = vstv %s10854_s15  ;;  %v1118_v47 = vmul.f32 %v10434_v20, %v10564_v40  ;;  %v11022_v40 = vstv %s10918_s3  ;;  %s11346_s3 = sld [smem:[#allocation2 + $0x305]] }
 0x140   :  { %v10911_v25 = vadd.f32 %v2622_v38, %v2613_v2  ;;  %v13348_v38 = vld [vmem:[#allocation74_spill] sm:$0xff]  ;;  %v1162_v34 = vpack.c.bf16 %v1155_v6, %v1155_v6  ;;  %v2610_v2 = vmul.f32 %v10852_v7, %v10491_v63  ;;  %13353 = vst [vmem:[#allocation103_spill] sm:$0xff] %v10949_v28  ;;  %v1102_v6 = vmul.f32 %v10414_v53, %v10548_v50 }
 0x141   :  { %7825 = vmatpush3.bf16.msra.mxu1 %v8570_v48  ;;  %v8577_v48 = vld [vmem:[%s12872_s1 + $0x378] sm:$0xff]   ;;  %v2615_v54 = vadd.f32 %v2608_v44, %v13348_v38  ;;  %v10987_v0 = vmul.f32 %v10949_v28, %v13320_v58  ;;  %13363 = vst [vmem:[#allocation84_spill] sm:$0xff] %v11022_v40 }
 0x142   :  { %13347 = vst [vmem:[#allocation85_spill] sm:$0xff] %v10911_v25  ;;  %7826 = vmatprep.subr.bf16.mxu1 %v8572_v32  ;;  %7805 = vmatpush3.bf16.msra.mxu0 %v8573_v62  ;;  %v13349_v32 = vld [vmem:[#allocation26_spill] sm:$0xff] }
 0x143   :  { %7834 = vmatprep.subr.bf16.mxu0 %v8575_v16  ;;  %v2586_v62 = vadd.f32 %v2579_v41, %v13349_v32  ;;  %v10931_v16 = vadd.f32 %v2624_v30, %v2615_v54  ;;  %v8580_v41 = vld [vmem:[%s12872_s1 + $0x370] sm:$0xff]   ;;  %v10962_v54 = vstv %s10870_s11  ;;  %v2612_v32 = vmul.f32 %v10852_v7, %v10481_v59  ;;  %v13358_v7 = vld [vmem:[#allocation109_spill] sm:$0xff]  ;;  %s11303_s11 = sld [smem:[#allocation2 + $0x287]] }
 0x144   :  { %v13352_v30 = vld [vmem:[#allocation42_spill] sm:$0xff]  ;;  %13355 = vst [vmem:[#allocation104_spill] sm:$0xff] %v10962_v54 }
 0x145   :  { %7827 = vmatpush3.bf16.msra.mxu1 %v8574_v55  ;;  %1649 = vmatmul.mubr.bf16.vlgmr.msra.gmra.mxu0 %v1160_v19  ;;  %13350 = vst [vmem:[#allocation40_spill] sm:$0xff] %v10931_v16  ;;  %v10934_v44 = vadd.f32 %v2595_v27, %v2586_v62  ;;  %v8582_v55 = vld [vmem:[%s12872_s1 + $0x2e8] sm:$0xff]   ;;  %v2626_v27 = vmul.f32 %v10867_v10, %v10497_v29  ;;  %v13357_v25 = vld [vmem:[#allocation18_spill] sm:$0xff] }
 0x146   :  { %8335 = vmatprep.subr.bf16.mxu1 %v13288_v21  ;;  %7835 = vmatpush3.bf16.msra.mxu0 %v8576_v43  ;;  %v3345_v43 = vmul.f32 %v13352_v30, %v13333_v3  ;;  %v3347_v38 = vmul.f32 %v13352_v30, %v13312_v15 }
 0x147   :  { %13351 = vst [vmem:[#allocation80_spill] sm:$0xff] %v10934_v44  ;;  %1728 = vmatprep.mubr.bf16.mxu0 %v1165_v23  ;;  %7836 = vmatprep.subr.bf16.mxu0 %v8578_v11  ;;  %v13354_v11 = vld [vmem:[#allocation61_spill] sm:$0xff]  ;;  %v8584_v23 = vld [vmem:[%s12872_s1 + $0x320] sm:$0xff]   ;;  %v2617_v44 = vadd.f32 %v2610_v2, %v13357_v25  ;;  %v1109_v2 = vadd.f32 %v1102_v6, %v10641_v39 }
 0x148   :  { %1689 = vmatmul.mubr.bf16.vlgmr.msra.gmra.mxu1 %v1162_v34  ;;  %v3361_v19 = vmul.f32 %v13354_v11, %v13309_v37  ;;  %v10973_v62 = vmul.f32 %v13354_v11, %v13269_v51  ;;  %v13356_v34 = vld [vmem:[#allocation86_spill] sm:$0xff]  ;;  %v8583_v25 = vld [vmem:[%s12872_s1 + $0x368] sm:$0xff]   ;;  %v1104_v39 = vmul.f32 %v10414_v53, %v10538_v13  ;;  %v1120_v6 = vmul.f32 %v10434_v20, %v10569_v5 }
 0x149   :  { %8336 = vmatpush3.bf16.msra.mxu1 %v8577_v48  ;;  %8351 = vmatprep.mubr.msk.bf16.mxu1 %vm8980_vm8, %v13288_v21  ;;  %v10969_v48 = vmul.f32 %v10949_v28, %v13313_v52  ;;  %v1837_v16 = vmul.f32 %v10676_v17, %v13356_v34  ;;  %v1839_v34 = vmul.f32 %v10676_v17, %v13358_v7  ;;  %v11015_v7 = vstv %s10909_s30 }
 0x14a   :  { %8337 = vmatprep.subr.bf16.mxu1 %v13288_v21  ;;  %7837 = vmatpush3.bf16.msra.mxu0 %v8579_v8  ;;  %v10983_v8 = vmul.f32 %v10962_v54, %v13319_v18  ;;  %v11001_v50 = vadd.f32 %v2626_v27, %v2617_v44  ;;  %13360 = vst [vmem:[#allocation110_spill] sm:$0xff] %v11015_v7  ;;  %v13361_v44 = vld [vmem:[#allocation23_spill] sm:$0xff]  ;;  %v13372_v18 = vld [vmem:[#allocation30_spill] sm:$0xff] }
 0x14b   :  { %7838 = vmatprep.subr.bf16.mxu0 %v8581_v42  ;;  %v2628_v42 = vmul.f32 %v10867_v10, %v10506_v4  ;;  %v8587_v10 = vld [vmem:[%s12872_s1 + $0x318] sm:$0xff]   ;;  %v2619_v27 = vadd.f32 %v2612_v32, %v13361_v44  ;;  %v2644_v53 = vmul.f32 %v11015_v7, %v10538_v13  ;;  %v1855_v20 = vmul.f32 %v10689_v9, %v13364_v56  ;;  %v13367_v7 = vld [vmem:[#allocation50_spill] sm:$0xff] }
 0x14c   :  { %13359 = vst [vmem:[#allocation95_spill] sm:$0xff] %v11001_v50  ;;  %v13362_v50 = vld [vmem:[#allocation57_spill] sm:$0xff]  ;;  %v2660_v32 = vmul.f32 %v11022_v40, %v10569_v5  ;;  %v1846_v61 = vadd.f32 %v1839_v34, %v10705_v24  ;;  %v1871_v58 = vmul.f32 %v10804_v14, %v13367_v7  ;;  %v11042_v56 = vstv %s10944_s18  ;;  %v13370_v40 = vld [vmem:[#allocation94_spill] sm:$0xff] }
 0x14d   :  { %8338 = vmatpush3.bf16.msra.mxu1 %v8580_v41  ;;  %v8585_v41 = vld [vmem:[%s12872_s1 + $0x2e0] sm:$0xff]   ;;  %v1853_v60 = vmul.f32 %v10689_v9, %v13362_v50  ;;  %v2635_v22 = vadd.f32 %v2628_v42, %v2619_v27  ;;  %13368 = vst [vmem:[#allocation14_spill] sm:$0xff] %v11042_v56  ;;  %v8590_v42 = vld [vmem:[%s12872_s1 + $0x310] sm:$0xff]   ;;  %v2676_v24 = vmul.f32 %v11042_v56, %v10553_v35  ;;  %v13371_v9 = vld [vmem:[#allocation59_spill] sm:$0xff] }
 0x14e   :  { %8339 = vmatprep.subr.bf16.mxu1 %v13288_v21  ;;  %7839 = vmatpush3.bf16.msra.mxu0 %v8582_v55  ;;  %v1844_v55 = vadd.f32 %v1837_v16, %v10658_v46  ;;  %v8586_v46 = vld [vmem:[%s12872_s1 + $0x360] sm:$0xff]   ;;  %v1125_v27 = vadd.f32 %v1118_v47, %v1109_v2  ;;  %v1885_v7 = vmul.f32 %v10815_v31, %v13370_v40 }
 0x14f   :  { %7840 = vmatprep.subr.bf16.mxu0 %v8584_v23  ;;  %v13365_v23 = vld [vmem:[#allocation52_spill] sm:$0xff]  ;;  %v3354_v56 = vadd.f32 %v3347_v38, %v13372_v18  ;;  %v13375_v38 = vld [vmem:[#allocation37_spill] sm:$0xff] }
 0x150   :  { %v3352_v44 = vadd.f32 %v3345_v43, %v13365_v23  ;;  %v13366_v16 = vld [vmem:[#allocation88_spill] sm:$0xff]  ;;  %v8588_v43 = vld [vmem:[%s12872_s1 + $0x2d8] sm:$0xff]   ;;  %v1136_v23 = vmul.f32 %v10444_v26, %v10553_v35  ;;  %v1141_v26 = vadd.f32 %v1134_v45, %v1125_v27  ;;  %v8594_v27 = vld [vmem:[%s12872_s1 + $0x2c8] sm:$0xff]  }
 0x151   :  { %8340 = vmatpush3.bf16.msra.mxu1 %v8583_v25  ;;  %v1869_v50 = vmul.f32 %v10804_v14, %v13366_v16  ;;  %v2651_v25 = vadd.f32 %v2644_v53, %v2635_v22  ;;  %v1862_v16 = vadd.f32 %v1855_v20, %v1846_v61  ;;  %v1887_v22 = vmul.f32 %v10815_v31, %v13371_v9  ;;  %v13374_v2 = vld [vmem:[#allocation100_spill] sm:$0xff]  ;;  %v8591_v61 = vld [vmem:[%s12872_s1 + $0x2d0] sm:$0xff]  }
 0x152   :  { %8341 = vmatprep.subr.bf16.mxu1 %v13288_v21  ;;  %7841 = vmatpush3.bf16.msra.mxu0 %v8585_v41  ;;  %v11053_v34 = vadd.f32 %v3361_v19, %v3352_v44  ;;  %v1860_v41 = vadd.f32 %v1853_v60, %v1844_v55  ;;  %v13373_v60 = vld [vmem:[#allocation82_spill] sm:$0xff]  ;;  %v1901_v55 = vmul.f32 %v10837_v1, %v13374_v2  ;;  %v11082_v44 = vstv %s11024_s19  ;;  %s11542_s19 = sld [smem:[#allocation4 + $0x6]] }
 0x153   :  { %7842 = vmatprep.subr.bf16.mxu0 %v8587_v10  ;;  %v2667_v53 = vadd.f32 %v2660_v32, %v2651_v25  ;;  %v8589_v10 = vld [vmem:[%s12872_s1 + $0x358] sm:$0xff]   ;;  %v1111_v47 = vadd.f32 %v1104_v39, %v13373_v60  ;;  %v1878_v18 = vadd.f32 %v1871_v58, %v1862_v16  ;;  %v1903_v20 = vmul.f32 %v10837_v1, %v13375_v38  ;;  %v13378_v25 = vld [vmem:[#allocation68_spill] sm:$0xff] }
 0x154   :  { %13369 = vst [vmem:[#allocation8_spill] sm:$0xff] %v11053_v34  ;;  %v1876_v19 = vadd.f32 %v1869_v50, %v1860_v41  ;;  %v8593_v50 = vld [vmem:[%s12872_s1 + $0x308] sm:$0xff]  }
 0x155   :  { %8342 = vmatpush3.bf16.msra.mxu1 %v8586_v46  ;;  %v2683_v45 = vadd.f32 %v2676_v24, %v2667_v53  ;;  %v1127_v39 = vadd.f32 %v1120_v6, %v1111_v47  ;;  %v11085_v46 = vadd.f32 %v10973_v62, %v3354_v56  ;;  %v1894_v58 = vadd.f32 %v1887_v22, %v1878_v18  ;;  %v13380_v22 = vld [vmem:[#allocation75_spill] sm:$0xff] }
 0x156   :  { %8343 = vmatprep.subr.bf16.mxu1 %v13288_v21  ;;  %7843 = vmatpush3.bf16.msra.mxu0 %v8588_v43  ;;  %v1892_v32 = vadd.f32 %v1885_v7, %v1876_v19  ;;  %v3394_v43 = vmul.f32 %v10962_v54, %v13321_v57  ;;  %v3349_v24 = vmul.f32 %v13352_v30, %v10459_v49  ;;  %v8592_v7 = vld [vmem:[%s12872_s1 + $0x350] sm:$0xff]   ;;  %v8596_v30 = vld [vmem:[%s12872_s1 + $0x300] sm:$0xff]  }
 0x157   :  { %7844 = vmatprep.subr.bf16.mxu0 %v8590_v42  ;;  %13376 = vst [vmem:[#allocation91_spill] sm:$0xff] %v11085_v46  ;;  %v11090_v16 = vadd.f32 %v11082_v44, %v2683_v45  ;;  %v3383_v42 = vadd.f32 %v10969_v48, %v13378_v25  ;;  %v1150_v56 = vadd.f32 %v10620_v33, %v1141_v26  ;;  %v8597_v26 = vld [vmem:[%s12872_s1 + $0x2c0] sm:$0xff]   ;;  %v13411_v46 = vld [vmem:[#allocation105_spill] sm:$0xff] }
 0x158   :  { %v1143_v62 = vadd.f32 %v1136_v23, %v1127_v39  ;;  %v1908_v6 = vadd.f32 %v1901_v55, %v1892_v32  ;;  %v1910_v48 = vadd.f32 %v1903_v20, %v1894_v58  ;;  %v3385_v23 = vadd.f32 %v10987_v0, %v13380_v22  ;;  %v8600_v39 = vld [vmem:[%s12872_s1 + $0x478] sm:$0xff]   ;;  %v8604_v22 = vld [vmem:[%s12872_s1 + $0x470] sm:$0xff]  }
 0x159   :  { %13377 = vst [vmem:[#allocation10_spill] sm:$0xff] %v11090_v16  ;;  %8344 = vmatpush3.bf16.msra.mxu1 %v8589_v10  ;;  %v11110_v41 = vadd.f32 %v10983_v8, %v3383_v42  ;;  %v3365_v53 = vmul.f32 %v13354_v11, %v10474_v12  ;;  %v8595_v10 = vld [vmem:[%s12872_s1 + $0x348] sm:$0xff]   ;;  %v3380_v8 = vmul.f32 %v10949_v28, %v10491_v63  ;;  %v13382_v11 = vld [vmem:[#allocation28_spill] sm:$0xff]  ;;  %v1157_v19 = vmax.f32 %v1150_v56, 0.0  ;;  %v8603_v56 = vld [vmem:[%s12872_s1 + $0x3f0] sm:$0xff]  }
 0x15a   :  { %8345 = vmatprep.subr.bf16.mxu1 %v13288_v21  ;;  %7845 = vmatpush3.bf16.msra.mxu0 %v8591_v61  ;;  %v11122_v60 = vadd.f32 %v3394_v43, %v3385_v23  ;;  %v1917_v0 = vadd.f32 %v10882_v36, %v1908_v6  ;;  %v3356_v47 = vadd.f32 %v3349_v24, %v13382_v11  ;;  %v8599_v61 = vld [vmem:[%s12872_s1 + $0x3f8] sm:$0xff]   ;;  %v8605_v23 = vld [vmem:[%s12872_s1 + $0x3b0] sm:$0xff]  }
 0x15b   :  { %13379 = vst [vmem:[#allocation12_spill] sm:$0xff] %v11110_v41  ;;  %7846 = vmatprep.subr.bf16.mxu0 %v8593_v50  ;;  %v1152_v55 = vadd.f32 %v10620_v33, %v1143_v62  ;;  %v1919_v18 = vadd.f32 %v10882_v36, %v1910_v48  ;;  %v3396_v20 = vmul.f32 %v10962_v54, %v10497_v29  ;;  %v8598_v33 = vld [vmem:[%s12872_s1 + $0x340] sm:$0xff]   ;;  %v13384_v43 = vld [vmem:[#allocation19_spill] sm:$0xff]  ;;  %v13408_v41 = vld [vmem:[#allocation58_spill] sm:$0xff] }
 0x15c   :  { %13381 = vst [vmem:[#allocation25_spill] sm:$0xff] %v11122_v60  ;;  %v11140_v45 = vadd.f32 %v3365_v53, %v3356_v47  ;;  %v3382_v50 = vmul.f32 %v10949_v28, %v10481_v59  ;;  %v1924_v32 = vmax.f32 %v1917_v0, 0.0  ;;  %v3387_v58 = vadd.f32 %v3380_v8, %v13384_v43  ;;  %v8601_v24 = vld [vmem:[%s12872_s1 + $0x3b8] sm:$0xff]   ;;  %v13389_v8 = vld [vmem:[#allocation62_spill] sm:$0xff]  ;;  %v8608_v43 = vld [vmem:[%s12872_s1 + $0x468] sm:$0xff]  }
 0x15d   :  { %8346 = vmatpush3.bf16.msra.mxu1 %v8592_v7  ;;  %v3398_v25 = vmul.f32 %v10962_v54, %v10506_v4  ;;  %v1159_v42 = vmax.f32 %v1152_v55, 0.0  ;;  %v1926_v7 = vmax.f32 %v1919_v18, 0.0  ;;  %v1164_v62 = vpack.c.bf16 %v1157_v19, %v1157_v19  ;;  %v8602_v6 = vld [vmem:[%s12872_s1 + $0x438] sm:$0xff]  }
 0x15e   :  { %8347 = vmatprep.subr.bf16.mxu1 %v13288_v21  ;;  %7847 = vmatpush3.bf16.msra.mxu0 %v8594_v27  ;;  %13383 = vst [vmem:[#allocation38_spill] sm:$0xff] %v11140_v45  ;;  %v11163_v27 = vadd.f32 %v3396_v20, %v3387_v58  ;;  %v11174_v53 = vstv %s11107_s24  ;;  %v4131_v0 = vmul.f32 %v13389_v8, %v13309_v37  ;;  %v11180_v47 = vstv %s11127_s16  ;;  %v13409_v45 = vld [vmem:[#allocation69_spill] sm:$0xff]  ;;  %v13417_v28 = vld [vmem:[#allocation31_spill] sm:$0xff]  ;;  %s11508_s24 = sld [smem:[#allocation2 + $0x385]] }
 0x15f   :  { %7848 = vmatprep.subr.bf16.mxu0 %v8596_v30  ;;  %v13386_v30 = vld [vmem:[#allocation43_spill] sm:$0xff]  ;;  %13387 = vst [vmem:[#allocation66_spill] sm:$0xff] %v11174_v53  ;;  %v1931_v11 = vpack.c.bf16 %v1924_v32, %v1924_v32  ;;  %13390 = vst [vmem:[#allocation73_spill] sm:$0xff] %v11180_v47  ;;  %v3414_v19 = vmul.f32 %v11174_v53, %v10538_v13  ;;  %v1166_v55 = vpack.c.bf16 %v1159_v42, %v1159_v42  ;;  %v13392_v42 = vld [vmem:[#allocation53_spill] sm:$0xff] }
 0x160   :  { %13385 = vst [vmem:[#allocation92_spill] sm:$0xff] %v11163_v27  ;;  %v4115_v48 = vmul.f32 %v13386_v30, %v13333_v3  ;;  %v3430_v20 = vmul.f32 %v11180_v47, %v10569_v5  ;;  %v4117_v32 = vmul.f32 %v13386_v30, %v13312_v15  ;;  %v13415_v53 = vld [vmem:[#allocation76_spill] sm:$0xff] }
 0x161   :  { %8348 = vmatpush3.bf16.msra.mxu1 %v8595_v10  ;;  %v13388_v10 = vld [vmem:[#allocation48_spill] sm:$0xff] }
 0x162   :  { %8349 = vmatprep.subr.bf16.mxu1 %v13288_v21  ;;  %7849 = vmatpush3.bf16.msra.mxu0 %v8597_v26  ;;  %v3389_v26 = vadd.f32 %v3382_v50, %v13388_v10  ;;  %v1933_v50 = vpack.c.bf16 %v1926_v7, %v1926_v7  ;;  %v8609_v7 = vld [vmem:[%s12872_s1 + $0x3a8] sm:$0xff]  }
 0x163   :  { %7865 = vmatprep.subr.bf16.mxu0 %v8599_v61  ;;  %v8607_v61 = vld [vmem:[%s12872_s1 + $0x3e8] sm:$0xff]  }
 0x164   :  { %v3405_v18 = vadd.f32 %v3398_v25, %v3389_v26 }
 0x165   :  { %8350 = vmatpush3.bf16.msra.mxu1 %v8598_v33  ;;  %1729 = vmatmul.mubr.bf16.vlgmr.msra.gmra.mxu0 %v1164_v62  ;;  %v11192_v33 = vstv %s11136_s20  ;;  %v8611_v62 = vld [vmem:[%s12872_s1 + $0x3e0] sm:$0xff]  }
 0x166   :  { %7887 = vmatprep.subr.bf16.mxu1 %v8600_v39  ;;  %7866 = vmatpush3.bf16.msra.mxu0 %v8601_v24  ;;  %13391 = vst [vmem:[#allocation34_spill] sm:$0xff] %v11192_v33  ;;  %v8606_v39 = vld [vmem:[%s12872_s1 + $0x430] sm:$0xff]   ;;  %v3421_v58 = vadd.f32 %v3414_v19, %v3405_v18  ;;  %v3446_v25 = vmul.f32 %v11192_v33, %v10553_v35 }
 0x167   :  { %2418 = vmatprep.mubr.bf16.mxu0 %v1931_v11  ;;  %7867 = vmatprep.subr.bf16.mxu0 %v8603_v56  ;;  %v4122_v24 = vadd.f32 %v4115_v48, %v13392_v42  ;;  %v4133_v56 = vmul.f32 %v13389_v8, %v13269_v51  ;;  %v13395_v11 = vld [vmem:[#allocation36_spill] sm:$0xff]  ;;  %v13403_v42 = vld [vmem:[#allocation87_spill] sm:$0xff] }
 0x168   :  { %8352 = vmatmul.mubr.bf16.vlgmr.msra.gmra.mxu1 %v1166_v55  ;;  %v3437_v10 = vadd.f32 %v3430_v20, %v3421_v58  ;;  %v4124_v19 = vadd.f32 %v4117_v32, %v13395_v11  ;;  %v11227_v20 = vstv %s11182_s28  ;;  %v13399_v32 = vld [vmem:[#allocation96_spill] sm:$0xff]  ;;  %v13405_v11 = vld [vmem:[#allocation90_spill] sm:$0xff]  ;;  %s11493_s28 = sld [smem:[#allocation2 + $0x384]] }
 0x169   :  { %7888 = vmatpush3.bf16.msra.mxu1 %v8602_v6  ;;  %2458 = vmatprep.mubr.bf16.mxu1 %v1933_v50  ;;  %v11213_v26 = vadd.f32 %v4131_v0, %v4122_v24  ;;  %v11216_v6 = vstv %s11059_s25  ;;  %13397 = vst [vmem:[#allocation41_spill] sm:$0xff] %v11227_v20  ;;  %v11230_v0 = vstv %s11070_s29  ;;  %v8613_v50 = vld [vmem:[%s12872_s1 + $0x3a0] sm:$0xff]   ;;  %s11435_s29 = sld [smem:[#allocation2 + $0x306]] }
 0x16a   :  { %7889 = vmatprep.subr.bf16.mxu1 %v8604_v22  ;;  %7868 = vmatpush3.bf16.msra.mxu0 %v8605_v23  ;;  %13394 = vst [vmem:[#allocation46_spill] sm:$0xff] %v11216_v6  ;;  %v3453_v48 = vadd.f32 %v3446_v25, %v3437_v10  ;;  %v4146_v55 = vmul.f32 %v11216_v6, %v13313_v52  ;;  %v8610_v22 = vld [vmem:[%s12872_s1 + $0x428] sm:$0xff]   ;;  %v13396_v23 = vld [vmem:[#allocation47_spill] sm:$0xff]  ;;  %13398 = vst [vmem:[#allocation108_spill] sm:$0xff] %v11230_v0 }
 0x16b   :  { %13393 = vst [vmem:[#allocation106_spill] sm:$0xff] %v11213_v26  ;;  %7869 = vmatprep.subr.bf16.mxu0 %v8607_v61  ;;  %v1841_v18 = vmul.f32 %v10676_v17, %v13396_v23  ;;  %v8612_v61 = vld [vmem:[%s12872_s1 + $0x460] sm:$0xff]   ;;  %v11243_v17 = vadd.f32 %v4133_v56, %v4124_v19  ;;  %v13402_v25 = vld [vmem:[#allocation93_spill] sm:$0xff]  ;;  %v4148_v24 = vmul.f32 %v11216_v6, %v13403_v42 }
 0x16c   :  { %v11241_v58 = vadd.f32 %v11227_v20, %v3453_v48  ;;  %v13404_v10 = vld [vmem:[#allocation81_spill] sm:$0xff]  ;;  %v4164_v48 = vmul.f32 %v11230_v0, %v13321_v57  ;;  %v4119_v56 = vmul.f32 %v13386_v30, %v10459_v49  ;;  %v4135_v19 = vmul.f32 %v13389_v8, %v10474_v12  ;;  %v8617_v8 = vld [vmem:[%s12872_s1 + $0x398] sm:$0xff]  }
 0x16d   :  { %7890 = vmatpush3.bf16.msra.mxu1 %v8606_v39  ;;  %v1868_v39 = vmul.f32 %v10804_v14, %v13399_v32  ;;  %13401 = vst [vmem:[#allocation27_spill] sm:$0xff] %v11243_v17  ;;  %v1857_v27 = vmul.f32 %v13405_v11, %v13404_v10  ;;  %v13406_v17 = vld [vmem:[#allocation98_spill] sm:$0xff]  ;;  %v13407_v26 = vld [vmem:[#allocation101_spill] sm:$0xff]  ;;  %v1873_v30 = vmul.f32 %v10804_v14, %v13408_v41  ;;  %v13410_v20 = vld [vmem:[#allocation83_spill] sm:$0xff] }
 0x16e   :  { %7891 = vmatprep.subr.bf16.mxu1 %v8608_v43  ;;  %7870 = vmatpush3.bf16.msra.mxu0 %v8609_v7  ;;  %13400 = vst [vmem:[#allocation51_spill] sm:$0xff] %v11241_v58  ;;  %v4162_v43 = vmul.f32 %v11230_v0, %v13402_v25  ;;  %v8615_v7 = vld [vmem:[%s12872_s1 + $0x3d8] sm:$0xff]   ;;  %v1884_v11 = vmul.f32 %v10815_v31, %v13406_v17 }
 0x16f   :  { %7871 = vmatprep.subr.bf16.mxu0 %v8611_v62  ;;  %v8614_v62 = vld [vmem:[%s12872_s1 + $0x420] sm:$0xff]   ;;  %v8616_v58 = vld [vmem:[%s12872_s1 + $0x458] sm:$0xff]   ;;  %v1848_v60 = vadd.f32 %v1841_v18, %v13407_v26  ;;  %v4153_v16 = vadd.f32 %v4146_v55, %v13409_v45  ;;  %v1875_v33 = vadd.f32 %v1868_v39, %v13410_v20  ;;  %v1900_v26 = vmul.f32 %v10837_v1, %v13411_v46  ;;  %v13412_v18 = vld [vmem:[#allocation13_spill] sm:$0xff] }
 0x170   :  { %v1870_v47 = vmul.f32 %v10804_v14, %v13412_v18  ;;  %v13413_v55 = vld [vmem:[#allocation102_spill] sm:$0xff]  ;;  %v4155_v34 = vadd.f32 %v4148_v24, %v13415_v53  ;;  %v4150_v20 = vmul.f32 %v11216_v6, %v10491_v63  ;;  %v13416_v39 = vld [vmem:[#allocation9_spill] sm:$0xff]  ;;  %v4126_v41 = vadd.f32 %v4119_v56, %v13417_v28  ;;  %v13418_v53 = vld [vmem:[#allocation107_spill] sm:$0xff] }
 0x171   :  { %7892 = vmatpush3.bf16.msra.mxu1 %v8610_v22  ;;  %v8619_v22 = vld [vmem:[%s12872_s1 + $0x3d0] sm:$0xff]   ;;  %v1864_v45 = vadd.f32 %v1857_v27, %v1848_v60  ;;  %v1886_v54 = vmul.f32 %v10815_v31, %v13416_v39  ;;  %v8618_v60 = vld [vmem:[%s12872_s1 + $0x418] sm:$0xff]   ;;  %v1891_v27 = vadd.f32 %v1884_v11, %v1875_v33  ;;  %v1905_v24 = vmul.f32 %v10837_v1, %v13418_v53  ;;  %v8623_v56 = vld [vmem:[%s12872_s1 + $0x3c8] sm:$0xff]  }
 0x172   :  { %7893 = vmatprep.subr.bf16.mxu1 %v8612_v61  ;;  %7872 = vmatpush3.bf16.msra.mxu0 %v8613_v50  ;;  %v1889_v61 = vmul.f32 %v10815_v31, %v13413_v55  ;;  %v11287_v50 = vadd.f32 %v4162_v43, %v4153_v16  ;;  %v8620_v16 = vld [vmem:[%s12872_s1 + $0x450] sm:$0xff]   ;;  %v13421_v11 = vld [vmem:[#allocation17_spill] sm:$0xff] }
 0x173   :  { %7873 = vmatprep.subr.bf16.mxu0 %v8615_v7  ;;  %v1880_v43 = vadd.f32 %v1873_v30, %v1864_v45  ;;  %v11305_v7 = vadd.f32 %v4164_v48, %v4155_v34  ;;  %v8621_v28 = vld [vmem:[%s12872_s1 + $0x390] sm:$0xff]   ;;  %v1902_v30 = vmul.f32 %v10837_v1, %v13421_v11  ;;  %v11318_v45 = vadd.f32 %v4135_v19, %v4126_v41  ;;  %v8624_v41 = vld [vmem:[%s12872_s1 + $0x448] sm:$0xff]  }
 0x174   :  { %13414 = vst [vmem:[#allocation67_spill] sm:$0xff] %v11287_v50  ;;  %v4166_v34 = vmul.f32 %v11230_v0, %v10497_v29 }
 0x175   :  { %7894 = vmatpush3.bf16.msra.mxu1 %v8614_v62  ;;  %13419 = vst [vmem:[#allocation74_spill] sm:$0xff] %v11305_v7  ;;  %v13420_v62 = vld [vmem:[#allocation24_spill] sm:$0xff]  ;;  %13422 = vst [vmem:[#allocation26_spill] sm:$0xff] %v11318_v45  ;;  %v1896_v48 = vadd.f32 %v1889_v61, %v1880_v43 }
 0x176   :  { %7895 = vmatprep.subr.bf16.mxu1 %v8616_v58  ;;  %7874 = vmatpush3.bf16.msra.mxu0 %v8617_v8  ;;  %v1877_v33 = vadd.f32 %v1870_v47, %v13420_v62  ;;  %v1907_v58 = vadd.f32 %v1900_v26, %v1891_v27  ;;  %v4152_v8 = vmul.f32 %v11216_v6, %v10481_v59  ;;  %v8622_v47 = vld [vmem:[%s12872_s1 + $0x410] sm:$0xff]   ;;  %v13423_v62 = vld [vmem:[#allocation20_spill] sm:$0xff] }
 0x177   :  { %7875 = vmatprep.subr.bf16.mxu0 %v8619_v22  ;;  %v1912_v19 = vadd.f32 %v1905_v24, %v1896_v48  ;;  %v4157_v50 = vadd.f32 %v4150_v20, %v13423_v62  ;;  %v4168_v22 = vmul.f32 %v11230_v0, %v10506_v4  ;;  %v8627_v26 = vld [vmem:[%s12872_s1 + $0x3c0] sm:$0xff]   ;;  %v13427_v24 = vld [vmem:[#allocation97_spill] sm:$0xff]  ;;  %v11376_v62 = vstv %s11316_s17  ;;  %s11637_s17 = sld [smem:[#allocation2 + $0x388]] }
 0x178   :  { %v1893_v7 = vadd.f32 %v1886_v54, %v1877_v33  ;;  %v8625_v54 = vld [vmem:[%s12872_s1 + $0x388] sm:$0xff]   ;;  %v13425_v27 = vld [vmem:[#allocation44_spill] sm:$0xff]  ;;  %13430 = vst [vmem:[#allocation23_spill] sm:$0xff] %v11376_v62 }
 0x179   :  { %7896 = vmatpush3.bf16.msra.mxu1 %v8618_v60  ;;  %v1916_v60 = vadd.f32 %v10882_v36, %v1907_v58  ;;  %v11342_v20 = vadd.f32 %v4166_v34, %v4157_v50  ;;  %v4885_v43 = vmul.f32 %v13425_v27, %v13333_v3  ;;  %v13428_v33 = vld [vmem:[#allocation29_spill] sm:$0xff]  ;;  %v8628_v34 = vld [vmem:[%s12872_s1 + $0x440] sm:$0xff]  }
 0x17a   :  { %7897 = vmatprep.subr.bf16.mxu1 %v8620_v16  ;;  %7876 = vmatpush3.bf16.msra.mxu0 %v8621_v28  ;;  %v1909_v61 = vadd.f32 %v1902_v30, %v1893_v7  ;;  %v11349_v16 = vstv %s11283_s10  ;;  %v4159_v28 = vadd.f32 %v4152_v8, %v13427_v24  ;;  %v8626_v7 = vld [vmem:[%s12872_s1 + $0x408] sm:$0xff]   ;;  %v4901_v30 = vmul.f32 %v13428_v33, %v13309_v37  ;;  %v8629_v58 = vld [vmem:[%s12872_s1 + $0x380] sm:$0xff]   ;;  %s11481_s10 = sld [smem:[#allocation2 + $0x308]] }
 0x17b   :  { %7877 = vmatprep.subr.bf16.mxu0 %v8623_v56  ;;  %13424 = vst [vmem:[#allocation42_spill] sm:$0xff] %v11342_v20  ;;  %13426 = vst [vmem:[#allocation61_spill] sm:$0xff] %v11349_v16  ;;  %v1921_v56 = vadd.f32 %v10882_v36, %v1912_v19  ;;  %v4184_v50 = vmul.f32 %v11349_v16, %v10538_v13  ;;  %v11370_v8 = vstv %s11303_s11  ;;  %v1923_v19 = vmax.f32 %v1916_v60, 0.0  ;;  %v8630_v60 = vld [vmem:[%s12872_s1 + $0x400] sm:$0xff]  }
 0x17c   :  { %v1918_v48 = vadd.f32 %v10882_v36, %v1909_v61  ;;  %13429 = vst [vmem:[#allocation18_spill] sm:$0xff] %v11370_v8  ;;  %v4887_v24 = vmul.f32 %v13425_v27, %v13312_v15  ;;  %v4216_v61 = vmul.f32 %v11376_v62, %v10553_v35 }
 0x17d   :  { %7898 = vmatpush3.bf16.msra.mxu1 %v8622_v47  ;;  %v4175_v47 = vadd.f32 %v4168_v22, %v4159_v28  ;;  %v13431_v22 = vld [vmem:[#allocation54_spill] sm:$0xff]  ;;  %v1928_v28 = vmax.f32 %v1921_v56, 0.0  ;;  %v4903_v56 = vmul.f32 %v13428_v33, %v13269_v51 }
 0x17e   :  { %7899 = vmatprep.subr.bf16.mxu1 %v8624_v41  ;;  %7878 = vmatpush3.bf16.msra.mxu0 %v8625_v54  ;;  %v8631_v41 = vld [vmem:[%s12872_s1 + $0x4f8] sm:$0xff]   ;;  %v4200_v54 = vmul.f32 %v11370_v8, %v10569_v5  ;;  %v1925_v45 = vmax.f32 %v1918_v48, 0.0 }
 0x17f   :  { %7879 = vmatprep.subr.bf16.mxu0 %v8627_v26  ;;  %v4191_v20 = vadd.f32 %v4184_v50, %v4175_v47  ;;  %v4892_v26 = vadd.f32 %v4885_v43, %v13431_v22  ;;  %v8632_v8 = vld [vmem:[%s12872_s1 + $0x4b8] sm:$0xff]   ;;  %v8634_v50 = vld [vmem:[%s12872_s1 + $0x4f0] sm:$0xff]   ;;  %v11407_v22 = vstv %s11346_s3 }
 0x180   :  { %13434 = vst [vmem:[#allocation30_spill] sm:$0xff] %v11407_v22  ;;  %v4932_v62 = vmul.f32 %v11407_v22, %v13402_v25  ;;  %v1932_v16 = vpack.c.bf16 %v1925_v45, %v1925_v45  ;;  %v8638_v45 = vld [vmem:[%s12872_s1 + $0x4a8] sm:$0xff]  }
 0x181   :  { %7900 = vmatpush3.bf16.msra.mxu1 %v8626_v7  ;;  %v4207_v47 = vadd.f32 %v4200_v54, %v4191_v20  ;;  %v11394_v43 = vadd.f32 %v4901_v30, %v4892_v26  ;;  %v11397_v7 = vstv %s11331_s22  ;;  %v8635_v20 = vld [vmem:[%s12872_s1 + $0x4b0] sm:$0xff]   ;;  %v13435_v54 = vld [vmem:[#allocation39_spill] sm:$0xff] }
 0x182   :  { %7901 = vmatprep.subr.bf16.mxu1 %v8628_v34  ;;  %7880 = vmatpush3.bf16.msra.mxu0 %v8629_v58  ;;  %13433 = vst [vmem:[#allocation59_spill] sm:$0xff] %v11397_v7  ;;  %v1930_v34 = vpack.c.bf16 %v1923_v19, %v1923_v19  ;;  %v8633_v58 = vld [vmem:[%s12872_s1 + $0x538] sm:$0xff]   ;;  %v4916_v48 = vmul.f32 %v11397_v7, %v13313_v52 }
 0x183   :  { %13432 = vst [vmem:[#allocation52_spill] sm:$0xff] %v11394_v43  ;;  %7909 = vmatprep.subr.bf16.mxu0 %v8631_v41  ;;  %v4223_v30 = vadd.f32 %v4216_v61, %v4207_v47  ;;  %v4894_v26 = vadd.f32 %v4887_v24, %v13435_v54  ;;  %v1935_v19 = vpack.c.bf16 %v1928_v28, %v1928_v28  ;;  %v8637_v41 = vld [vmem:[%s12872_s1 + $0x4e8] sm:$0xff]   ;;  %v11417_v43 = vstv %s11356_s14  ;;  %v8636_v28 = vld [vmem:[%s12872_s1 + $0x530] sm:$0xff]   ;;  %s11464_s14 = sld [smem:[#allocation2 + $0x307]] }
 0x184   :  { %13436 = vst [vmem:[#allocation82_spill] sm:$0xff] %v11417_v43  ;;  %v4918_v24 = vmul.f32 %v11397_v7, %v13403_v42  ;;  %v4905_v54 = vmul.f32 %v13428_v33, %v10474_v12 }
 0x185   :  { %7902 = vmatpush3.bf16.msra.mxu1 %v8630_v60  ;;  %2419 = vmatmul.mubr.bf16.vlgmr.msra.gmra.mxu0 %v1930_v34  ;;  %v11423_v61 = vadd.f32 %v11417_v43, %v4223_v30  ;;  %v11427_v60 = vadd.f32 %v4903_v56, %v4894_v26  ;;  %v4934_v34 = vmul.f32 %v11407_v22, %v13321_v57  ;;  %v13440_v56 = vld [vmem:[#allocation56_spill] sm:$0xff]  ;;  %v13453_v43 = vld [vmem:[#allocation89_spill] sm:$0xff] }
 0x186   :  { %8355 = vmatprep.subr.bf16.mxu1 %v13288_v21  ;;  %7910 = vmatpush3.bf16.msra.mxu0 %v8632_v8  ;;  %v13439_v8 = vld [vmem:[#allocation70_spill] sm:$0xff]  ;;  %v13443_v26 = vld [vmem:[#allocation60_spill] sm:$0xff] }
 0x187   :  { %13437 = vst [vmem:[#allocation100_spill] sm:$0xff] %v11423_v61  ;;  %2498 = vmatprep.mubr.bf16.mxu0 %v1935_v19  ;;  %7911 = vmatprep.subr.bf16.mxu0 %v8634_v50  ;;  %13438 = vst [vmem:[#allocation37_spill] sm:$0xff] %v11427_v60  ;;  %v4923_v47 = vadd.f32 %v4916_v48, %v13439_v8  ;;  %v4889_v50 = vmul.f32 %v13425_v27, %v10459_v49  ;;  %v13442_v27 = vld [vmem:[#allocation77_spill] sm:$0xff]  ;;  %v13449_v61 = vld [vmem:[#allocation63_spill] sm:$0xff] }
 0x188   :  { %2459 = vmatmul.mubr.bf16.vlgmr.msra.gmra.mxu1 %v1932_v16  ;;  %v8640_v16 = vld [vmem:[%s12872_s1 + $0x4e0] sm:$0xff]   ;;  %v1872_v48 = vmul.f32 %v10804_v14, %v13440_v56  ;;  %v1888_v19 = vmul.f32 %v10815_v31, %v13443_v26  ;;  %v4920_v8 = vmul.f32 %v11397_v7, %v10491_v63  ;;  %v13444_v14 = vld [vmem:[#allocation86_spill] sm:$0xff]  ;;  %v1904_v60 = vmul.f32 %v10837_v1, %v13449_v61  ;;  %v13456_v26 = vld [vmem:[#allocation11_spill] sm:$0xff] }
 0x189   :  { %8356 = vmatpush3.bf16.msra.mxu1 %v8633_v58  ;;  %8371 = vmatprep.mubr.msk.bf16.mxu1 %vm8980_vm8, %v13288_v21  ;;  %v11450_v30 = vadd.f32 %v4932_v62, %v4923_v47  ;;  %v4925_v58 = vadd.f32 %v4918_v24, %v13442_v27  ;;  %v13445_v62 = vld [vmem:[#allocation65_spill] sm:$0xff]  ;;  %v8641_v31 = vld [vmem:[%s12872_s1 + $0x4a0] sm:$0xff]  }
 0x18a   :  { %8357 = vmatprep.subr.bf16.mxu1 %v13288_v21  ;;  %7912 = vmatpush3.bf16.msra.mxu0 %v8635_v20  ;;  %v8639_v20 = vld [vmem:[%s12872_s1 + $0x528] sm:$0xff]   ;;  %v2607_v47 = vmul.f32 %v13445_v62, %v13444_v14  ;;  %v13448_v27 = vld [vmem:[#allocation16_spill] sm:$0xff]  ;;  %v11526_v14 = vstv %s11435_s29 }
 0x18b   :  { %13441 = vst [vmem:[#allocation68_spill] sm:$0xff] %v11450_v30  ;;  %7913 = vmatprep.subr.bf16.mxu0 %v8637_v41  ;;  %v11466_v33 = vadd.f32 %v4934_v34, %v4925_v58  ;;  %v13447_v41 = vld [vmem:[#allocation32_spill] sm:$0xff]  ;;  %v1879_v30 = vadd.f32 %v1872_v48, %v13448_v27  ;;  %v13450_v34 = vld [vmem:[#allocation109_spill] sm:$0xff]  ;;  %v13455_v48 = vld [vmem:[#allocation35_spill] sm:$0xff]  ;;  %v4922_v27 = vmul.f32 %v11397_v7, %v10481_v59 }
 0x18c   :  { %v4896_v24 = vadd.f32 %v4889_v50, %v13447_v41  ;;  %v2609_v58 = vmul.f32 %v13445_v62, %v13450_v34  ;;  %v4936_v41 = vmul.f32 %v11407_v22, %v10497_v29  ;;  %v5671_v1 = vmul.f32 %v13455_v48, %v13309_v37  ;;  %v13459_v34 = vld [vmem:[#allocation110_spill] sm:$0xff]  ;;  %v13460_v56 = vld [vmem:[#allocation21_spill] sm:$0xff] }
 0x18d   :  { %8358 = vmatpush3.bf16.msra.mxu1 %v8636_v28  ;;  %13446 = vst [vmem:[#allocation75_spill] sm:$0xff] %v11466_v33  ;;  %v8643_v28 = vld [vmem:[%s12872_s1 + $0x4d8] sm:$0xff]   ;;  %v13452_v33 = vld [vmem:[#allocation57_spill] sm:$0xff]  ;;  %v1895_v61 = vadd.f32 %v1888_v19, %v1879_v30  ;;  %v4927_v7 = vadd.f32 %v4920_v8, %v13460_v56  ;;  %v8646_v19 = vld [vmem:[%s12872_s1 + $0x4d0] sm:$0xff]  }
 0x18e   :  { %8359 = vmatprep.subr.bf16.mxu1 %v13288_v21  ;;  %7914 = vmatpush3.bf16.msra.mxu0 %v8638_v45  ;;  %v13451_v45 = vld [vmem:[#allocation45_spill] sm:$0xff]  ;;  %v2623_v0 = vmul.f32 %v13453_v43, %v13452_v33  ;;  %v11489_v6 = vadd.f32 %v4905_v54, %v4896_v24  ;;  %v8642_v54 = vld [vmem:[%s12872_s1 + $0x520] sm:$0xff]   ;;  %v13457_v24 = vld [vmem:[#allocation79_spill] sm:$0xff] }
 0x18f   :  { %v5655_v50 = vmul.f32 %v13451_v45, %v13333_v3  ;;  %7915 = vmatprep.subr.bf16.mxu0 %v8640_v16  ;;  %v2625_v3 = vmul.f32 %v13453_v43, %v13456_v26  ;;  %v4938_v16 = vmul.f32 %v11407_v22, %v10506_v4  ;;  %v2614_v37 = vadd.f32 %v2607_v47, %v13457_v24  ;;  %v8644_v30 = vld [vmem:[%s12872_s1 + $0x498] sm:$0xff]   ;;  %v13461_v47 = vld [vmem:[#allocation72_spill] sm:$0xff]  ;;  %v13462_v22 = vld [vmem:[#allocation50_spill] sm:$0xff] }
 0x190   :  { %13454 = vst [vmem:[#allocation28_spill] sm:$0xff] %v11489_v6  ;;  %v13458_v6 = vld [vmem:[#allocation88_spill] sm:$0xff]  ;;  %v2616_v24 = vadd.f32 %v2609_v58, %v13461_v47  ;;  %v2641_v56 = vmul.f32 %v13459_v34, %v13462_v22  ;;  %v8645_v8 = vld [vmem:[%s12872_s1 + $0x518] sm:$0xff]   ;;  %v11528_v53 = vadd.f32 %v4936_v41, %v4927_v7  ;;  %v13465_v58 = vld [vmem:[#allocation49_spill] sm:$0xff]  ;;  %v11540_v7 = vstv %s11464_s14 }
 0x191   :  { %8360 = vmatpush3.bf16.msra.mxu1 %v8639_v20  ;;  %v2639_v33 = vmul.f32 %v13459_v34, %v13458_v6  ;;  %v1911_v20 = vadd.f32 %v1904_v60, %v1895_v61  ;;  %v13463_v26 = vld [vmem:[#allocation84_spill] sm:$0xff]  ;;  %v4929_v47 = vadd.f32 %v4922_v27, %v13465_v58  ;;  %v8647_v41 = vld [vmem:[%s12872_s1 + $0x490] sm:$0xff]  }
 0x192   :  { %8361 = vmatprep.subr.bf16.mxu1 %v13288_v21  ;;  %7916 = vmatpush3.bf16.msra.mxu0 %v8641_v31  ;;  %v2630_v31 = vadd.f32 %v2623_v0, %v2614_v37  ;;  %v2655_v6 = vmul.f32 %v13463_v26, %v13370_v40  ;;  %13464 = vst [vmem:[#allocation19_spill] sm:$0xff] %v11528_v53  ;;  %v13466_v0 = vld [vmem:[#allocation14_spill] sm:$0xff] }
 0x193   :  { %7917 = vmatprep.subr.bf16.mxu0 %v8643_v28  ;;  %v2632_v61 = vadd.f32 %v2625_v3, %v2616_v24  ;;  %v2657_v60 = vmul.f32 %v13463_v26, %v13371_v9  ;;  %v4954_v28 = vmul.f32 %v11526_v14, %v10538_v13  ;;  %v2671_v37 = vmul.f32 %v13466_v0, %v13374_v2  ;;  %v8649_v24 = vld [vmem:[%s12872_s1 + $0x4c8] sm:$0xff]  }
 0x194   :  { %v2646_v22 = vadd.f32 %v2639_v33, %v2630_v31  ;;  %v2673_v40 = vmul.f32 %v13466_v0, %v13375_v38  ;;  %v4945_v3 = vadd.f32 %v4938_v16, %v4929_v47  ;;  %v4970_v33 = vmul.f32 %v11540_v7, %v10569_v5 }
 0x195   :  { %8362 = vmatpush3.bf16.msra.mxu1 %v8642_v54  ;;  %v2648_v27 = vadd.f32 %v2641_v56, %v2632_v61  ;;  %v5657_v54 = vmul.f32 %v13451_v45, %v13312_v15  ;;  %v13467_v56 = vld [vmem:[#allocation55_spill] sm:$0xff]  ;;  %v5673_v47 = vmul.f32 %v13455_v48, %v13269_v51  ;;  %v8648_v15 = vld [vmem:[%s12872_s1 + $0x510] sm:$0xff]   ;;  %v8652_v51 = vld [vmem:[%s12872_s1 + $0x4c0] sm:$0xff]  }
 0x196   :  { %8363 = vmatprep.subr.bf16.mxu1 %v13288_v21  ;;  %7918 = vmatpush3.bf16.msra.mxu0 %v8644_v30  ;;  %v2662_v31 = vadd.f32 %v2655_v6, %v2646_v22  ;;  %v11556_v30 = vstv %s11481_s10  ;;  %v4961_v53 = vadd.f32 %v4954_v28, %v4945_v3  ;;  %v5662_v61 = vadd.f32 %v5655_v50, %v13467_v56  ;;  %v8650_v50 = vld [vmem:[%s12872_s1 + $0x488] sm:$0xff]   ;;  %v13468_v3 = vld [vmem:[#allocation64_spill] sm:$0xff]  ;;  %s11676_s10 = sld [smem:[#allocation4 + $0x7]] }
 0x197   :  { %7919 = vmatprep.subr.bf16.mxu0 %v8646_v19  ;;  %v2664_v58 = vadd.f32 %v2657_v60, %v2648_v27  ;;  %v4986_v16 = vmul.f32 %v11556_v30, %v10553_v35  ;;  %v1920_v6 = vadd.f32 %v10882_v36, %v1911_v20  ;;  %v11568_v19 = vstv %s11493_s28  ;;  %v8651_v20 = vld [vmem:[%s12872_s1 + $0x508] sm:$0xff]   ;;  %s11609_s28 = sld [smem:[#allocation2 + $0x387]] }
 0x198   :  { %v2678_v22 = vadd.f32 %v2671_v37, %v2662_v31  ;;  %v4977_v60 = vadd.f32 %v4970_v33, %v4961_v53  ;;  %v11577_v28 = vadd.f32 %v5671_v1, %v5662_v61  ;;  %v5686_v36 = vmul.f32 %v11568_v19, %v13313_v52  ;;  %v13470_v61 = vld [vmem:[#allocation71_spill] sm:$0xff] }
 0x199   :  { %8364 = vmatpush3.bf16.msra.mxu1 %v8645_v8  ;;  %v2680_v8 = vadd.f32 %v2673_v40, %v2664_v58  ;;  %v11585_v37 = vstv %s11508_s24  ;;  %v5664_v40 = vadd.f32 %v5657_v54, %v13468_v3  ;;  %v5688_v52 = vmul.f32 %v11568_v19, %v13403_v42  ;;  %v8655_v54 = vld [vmem:[%s12872_s1 + $0x5b8] sm:$0xff]  }
 0x19a   :  { %8365 = vmatprep.subr.bf16.mxu1 %v13288_v21  ;;  %7920 = vmatpush3.bf16.msra.mxu0 %v8647_v41  ;;  %v8653_v41 = vld [vmem:[%s12872_s1 + $0x480] sm:$0xff]   ;;  %v4993_v27 = vadd.f32 %v4986_v16, %v4977_v60  ;;  %v5702_v53 = vmul.f32 %v11585_v37, %v13402_v25  ;;  %v2687_v1 = vadd.f32 %v11082_v44, %v2678_v22  ;;  %v11597_v33 = vstv %s11542_s19  ;;  %v13472_v60 = vld [vmem:[#allocation78_spill] sm:$0xff] }
 0x19b   :  { %7921 = vmatprep.subr.bf16.mxu0 %v8649_v24  ;;  %v1927_v24 = vmax.f32 %v1920_v6, 0.0  ;;  %v2689_v25 = vadd.f32 %v11082_v44, %v2680_v8  ;;  %v11611_v42 = vadd.f32 %v5673_v47, %v5664_v40  ;;  %v5704_v58 = vmul.f32 %v11585_v37, %v13321_v57  ;;  %v8654_v16 = vld [vmem:[%s12872_s1 + $0x500] sm:$0xff]   ;;  %v8656_v6 = vld [vmem:[%s12872_s1 + $0x638] sm:$0xff]  }
 0x19c   :  { %v11607_v31 = vadd.f32 %v11597_v33, %v4993_v27  ;;  %v8657_v47 = vld [vmem:[%s12872_s1 + $0x578] sm:$0xff]   ;;  %v5659_v22 = vmul.f32 %v13451_v45, %v10459_v49  ;;  %v2694_v57 = vmax.f32 %v2687_v1, 0.0  ;;  %v5675_v49 = vmul.f32 %v13455_v48, %v10474_v12  ;;  %v8661_v1 = vld [vmem:[%s12872_s1 + $0x570] sm:$0xff]   ;;  %v8663_v48 = vld [vmem:[%s12872_s1 + $0x5a8] sm:$0xff]  }
 0x19d   :  { %8366 = vmatpush3.bf16.msra.mxu1 %v8648_v15  ;;  %v5693_v15 = vadd.f32 %v5686_v36, %v13470_v61  ;;  %v5695_v36 = vadd.f32 %v5688_v52, %v13472_v60  ;;  %v13473_v27 = vld [vmem:[#allocation15_spill] sm:$0xff]  ;;  %v2696_v40 = vmax.f32 %v2689_v25, 0.0  ;;  %v1934_v45 = vpack.c.bf16 %v1927_v24, %v1927_v24  ;;  %v13477_v60 = vld [vmem:[#allocation22_spill] sm:$0xff] }
 0x19e   :  { %8367 = vmatprep.subr.bf16.mxu1 %v13288_v21  ;;  %7922 = vmatpush3.bf16.msra.mxu0 %v8650_v50  ;;  %13469 = vst [vmem:[#allocation43_spill] sm:$0xff] %v11607_v31  ;;  %v8659_v50 = vld [vmem:[%s12872_s1 + $0x5b0] sm:$0xff]   ;;  %v1929_v3 = vmax.f32 %v13473_v27, 0.0  ;;  %v2701_v12 = vpack.c.bf16 %v2694_v57, %v2694_v57  ;;  %v5708_v57 = vmul.f32 %v11585_v37, %v10506_v4  ;;  %v13478_v27 = vld [vmem:[#allocation99_spill] sm:$0xff] }
 0x19f   :  { %7923 = vmatprep.subr.bf16.mxu0 %v8652_v51  ;;  %v7731_v56 = vpop.f32.mrf.mxu0  ;;  %v11630_v8 = vadd.f32 %v5702_v53, %v5693_v15  ;;  %v11644_v52 = vadd.f32 %v5704_v58, %v5695_v36  ;;  %v2703_v15 = vpack.c.bf16 %v2696_v40, %v2696_v40  ;;  %v11685_v36 = vstv %s11599_s26 }
 0x1a0   :  { %v1936_v58 = vpack.c.bf16 %v1929_v3, %v1929_v3  ;;  %v2611_v40 = vmul.f32 %v13445_v62, %v13396_v23  ;;  %v2638_v62 = vmul.f32 %v13459_v34, %v13399_v32 }
 0x1a1   :  { %8368 = vmatpush3.bf16.msra.mxu1 %v8651_v20  ;;  %v7732_v51 = vpop.f32.mrf.mxu0  ;;  %13471 = vst [vmem:[#allocation48_spill] sm:$0xff] %v11630_v8  ;;  %v8658_v20 = vld [vmem:[%s12872_s1 + $0x5f8] sm:$0xff]   ;;  %13474 = vst [vmem:[#allocation62_spill] sm:$0xff] %v11644_v52  ;;  %v13504_v8 = vld [vmem:[#allocation50_spill] sm:$0xff] }
 0x1a2   :  { %8369 = vmatprep.subr.bf16.mxu1 %v13288_v21  ;;  %7924 = vmatpush3.bf16.msra.mxu0 %v8653_v41  ;;  %v11635_v61 = vadd.f32 %v7732_v51, %v7731_v56  ;;  %v8660_v41 = vld [vmem:[%s12872_s1 + $0x630] sm:$0xff]   ;;  %v5690_v56 = vmul.f32 %v11568_v19, %v10491_v63  ;;  %v8665_v63 = vld [vmem:[%s12872_s1 + $0x568] sm:$0xff]   ;;  %v13503_v52 = vld [vmem:[#allocation91_spill] sm:$0xff] }
 0x1a3   :  { %7940 = vmatprep.subr.bf16.mxu0 %v8655_v54  ;;  %v7734_v53 = vpop.f32.mrf.mxu0  ;;  %v13475_v54 = vld [vmem:[#allocation33_spill] sm:$0xff] }
 0x1a4   :  { %v5666_v25 = vadd.f32 %v5659_v22, %v13475_v54  ;;  %v8662_v22 = vld [vmem:[%s12872_s1 + $0x5f0] sm:$0xff]   ;;  %v8669_v53 = vld [vmem:[%s12872_s1 + $0x560] sm:$0xff]  }
 0x1a5   :  { %8370 = vmatpush3.bf16.msra.mxu1 %v8654_v16  ;;  %2499 = vmatmul.mubr.bf16.vlgmr.msra.gmra.mxu0 %v1934_v45  ;;  %v7735_v24 = vpop.f32.mrf.mxu0  ;;  %v5692_v16 = vmul.f32 %v11568_v19, %v10481_v59  ;;  %v8667_v59 = vld [vmem:[%s12872_s1 + $0x5a0] sm:$0xff]   ;;  %v5724_v45 = vmul.f32 %v11685_v36, %v10538_v13  ;;  %v8671_v13 = vld [vmem:[%s12872_s1 + $0x598] sm:$0xff]  }
 0x1a6   :  { %7962 = vmatprep.subr.bf16.mxu1 %v8656_v6  ;;  %7941 = vmatpush3.bf16.msra.mxu0 %v8657_v47  ;;  %v11658_v51 = vadd.f32 %v5675_v49, %v5666_v25  ;;  %v8664_v6 = vld [vmem:[%s12872_s1 + $0x628] sm:$0xff]   ;;  %v5706_v47 = vmul.f32 %v11585_v37, %v10497_v29  ;;  %v5697_v29 = vadd.f32 %v5690_v56, %v13477_v60  ;;  %v11691_v49 = vstv %s11609_s28  ;;  %v13481_v56 = vld [vmem:[#allocation80_spill] sm:$0xff] }
 0x1a7   :  { %3188 = vmatprep.mubr.bf16.mxu0 %v2701_v12  ;;  %7942 = vmatprep.subr.bf16.mxu0 %v8659_v50  ;;  %v8666_v50 = vld [vmem:[%s12872_s1 + $0x5e8] sm:$0xff]   ;;  %v5699_v3 = vadd.f32 %v5692_v16, %v13478_v27  ;;  %v2627_v12 = vmul.f32 %v13453_v43, %v13404_v10  ;;  %v2654_v24 = vmul.f32 %v13463_v26, %v13406_v17  ;;  %v13482_v16 = vld [vmem:[#allocation58_spill] sm:$0xff] }
 0x1a8   :  { %13476 = vst [vmem:[#allocation53_spill] sm:$0xff] %v11658_v51  ;;  %8372 = vmatmul.mubr.bf16.vlgmr.msra.gmra.mxu1 %v1936_v58  ;;  %v11693_v4 = vadd.f32 %v5706_v47, %v5697_v29  ;;  %v8672_v58 = vld [vmem:[%s12872_s1 + $0x618] sm:$0xff]   ;;  %v2670_v43 = vmul.f32 %v13466_v0, %v13411_v46  ;;  %v2659_v60 = vmul.f32 %v13463_v26, %v13413_v55 }
 0x1a9   :  { %7963 = vmatpush3.bf16.msra.mxu1 %v8658_v20  ;;  %3228 = vmatprep.mubr.bf16.mxu1 %v2703_v15  ;;  %v8668_v20 = vld [vmem:[%s12872_s1 + $0x620] sm:$0xff]   ;;  %v2618_v15 = vadd.f32 %v2611_v40, %v13481_v56  ;;  %v2656_v27 = vmul.f32 %v13463_v26, %v13416_v39  ;;  %v8674_v40 = vld [vmem:[%s12872_s1 + $0x5d8] sm:$0xff]  }
 0x1aa   :  { %7964 = vmatprep.subr.bf16.mxu1 %v8660_v41  ;;  %7943 = vmatpush3.bf16.msra.mxu0 %v8661_v1  ;;  %13479 = vst [vmem:[#allocation36_spill] sm:$0xff] %v11693_v4  ;;  %v5715_v41 = vadd.f32 %v5708_v57, %v5699_v3  ;;  %v5740_v1 = vmul.f32 %v11691_v49, %v10569_v5  ;;  %v8670_v5 = vld [vmem:[%s12872_s1 + $0x5e0] sm:$0xff]  }
 0x1ab   :  { %7944 = vmatprep.subr.bf16.mxu0 %v8663_v48  ;;  %v11713_v48 = vstv %s11637_s17 }
 0x1ac   :  { %13480 = vst [vmem:[#allocation47_spill] sm:$0xff] %v11713_v48  ;;  %v5731_v54 = vadd.f32 %v5724_v45, %v5715_v41  ;;  %v5756_v25 = vmul.f32 %v11713_v48, %v10553_v35  ;;  %v8673_v35 = vld [vmem:[%s12872_s1 + $0x558] sm:$0xff]   ;;  %v8676_v45 = vld [vmem:[%s12872_s1 + $0x610] sm:$0xff]  }
 0x1ad   :  { %7965 = vmatpush3.bf16.msra.mxu1 %v8662_v22  ;;  %v2643_v22 = vmul.f32 %v13459_v34, %v13482_v16 }
 0x1ae   :  { %7966 = vmatprep.subr.bf16.mxu1 %v8664_v6  ;;  %7945 = vmatpush3.bf16.msra.mxu0 %v8665_v63  ;;  %v8675_v6 = vld [vmem:[%s12872_s1 + $0x590] sm:$0xff]   ;;  %v13483_v63 = vld [vmem:[#allocation85_spill] sm:$0xff]  ;;  %v5747_v57 = vadd.f32 %v5740_v1, %v5731_v54  ;;  %v11754_v1 = vstv %s11676_s10  ;;  %v13486_v54 = vld [vmem:[#allocation40_spill] sm:$0xff] }
 0x1af   :  { %7946 = vmatprep.subr.bf16.mxu0 %v8667_v59  ;;  %v2645_v47 = vadd.f32 %v2638_v62, %v13483_v63  ;;  %v2640_v59 = vmul.f32 %v13459_v34, %v13412_v18  ;;  %v13484_v62 = vld [vmem:[#allocation107_spill] sm:$0xff]  ;;  %13485 = vst [vmem:[#allocation96_spill] sm:$0xff] %v11754_v1 }
 0x1b0   :  { %v5763_v3 = vadd.f32 %v5756_v25, %v5747_v57  ;;  %v2675_v41 = vmul.f32 %v13466_v0, %v13484_v62  ;;  %v8684_v57 = vld [vmem:[%s12872_s1 + $0x600] sm:$0xff]  }
 0x1b1   :  { %7967 = vmatpush3.bf16.msra.mxu1 %v8666_v50  ;;  %v2634_v50 = vadd.f32 %v2627_v12, %v2618_v15  ;;  %v2661_v29 = vadd.f32 %v2654_v24, %v2645_v47  ;;  %v8679_v12 = vld [vmem:[%s12872_s1 + $0x588] sm:$0xff]   ;;  %v2647_v25 = vadd.f32 %v2640_v59, %v13486_v54 }
 0x1b2   :  { %7968 = vmatprep.subr.bf16.mxu1 %v8668_v20  ;;  %7947 = vmatpush3.bf16.msra.mxu0 %v8669_v53  ;;  %v2672_v20 = vmul.f32 %v13466_v0, %v13421_v11  ;;  %v8682_v59 = vld [vmem:[%s12872_s1 + $0x5c8] sm:$0xff]  }
 0x1b3   :  { %7948 = vmatprep.subr.bf16.mxu0 %v8671_v13  ;;  %v2650_v53 = vadd.f32 %v2643_v22, %v2634_v50  ;;  %v8677_v13 = vld [vmem:[%s12872_s1 + $0x550] sm:$0xff]   ;;  %v2677_v24 = vadd.f32 %v2670_v43, %v2661_v29  ;;  %v2663_v15 = vadd.f32 %v2656_v27, %v2647_v25  ;;  %v8680_v22 = vld [vmem:[%s12872_s1 + $0x608] sm:$0xff]  }
 0x1b4   :  { %v8681_v43 = vld [vmem:[%s12872_s1 + $0x548] sm:$0xff]  }
 0x1b5   :  { %7969 = vmatpush3.bf16.msra.mxu1 %v8670_v5  ;;  %v11764_v5 = vadd.f32 %v11754_v1, %v5763_v3  ;;  %v2666_v56 = vadd.f32 %v2659_v60, %v2650_v53  ;;  %v2686_v63 = vadd.f32 %v11082_v44, %v2677_v24  ;;  %v2679_v47 = vadd.f32 %v2672_v20, %v2663_v15  ;;  %v8685_v60 = vld [vmem:[%s12872_s1 + $0x540] sm:$0xff]   ;;  %v8687_v3 = vld [vmem:[%s12872_s1 + $0x6b8] sm:$0xff]   ;;  %v8691_v24 = vld [vmem:[%s12872_s1 + $0x670] sm:$0xff]  }
 0x1b6   :  { %7970 = vmatprep.subr.bf16.mxu1 %v8672_v58  ;;  %7949 = vmatpush3.bf16.msra.mxu0 %v8673_v35  ;;  %v8678_v58 = vld [vmem:[%s12872_s1 + $0x5d0] sm:$0xff]   ;;  %v8688_v53 = vld [vmem:[%s12872_s1 + $0x678] sm:$0xff]   ;;  %v8693_v25 = vld [vmem:[%s12872_s1 + $0x6a8] sm:$0xff]  }
 0x1b7   :  { %13487 = vst [vmem:[#allocation93_spill] sm:$0xff] %v11764_v5  ;;  %7950 = vmatprep.subr.bf16.mxu0 %v8675_v6  ;;  %v2682_v35 = vadd.f32 %v2675_v41, %v2666_v56  ;;  %v8683_v6 = vld [vmem:[%s12872_s1 + $0x580] sm:$0xff]   ;;  %v2693_v29 = vmax.f32 %v2686_v63, 0.0  ;;  %v2688_v27 = vadd.f32 %v11082_v44, %v2679_v47  ;;  %v8690_v41 = vld [vmem:[%s12872_s1 + $0x6b0] sm:$0xff]   ;;  %v13502_v5 = vld [vmem:[#allocation73_spill] sm:$0xff] }
 0x1b8   :  { %v8701_v1 = vld [vmem:[%s12872_s1 + $0x6d8] sm:$0xff]  }
 0x1b9   :  { %7971 = vmatpush3.bf16.msra.mxu1 %v8674_v40  ;;  %v2691_v50 = vadd.f32 %v11082_v44, %v2682_v35  ;;  %v8686_v40 = vld [vmem:[%s12872_s1 + $0x5c0] sm:$0xff]   ;;  %v2695_v20 = vmax.f32 %v2688_v27, 0.0 }
 0x1ba   :  { %7972 = vmatprep.subr.bf16.mxu1 %v8676_v45  ;;  %7951 = vmatpush3.bf16.msra.mxu0 %v8677_v13  ;;  %v2700_v13 = vpack.c.bf16 %v2693_v29, %v2693_v29  ;;  %v8696_v35 = vld [vmem:[%s12872_s1 + $0x6a0] sm:$0xff]  }
 0x1bb   :  { %7952 = vmatprep.subr.bf16.mxu0 %v8679_v12  ;;  %v2698_v45 = vmax.f32 %v2691_v50, 0.0  ;;  %v8689_v12 = vld [vmem:[%s12872_s1 + $0x6f8] sm:$0xff]   ;;  %v2702_v56 = vpack.c.bf16 %v2695_v20, %v2695_v20  ;;  %v8697_v27 = vld [vmem:[%s12872_s1 + $0x660] sm:$0xff]  }
 0x1bc   :  { %v13489_v50 = vld [vmem:[#allocation103_spill] sm:$0xff]  ;;  %v13492_v20 = vld [vmem:[#allocation104_spill] sm:$0xff] }
 0x1bd   :  { %7973 = vmatpush3.bf16.msra.mxu1 %v8678_v58  ;;  %v2705_v54 = vpack.c.bf16 %v2698_v45, %v2698_v45  ;;  %v8692_v58 = vld [vmem:[%s12872_s1 + $0x6f0] sm:$0xff]   ;;  %v13491_v45 = vld [vmem:[#allocation57_spill] sm:$0xff] }
 0x1be   :  { %7974 = vmatprep.subr.bf16.mxu1 %v8680_v22  ;;  %7953 = vmatpush3.bf16.msra.mxu0 %v8681_v43  ;;  %v8694_v22 = vld [vmem:[%s12872_s1 + $0x668] sm:$0xff]  }
 0x1bf   :  { %7954 = vmatprep.subr.bf16.mxu0 %v8683_v6 }
 0x1c1   :  { %7975 = vmatpush3.bf16.msra.mxu1 %v8682_v59  ;;  %v8695_v59 = vld [vmem:[%s12872_s1 + $0x6e8] sm:$0xff]  }
 0x1c2   :  { %7976 = vmatprep.subr.bf16.mxu1 %v8684_v57  ;;  %7955 = vmatpush3.bf16.msra.mxu0 %v8685_v60  ;;  %v13488_v57 = vld [vmem:[#allocation86_spill] sm:$0xff] }
 0x1c3   :  { %7984 = vmatprep.subr.bf16.mxu0 %v8687_v3  ;;  %v3377_v60 = vmul.f32 %v13489_v50, %v13488_v57  ;;  %v13490_v3 = vld [vmem:[#allocation56_spill] sm:$0xff] }
 0x1c5   :  { %7977 = vmatpush3.bf16.msra.mxu1 %v8686_v40  ;;  %3189 = vmatmul.mubr.bf16.vlgmr.msra.gmra.mxu0 %v2700_v13  ;;  %v2642_v40 = vmul.f32 %v13459_v34, %v13490_v3 }
 0x1c6   :  { %8375 = vmatprep.subr.bf16.mxu1 %v13288_v21  ;;  %7985 = vmatpush3.bf16.msra.mxu0 %v8688_v53  ;;  %v3393_v53 = vmul.f32 %v13492_v20, %v13491_v45 }
 0x1c7   :  { %3268 = vmatprep.mubr.bf16.mxu0 %v2705_v54  ;;  %7986 = vmatprep.subr.bf16.mxu0 %v8690_v41  ;;  %v13493_v41 = vld [vmem:[#allocation109_spill] sm:$0xff]  ;;  %v8698_v54 = vld [vmem:[%s12872_s1 + $0x6e0] sm:$0xff]  }
 0x1c8   :  { %3229 = vmatmul.mubr.bf16.vlgmr.msra.gmra.mxu1 %v2702_v56  ;;  %v7753_v15 = vpop.f32.mrf.mxu1  ;;  %v3379_v13 = vmul.f32 %v13489_v50, %v13493_v41 }
 0x1c9   :  { %8376 = vmatpush3.bf16.msra.mxu1 %v8689_v12  ;;  %8391 = vmatprep.mubr.msk.bf16.mxu1 %vm8980_vm8, %v13288_v21  ;;  %v13494_v12 = vld [vmem:[#allocation60_spill] sm:$0xff] }
 0x1ca   :  { %v7754_v43 = vpop.f32.mrf.mxu1  ;;  %8377 = vmatprep.subr.bf16.mxu1 %v13288_v21  ;;  %7987 = vmatpush3.bf16.msra.mxu0 %v8691_v24  ;;  %v2658_v24 = vmul.f32 %v13463_v26, %v13494_v12  ;;  %v8700_v26 = vld [vmem:[%s12872_s1 + $0x658] sm:$0xff]  }
 0x1cb   :  { %v7755_v6 = vadd.f32 %v7754_v43, %v7753_v15  ;;  %7988 = vmatprep.subr.bf16.mxu0 %v8693_v25  ;;  %v13495_v25 = vld [vmem:[#allocation8_spill] sm:$0xff]  ;;  %v8702_v43 = vld [vmem:[%s12872_s1 + $0x690] sm:$0xff]  }
 0x1cc   :  { %v7756_v63 = vpop.f32.mrf.mxu1  ;;  %v3384_v56 = vadd.f32 %v3377_v60, %v13495_v25  ;;  %v13496_v15 = vld [vmem:[#allocation88_spill] sm:$0xff]  ;;  %v13501_v25 = vld [vmem:[#allocation94_spill] sm:$0xff] }
 0x1cd   :  { %v11825_v47 = vadd.f32 %v7755_v6, %v11635_v61  ;;  %8378 = vmatpush3.bf16.msra.mxu1 %v8692_v58  ;;  %v8699_v61 = vld [vmem:[%s12872_s1 + $0x698] sm:$0xff]   ;;  %v13497_v58 = vld [vmem:[#allocation66_spill] sm:$0xff]  ;;  %v3425_v4 = vmul.f32 %v13502_v5, %v13501_v25 }
 0x1ce   :  { %v7757_v29 = vpop.f32.mrf.mxu1  ;;  %8379 = vmatprep.subr.bf16.mxu1 %v13288_v21  ;;  %7989 = vmatpush3.bf16.msra.mxu0 %v8694_v22  ;;  %v3409_v34 = vmul.f32 %v13497_v58, %v13496_v15  ;;  %v13498_v22 = vld [vmem:[#allocation11_spill] sm:$0xff]  ;;  %v3411_v51 = vmul.f32 %v13497_v58, %v13504_v8 }
 0x1cf   :  { %7990 = vmatprep.subr.bf16.mxu0 %v8696_v35  ;;  %v3395_v35 = vmul.f32 %v13492_v20, %v13498_v22  ;;  %v13499_v6 = vld [vmem:[#allocation95_spill] sm:$0xff]  ;;  %v3400_v29 = vadd.f32 %v3393_v53, %v3384_v56  ;;  %v3427_v53 = vmul.f32 %v13502_v5, %v13371_v9 }
 0x1d0   :  { %v2649_v63 = vadd.f32 %v2642_v40, %v13499_v6  ;;  %v13505_v6 = vld [vmem:[#allocation34_spill] sm:$0xff] }
 0x1d1   :  { %8380 = vmatpush3.bf16.msra.mxu1 %v8695_v59  ;;  %v13500_v59 = vld [vmem:[#allocation63_spill] sm:$0xff]  ;;  %v3416_v40 = vadd.f32 %v3409_v34, %v3400_v29  ;;  %v3443_v34 = vmul.f32 %v13505_v6, %v13375_v38 }
 0x1d2   :  { %8381 = vmatprep.subr.bf16.mxu1 %v13288_v21  ;;  %7991 = vmatpush3.bf16.msra.mxu0 %v8697_v27  ;;  %v2674_v60 = vmul.f32 %v13466_v0, %v13500_v59  ;;  %v3386_v27 = vadd.f32 %v3379_v13, %v13503_v52  ;;  %v2665_v31 = vadd.f32 %v2658_v24, %v2649_v63  ;;  %v8703_v52 = vld [vmem:[%s12872_s1 + $0x650] sm:$0xff]   ;;  %v8705_v13 = vld [vmem:[%s12872_s1 + $0x688] sm:$0xff]  }
 0x1d3   :  { %7992 = vmatprep.subr.bf16.mxu0 %v8699_v61  ;;  %v3441_v0 = vmul.f32 %v13505_v6, %v13374_v2 }
 0x1d4   :  { %v3402_v61 = vadd.f32 %v3395_v35, %v3386_v27  ;;  %v2681_v24 = vadd.f32 %v2674_v60, %v2665_v31  ;;  %v8704_v35 = vld [vmem:[%s12872_s1 + $0x6d0] sm:$0xff]   ;;  %v8706_v31 = vld [vmem:[%s12872_s1 + $0x648] sm:$0xff]   ;;  %v8709_v27 = vld [vmem:[%s12872_s1 + $0x640] sm:$0xff]  }
 0x1d5   :  { %8382 = vmatpush3.bf16.msra.mxu1 %v8698_v54  ;;  %v3432_v54 = vadd.f32 %v3425_v4, %v3416_v40  ;;  %v13506_v60 = vld [vmem:[#allocation41_spill] sm:$0xff] }
 0x1d6   :  { %8383 = vmatprep.subr.bf16.mxu1 %v13288_v21  ;;  %7993 = vmatpush3.bf16.msra.mxu0 %v8700_v26  ;;  %v3418_v56 = vadd.f32 %v3411_v51, %v3402_v61  ;;  %v8708_v51 = vld [vmem:[%s12872_s1 + $0x680] sm:$0xff]   ;;  %v2690_v4 = vadd.f32 %v11082_v44, %v2681_v24  ;;  %v8711_v44 = vld [vmem:[%s12872_s1 + $0x778] sm:$0xff]  }
 0x1d7   :  { %7994 = vmatprep.subr.bf16.mxu0 %v8702_v43  ;;  %v3448_v26 = vadd.f32 %v3441_v0, %v3432_v54  ;;  %v8707_v43 = vld [vmem:[%s12872_s1 + $0x6c8] sm:$0xff]   ;;  %v8710_v61 = vld [vmem:[%s12872_s1 + $0x6c0] sm:$0xff]   ;;  %v8712_v24 = vld [vmem:[%s12872_s1 + $0x7f8] sm:$0xff]  }
 0x1d8   :  { %v3434_v63 = vadd.f32 %v3427_v53, %v3418_v56  ;;  %v2697_v40 = vmax.f32 %v2690_v4, 0.0  ;;  %v8713_v54 = vld [vmem:[%s12872_s1 + $0x738] sm:$0xff]  }
 0x1d9   :  { %8384 = vmatpush3.bf16.msra.mxu1 %v8701_v1  ;;  %v3457_v29 = vadd.f32 %v13506_v60, %v3448_v26 }
 0x1da   :  { %8385 = vmatprep.subr.bf16.mxu1 %v13288_v21  ;;  %7995 = vmatpush3.bf16.msra.mxu0 %v8703_v52  ;;  %v3450_v1 = vadd.f32 %v3443_v34, %v3434_v63  ;;  %v13507_v52 = vld [vmem:[#allocation10_spill] sm:$0xff]  ;;  %v2704_v56 = vpack.c.bf16 %v2697_v40, %v2697_v40  ;;  %v8719_v40 = vld [vmem:[%s12872_s1 + $0x768] sm:$0xff]  }
 0x1db   :  { %7996 = vmatprep.subr.bf16.mxu0 %v8705_v13  ;;  %v3464_v53 = vmax.f32 %v3457_v29, 0.0  ;;  %v2699_v13 = vmax.f32 %v13507_v52, 0.0 }
 0x1dc   :  { %v3459_v0 = vadd.f32 %v13506_v60, %v3450_v1  ;;  %v8716_v1 = vld [vmem:[%s12872_s1 + $0x7f0] sm:$0xff]  }
 0x1dd   :  { %8386 = vmatpush3.bf16.msra.mxu1 %v8704_v35  ;;  %v8715_v35 = vld [vmem:[%s12872_s1 + $0x770] sm:$0xff]   ;;  %v3471_v63 = vpack.c.bf16 %v3464_v53, %v3464_v53 }
 0x1de   :  { %8387 = vmatprep.subr.bf16.mxu1 %v13288_v21  ;;  %7997 = vmatpush3.bf16.msra.mxu0 %v8706_v31  ;;  %v3466_v34 = vmax.f32 %v3459_v0, 0.0  ;;  %v8714_v31 = vld [vmem:[%s12872_s1 + $0x7b8] sm:$0xff]   ;;  %v8718_v53 = vld [vmem:[%s12872_s1 + $0x7b0] sm:$0xff]  }
 0x1df   :  { %7998 = vmatprep.subr.bf16.mxu0 %v8708_v51  ;;  %v2706_v51 = vpack.c.bf16 %v2699_v13, %v2699_v13 }
 0x1e0   :  { %v3473_v29 = vpack.c.bf16 %v3466_v34, %v3466_v34 }
 0x1e1   :  { %8388 = vmatpush3.bf16.msra.mxu1 %v8707_v43  ;;  %v8717_v43 = vld [vmem:[%s12872_s1 + $0x730] sm:$0xff]  }
 0x1e2   :  { %8389 = vmatprep.subr.bf16.mxu1 %v13288_v21  ;;  %7999 = vmatpush3.bf16.msra.mxu0 %v8709_v27 }
 0x1e3   :  { %8015 = vmatprep.subr.bf16.mxu0 %v8711_v44 }
 0x1e4   :  { %v7775_v26 = vpop.f32.mrf.mxu0 }
 0x1e5   :  { %8390 = vmatpush3.bf16.msra.mxu1 %v8710_v61  ;;  %3269 = vmatmul.mubr.bf16.vlgmr.msra.gmra.mxu0 %v2704_v56 }
 0x1e6   :  { %8037 = vmatprep.subr.bf16.mxu1 %v8712_v24  ;;  %8016 = vmatpush3.bf16.msra.mxu0 %v8713_v54  ;;  %v7776_v4 = vpop.f32.mrf.mxu0  ;;  %v8720_v24 = vld [vmem:[%s12872_s1 + $0x7e8] sm:$0xff]  }
 0x1e7   :  { %3958 = vmatprep.mubr.bf16.mxu0 %v3471_v63  ;;  %v7777_v27 = vadd.f32 %v7776_v4, %v7775_v26  ;;  %8017 = vmatprep.subr.bf16.mxu0 %v8715_v35  ;;  %v8721_v54 = vld [vmem:[%s12872_s1 + $0x728] sm:$0xff]   ;;  %v3381_v26 = vmul.f32 %v13489_v50, %v13396_v23  ;;  %v8727_v4 = vld [vmem:[%s12872_s1 + $0x758] sm:$0xff]   ;;  %v3397_v50 = vmul.f32 %v13492_v20, %v13404_v10 }
 0x1e8   :  { %v1000_v44 = vpop.f32.mrf.mxu1  ;;  %8392 = vmatmul.mubr.bf16.vlgmr.msra.gmra.mxu1 %v2706_v51  ;;  %v7778_v0 = vpop.f32.mrf.mxu0  ;;  %v8722_v35 = vld [vmem:[%s12872_s1 + $0x7a8] sm:$0xff]   ;;  %v8725_v51 = vld [vmem:[%s12872_s1 + $0x720] sm:$0xff]   ;;  %v8729_v20 = vld [vmem:[%s12872_s1 + $0x718] sm:$0xff]  }
 0x1e9   :  { %8038 = vmatpush3.bf16.msra.mxu1 %v8714_v31  ;;  %3998 = vmatprep.mubr.bf16.mxu1 %v3473_v29  ;;  %v961_v61 = vadd.f32 %v7777_v27, %v11825_v47  ;;  %v8723_v47 = vld [vmem:[%s12872_s1 + $0x760] sm:$0xff]   ;;  %v3424_v29 = vmul.f32 %v13502_v5, %v13406_v17  ;;  %v13508_v27 = vld [vmem:[#allocation38_spill] sm:$0xff]  ;;  %v8728_v0 = vld [vmem:[%s12872_s1 + $0x7d8] sm:$0xff]  }
 0x1ea   :  { %v8333_v52 = vpop.f32.mrf.mxu1  ;;  %8039 = vmatprep.subr.bf16.mxu1 %v8716_v1  ;;  %8018 = vmatpush3.bf16.msra.mxu0 %v8717_v43  ;;  %v7779_v13 = vpop.f32.mrf.mxu0  ;;  %v8724_v31 = vld [vmem:[%s12872_s1 + $0x7e0] sm:$0xff]   ;;  %v3408_v1 = vmul.f32 %v13497_v58, %v13399_v32 }
 0x1eb   :  { %v11945_v56 = vadd.f32 %v1000_v44, %v961_v61  ;;  %8019 = vmatprep.subr.bf16.mxu0 %v8719_v40  ;;  %v8726_v43 = vld [vmem:[%s12872_s1 + $0x7a0] sm:$0xff]   ;;  %v3388_v40 = vadd.f32 %v3381_v26, %v13508_v27  ;;  %v3413_v44 = vmul.f32 %v13497_v58, %v13482_v16  ;;  %v3410_v61 = vmul.f32 %v13497_v58, %v13412_v18 }
 0x1ec   :  { %v1003_v34 = vpop.f32.mrf.mxu1  ;;  %v13509_v52 = vld [vmem:[#allocation12_spill] sm:$0xff] }
 0x1ed   :  { %8040 = vmatpush3.bf16.msra.mxu1 %v8718_v53  ;;  %v8731_v53 = vld [vmem:[%s12872_s1 + $0x750] sm:$0xff]   ;;  %v3415_v13 = vadd.f32 %v3408_v1, %v13509_v52  ;;  %v3426_v34 = vmul.f32 %v13502_v5, %v13416_v39  ;;  %v13510_v1 = vld [vmem:[#allocation25_spill] sm:$0xff] }
 0x1ee   :  { %v8334_v63 = vpop.f32.mrf.mxu1  ;;  %8041 = vmatprep.subr.bf16.mxu1 %v8720_v24  ;;  %8020 = vmatpush3.bf16.msra.mxu0 %v8721_v54  ;;  %v3440_v24 = vmul.f32 %v13505_v6, %v13411_v46  ;;  %v3404_v54 = vadd.f32 %v3397_v50, %v3388_v40  ;;  %v3417_v50 = vadd.f32 %v3410_v61, %v13510_v1  ;;  %v8736_v61 = vld [vmem:[%s12872_s1 + $0x7c8] sm:$0xff]  }
 0x1ef   :  { %8021 = vmatprep.subr.bf16.mxu0 %v8723_v47  ;;  %v3429_v47 = vmul.f32 %v13502_v5, %v13413_v55  ;;  %v3431_v26 = vadd.f32 %v3424_v29, %v3415_v13  ;;  %v8735_v29 = vld [vmem:[%s12872_s1 + $0x748] sm:$0xff]   ;;  %v8739_v13 = vld [vmem:[%s12872_s1 + $0x740] sm:$0xff]  }
 0x1f0   :  { %v3420_v63 = vadd.f32 %v3413_v44, %v3404_v54  ;;  %v3433_v44 = vadd.f32 %v3426_v34, %v3417_v50  ;;  %v8738_v54 = vld [vmem:[%s12872_s1 + $0x788] sm:$0xff]   ;;  %v8740_v34 = vld [vmem:[%s12872_s1 + $0x7c0] sm:$0xff]   ;;  %v8744_v50 = vld [vmem:[%s12872_s1 + $0x838] sm:$0xff]  }
 0x1f1   :  { %8042 = vmatpush3.bf16.msra.mxu1 %v8722_v35  ;;  %v8730_v35 = vld [vmem:[%s12872_s1 + $0x798] sm:$0xff]   ;;  %v3447_v27 = vadd.f32 %v3440_v24, %v3431_v26 }
 0x1f2   :  { %8043 = vmatprep.subr.bf16.mxu1 %v8724_v31  ;;  %8022 = vmatpush3.bf16.msra.mxu0 %v8725_v51  ;;  %v3445_v31 = vmul.f32 %v13505_v6, %v13484_v62  ;;  %v8732_v51 = vld [vmem:[%s12872_s1 + $0x7d0] sm:$0xff]   ;;  %v3436_v40 = vadd.f32 %v3429_v47, %v3420_v63 }
 0x1f3   :  { %8023 = vmatprep.subr.bf16.mxu0 %v8727_v4  ;;  %v8733_v4 = vld [vmem:[%s12872_s1 + $0x710] sm:$0xff]   ;;  %v3456_v24 = vadd.f32 %v13506_v60, %v3447_v27 }
 0x1f5   :  { %8044 = vmatpush3.bf16.msra.mxu1 %v8726_v43  ;;  %v3442_v43 = vmul.f32 %v13505_v6, %v13421_v11  ;;  %v3463_v63 = vmax.f32 %v3456_v24, 0.0 }
 0x1f6   :  { %8045 = vmatprep.subr.bf16.mxu1 %v8728_v0  ;;  %8024 = vmatpush3.bf16.msra.mxu0 %v8729_v20  ;;  %v8734_v0 = vld [vmem:[%s12872_s1 + $0x790] sm:$0xff]   ;;  %v3452_v20 = vadd.f32 %v3445_v31, %v3436_v40  ;;  %v8743_v31 = vld [vmem:[%s12872_s1 + $0x878] sm:$0xff]  }
 0x1f7   :  { %8025 = vmatprep.subr.bf16.mxu0 %v8731_v53  ;;  %v8737_v53 = vld [vmem:[%s12872_s1 + $0x708] sm:$0xff]   ;;  %v3449_v52 = vadd.f32 %v3442_v43, %v3433_v44  ;;  %v3470_v43 = vpack.c.bf16 %v3463_v63, %v3463_v63  ;;  %v8745_v44 = vld [vmem:[%s12872_s1 + $0x8b8] sm:$0xff]   ;;  %v8752_v63 = vld [vmem:[%s12872_s1 + $0x860] sm:$0xff]  }
 0x1f8   :  { %v3461_v47 = vadd.f32 %v13506_v60, %v3452_v20  ;;  %v8747_v20 = vld [vmem:[%s12872_s1 + $0x830] sm:$0xff]  }
 0x1f9   :  { %8046 = vmatpush3.bf16.msra.mxu1 %v8730_v35  ;;  %v8741_v35 = vld [vmem:[%s12872_s1 + $0x700] sm:$0xff]   ;;  %v3458_v26 = vadd.f32 %v13506_v60, %v3449_v52 }
 0x1fa   :  { %8047 = vmatprep.subr.bf16.mxu1 %v8732_v51  ;;  %8026 = vmatpush3.bf16.msra.mxu0 %v8733_v4  ;;  %v8742_v51 = vld [vmem:[%s12872_s1 + $0x780] sm:$0xff]   ;;  %v3468_v4 = vmax.f32 %v3461_v47, 0.0 }
 0x1fb   :  { %8027 = vmatprep.subr.bf16.mxu0 %v8735_v29  ;;  %v3465_v1 = vmax.f32 %v3458_v26, 0.0  ;;  %v8746_v29 = vld [vmem:[%s12872_s1 + $0x870] sm:$0xff]  }
 0x1fc   :  { %v3475_v40 = vpack.c.bf16 %v3468_v4, %v3468_v4  ;;  %v8751_v4 = vld [vmem:[%s12872_s1 + $0x8a8] sm:$0xff]  }
 0x1fd   :  { %8048 = vmatpush3.bf16.msra.mxu1 %v8734_v0  ;;  %v3472_v0 = vpack.c.bf16 %v3465_v1, %v3465_v1  ;;  %v13511_v1 = vld [vmem:[#allocation46_spill] sm:$0xff] }
 0x1fe   :  { %8049 = vmatprep.subr.bf16.mxu1 %v8736_v61  ;;  %8028 = vmatpush3.bf16.msra.mxu0 %v8737_v53  ;;  %v8749_v53 = vld [vmem:[%s12872_s1 + $0x868] sm:$0xff]  }
 0x1ff   :  { %8029 = vmatprep.subr.bf16.mxu0 %v8739_v13 }
 0x201   :  { %8050 = vmatpush3.bf16.msra.mxu1 %v8738_v54  ;;  %v8748_v54 = vld [vmem:[%s12872_s1 + $0x8b0] sm:$0xff]  }
 0x202   :  { %8051 = vmatprep.subr.bf16.mxu1 %v8740_v34  ;;  %8030 = vmatpush3.bf16.msra.mxu0 %v8741_v35  ;;  %v8750_v34 = vld [vmem:[%s12872_s1 + $0x828] sm:$0xff]  }
 0x203   :  { %8059 = vmatprep.subr.bf16.mxu0 %v8743_v31 }
 0x205   :  { %8052 = vmatpush3.bf16.msra.mxu1 %v8742_v51  ;;  %v7806_v27 = vpop.f32.mrf.mxu0  ;;  %3959 = vmatmul.mubr.bf16.vlgmr.msra.gmra.mxu0 %v3470_v43 }
 0x206   :  { %8395 = vmatprep.subr.bf16.mxu1 %v13288_v21  ;;  %8060 = vmatpush3.bf16.msra.mxu0 %v8744_v50  ;;  %v4147_v50 = vmul.f32 %v13511_v1, %v13488_v57 }
 0x207   :  { %4038 = vmatprep.mubr.bf16.mxu0 %v3475_v40  ;;  %v7807_v61 = vpop.f32.mrf.mxu0  ;;  %8061 = vmatprep.subr.bf16.mxu0 %v8746_v29  ;;  %v8753_v29 = vld [vmem:[%s12872_s1 + $0x820] sm:$0xff]   ;;  %v8755_v40 = vld [vmem:[%s12872_s1 + $0x858] sm:$0xff]  }
 0x208   :  { %v7828_v52 = vpop.f32.mrf.mxu1  ;;  %3999 = vmatmul.mubr.bf16.vlgmr.msra.gmra.mxu1 %v3472_v0  ;;  %v7808_v13 = vadd.f32 %v7807_v61, %v7806_v27  ;;  %v3412_v27 = vmul.f32 %v13497_v58, %v13490_v3  ;;  %v3428_v61 = vmul.f32 %v13502_v5, %v13494_v12  ;;  %v13513_v58 = vld [vmem:[#allocation106_spill] sm:$0xff]  ;;  %v8756_v5 = vld [vmem:[%s12872_s1 + $0x818] sm:$0xff]  }
 0x209   :  { %8396 = vmatpush3.bf16.msra.mxu1 %v8745_v44  ;;  %v7809_v24 = vpop.f32.mrf.mxu0  ;;  %8411 = vmatprep.mubr.msk.bf16.mxu1 %vm8980_vm8, %v13288_v21  ;;  %v13512_v44 = vld [vmem:[#allocation108_spill] sm:$0xff] }
 0x20a   :  { %v7829_v47 = vpop.f32.mrf.mxu1  ;;  %8397 = vmatprep.subr.bf16.mxu1 %v13288_v21  ;;  %8062 = vmatpush3.bf16.msra.mxu0 %v8747_v20  ;;  %v4163_v0 = vmul.f32 %v13512_v44, %v13491_v45  ;;  %v4149_v20 = vmul.f32 %v13511_v1, %v13493_v41 }
 0x20b   :  { %v7830_v35 = vadd.f32 %v7829_v47, %v7828_v52  ;;  %v7810_v26 = vpop.f32.mrf.mxu0  ;;  %8063 = vmatprep.subr.bf16.mxu0 %v8749_v53  ;;  %v8754_v53 = vld [vmem:[%s12872_s1 + $0x8a0] sm:$0xff]   ;;  %v4154_v52 = vadd.f32 %v4147_v50, %v13513_v58  ;;  %v13517_v50 = vld [vmem:[#allocation27_spill] sm:$0xff] }
 0x20c   :  { %v7831_v31 = vpop.f32.mrf.mxu1  ;;  %v13515_v47 = vld [vmem:[#allocation92_spill] sm:$0xff]  ;;  %v8758_v26 = vld [vmem:[%s12872_s1 + $0x850] sm:$0xff]  }
 0x20d   :  { %v12069_v51 = vadd.f32 %v7830_v35, %v7808_v13  ;;  %8398 = vmatpush3.bf16.msra.mxu1 %v8748_v54  ;;  %v13514_v13 = vld [vmem:[#allocation61_spill] sm:$0xff]  ;;  %v4165_v54 = vmul.f32 %v13512_v44, %v13498_v22  ;;  %v3444_v35 = vmul.f32 %v13505_v6, %v13500_v59  ;;  %v13516_v31 = vld [vmem:[#allocation18_spill] sm:$0xff]  ;;  %v8757_v6 = vld [vmem:[%s12872_s1 + $0x898] sm:$0xff]  }
 0x20e   :  { %v7832_v43 = vpop.f32.mrf.mxu1  ;;  %8399 = vmatprep.subr.bf16.mxu1 %v13288_v21  ;;  %8064 = vmatpush3.bf16.msra.mxu0 %v8750_v34  ;;  %v4179_v24 = vmul.f32 %v13514_v13, %v13496_v15  ;;  %v3419_v34 = vadd.f32 %v3412_v27, %v13515_v47 }
 0x20f   :  { %8065 = vmatprep.subr.bf16.mxu0 %v8752_v63  ;;  %v4170_v63 = vadd.f32 %v4163_v0, %v4154_v52  ;;  %v4156_v43 = vadd.f32 %v4149_v20, %v13517_v50  ;;  %v4197_v0 = vmul.f32 %v13516_v31, %v13371_v9  ;;  %v8759_v20 = vld [vmem:[%s12872_s1 + $0x810] sm:$0xff]   ;;  %v8763_v50 = vld [vmem:[%s12872_s1 + $0x888] sm:$0xff]  }
 0x210   :  { %v3435_v58 = vadd.f32 %v3428_v61, %v3419_v34  ;;  %v8761_v61 = vld [vmem:[%s12872_s1 + $0x848] sm:$0xff]  }
 0x211   :  { %8400 = vmatpush3.bf16.msra.mxu1 %v8751_v4  ;;  %v4195_v4 = vmul.f32 %v13516_v31, %v13501_v25  ;;  %v4186_v27 = vadd.f32 %v4179_v24, %v4170_v63  ;;  %v4172_v48 = vadd.f32 %v4165_v54, %v4156_v43  ;;  %v13519_v43 = vld [vmem:[#allocation82_spill] sm:$0xff] }
 0x212   :  { %8401 = vmatprep.subr.bf16.mxu1 %v13288_v21  ;;  %8066 = vmatpush3.bf16.msra.mxu0 %v8753_v29  ;;  %v4181_v29 = vmul.f32 %v13514_v13, %v13504_v8 }
 0x213   :  { %8067 = vmatprep.subr.bf16.mxu0 %v8755_v40  ;;  %v13518_v40 = vld [vmem:[#allocation23_spill] sm:$0xff]  ;;  %v4202_v52 = vadd.f32 %v4195_v4, %v4186_v27 }
 0x214   :  { %v4211_v47 = vmul.f32 %v13518_v40, %v13374_v2  ;;  %v4188_v24 = vadd.f32 %v4181_v29, %v4172_v48  ;;  %v4213_v54 = vmul.f32 %v13518_v40, %v13375_v38  ;;  %v8764_v48 = vld [vmem:[%s12872_s1 + $0x840] sm:$0xff]  }
 0x215   :  { %8402 = vmatpush3.bf16.msra.mxu1 %v8754_v53  ;;  %v3451_v53 = vadd.f32 %v3444_v35, %v3435_v58  ;;  %v8765_v58 = vld [vmem:[%s12872_s1 + $0x800] sm:$0xff]  }
 0x216   :  { %8403 = vmatprep.subr.bf16.mxu1 %v13288_v21  ;;  %8068 = vmatpush3.bf16.msra.mxu0 %v8756_v5  ;;  %v8760_v5 = vld [vmem:[%s12872_s1 + $0x890] sm:$0xff]   ;;  %v4218_v34 = vadd.f32 %v4211_v47, %v4202_v52  ;;  %v4204_v63 = vadd.f32 %v4197_v0, %v4188_v24  ;;  %v8766_v47 = vld [vmem:[%s12872_s1 + $0x880] sm:$0xff]   ;;  %v8769_v52 = vld [vmem:[%s12872_s1 + $0x8f8] sm:$0xff]  }
 0x217   :  { %8069 = vmatprep.subr.bf16.mxu0 %v8758_v26  ;;  %v8762_v26 = vld [vmem:[%s12872_s1 + $0x808] sm:$0xff]   ;;  %v3460_v35 = vadd.f32 %v13506_v60, %v3451_v53  ;;  %v8767_v60 = vld [vmem:[%s12872_s1 + $0x938] sm:$0xff]  }
 0x218   :  { %v4220_v4 = vadd.f32 %v4213_v54, %v4204_v63  ;;  %v4227_v29 = vadd.f32 %v13519_v43, %v4218_v34  ;;  %v8768_v53 = vld [vmem:[%s12872_s1 + $0x9b8] sm:$0xff]  }
 0x219   :  { %8404 = vmatpush3.bf16.msra.mxu1 %v8757_v6  ;;  %v3467_v6 = vmax.f32 %v3460_v35, 0.0  ;;  %v8772_v35 = vld [vmem:[%s12872_s1 + $0x9b0] sm:$0xff]  }
 0x21a   :  { %8405 = vmatprep.subr.bf16.mxu1 %v13288_v21  ;;  %8070 = vmatpush3.bf16.msra.mxu0 %v8759_v20  ;;  %v4229_v27 = vadd.f32 %v13519_v43, %v4220_v4  ;;  %v4234_v0 = vmax.f32 %v4227_v29, 0.0  ;;  %v13520_v20 = vld [vmem:[#allocation51_spill] sm:$0xff]  ;;  %v8773_v4 = vld [vmem:[%s12872_s1 + $0x8f0] sm:$0xff]  }
 0x21b   :  { %8071 = vmatprep.subr.bf16.mxu0 %v8761_v61  ;;  %v3469_v61 = vmax.f32 %v13520_v20, 0.0  ;;  %v3474_v24 = vpack.c.bf16 %v3467_v6, %v3467_v6 }
 0x21c   :  { %v4236_v54 = vmax.f32 %v4229_v27, 0.0  ;;  %v4241_v63 = vpack.c.bf16 %v4234_v0, %v4234_v0  ;;  %v6404_v27 = vld [vmem:[%s12873_s2] ss:$0 sm:$0xff]  ;;  %v8774_v0 = vld [vmem:[%s12872_s1 + $0x970] sm:$0xff]  }
 0x21d   :  { %8406 = vmatpush3.bf16.msra.mxu1 %v8760_v5  ;;  %v8771_v5 = vld [vmem:[%s12872_s1 + $0x930] sm:$0xff]  }
 0x21e   :  { %8407 = vmatprep.subr.bf16.mxu1 %v13288_v21  ;;  %8072 = vmatpush3.bf16.msra.mxu0 %v8762_v26  ;;  %v8770_v26 = vld [vmem:[%s12872_s1 + $0x978] sm:$0xff]  }
 0x21f   :  { %8073 = vmatprep.subr.bf16.mxu0 %v8764_v48  ;;  %v3476_v48 = vpack.c.bf16 %v3469_v61, %v3469_v61 }
 0x221   :  { %8408 = vmatpush3.bf16.msra.mxu1 %v8763_v50  ;;  %v4243_v50 = vpack.c.bf16 %v4236_v54, %v4236_v54  ;;  %v8779_v54 = vld [vmem:[%s12872_s1 + $0x920] sm:$0xff]  }
 0x222   :  { %8409 = vmatprep.subr.bf16.mxu1 %v13288_v21  ;;  %8074 = vmatpush3.bf16.msra.mxu0 %v8765_v58  ;;  %v8775_v58 = vld [vmem:[%s12872_s1 + $0x928] sm:$0xff]  }
 0x223   :  { %8090 = vmatprep.subr.bf16.mxu0 %v8767_v60 }
 0x225   :  { %8410 = vmatpush3.bf16.msra.mxu1 %v8766_v47  ;;  %v7850_v34 = vpop.f32.mrf.mxu0  ;;  %4039 = vmatmul.mubr.bf16.vlgmr.msra.gmra.mxu0 %v3474_v24 }
 0x226   :  { %8112 = vmatprep.subr.bf16.mxu1 %v8768_v53  ;;  %8091 = vmatpush3.bf16.msra.mxu0 %v8769_v52  ;;  %v8776_v53 = vld [vmem:[%s12872_s1 + $0x9a8] sm:$0xff]  }
 0x227   :  { %4728 = vmatprep.mubr.bf16.mxu0 %v4241_v63  ;;  %v7851_v29 = vpop.f32.mrf.mxu0  ;;  %8092 = vmatprep.subr.bf16.mxu0 %v8771_v5  ;;  %v8777_v52 = vld [vmem:[%s12872_s1 + $0x8e8] sm:$0xff]   ;;  %v1006_v5 = vadd.f32 %v6404_v27, %v11945_v56  ;;  %v8781_v56 = vld [vmem:[%s12872_s1 + $0x8e0] sm:$0xff]  }
 0x228   :  { %v1770_v6 = vpop.f32.mrf.mxu1  ;;  %8412 = vmatmul.mubr.bf16.vlgmr.msra.gmra.mxu1 %v3476_v48  ;;  %v7852_v60 = vadd.f32 %v7851_v29, %v7850_v34  ;;  %v8778_v63 = vld [vmem:[%s12872_s1 + $0x968] sm:$0xff]   ;;  %v4167_v29 = vmul.f32 %v13512_v44, %v13404_v10  ;;  %v8785_v44 = vld [vmem:[%s12872_s1 + $0x8d8] sm:$0xff]  }
 0x229   :  { %8113 = vmatpush3.bf16.msra.mxu1 %v8770_v26  ;;  %4768 = vmatprep.mubr.bf16.mxu1 %v4243_v50  ;;  %v7853_v47 = vpop.f32.mrf.mxu0  ;;  %v4151_v26 = vmul.f32 %v13511_v1, %v13396_v23  ;;  %v8783_v50 = vld [vmem:[%s12872_s1 + $0x918] sm:$0xff]   ;;  %v4178_v1 = vmul.f32 %v13514_v13, %v13399_v32 }
 0x22a   :  { %v1731_v20 = vadd.f32 %v7852_v60, %v12069_v51  ;;  %v8353_v61 = vpop.f32.mrf.mxu1  ;;  %8114 = vmatprep.subr.bf16.mxu1 %v8772_v35  ;;  %8093 = vmatpush3.bf16.msra.mxu0 %v8773_v4  ;;  %v8780_v4 = vld [vmem:[%s12872_s1 + $0x9a0] sm:$0xff]   ;;  %v13521_v60 = vld [vmem:[#allocation26_spill] sm:$0xff]  ;;  %v4183_v47 = vmul.f32 %v13514_v13, %v13482_v16 }
 0x22b   :  { %v7854_v24 = vpop.f32.mrf.mxu0  ;;  %8094 = vmatprep.subr.bf16.mxu0 %v8775_v58  ;;  %v8782_v58 = vld [vmem:[%s12872_s1 + $0x960] sm:$0xff]   ;;  %v4158_v27 = vadd.f32 %v4151_v26, %v13521_v60  ;;  %v8787_v61 = vld [vmem:[%s12872_s1 + $0x910] sm:$0xff]  }
 0x22c   :  { %v1771_v51 = vadd.f32 %v1770_v6, %v1731_v20  ;;  %v1773_v34 = vpop.f32.mrf.mxu1  ;;  %v4194_v6 = vmul.f32 %v13516_v31, %v13406_v17  ;;  %v4180_v20 = vmul.f32 %v13514_v13, %v13412_v18  ;;  %v4210_v24 = vmul.f32 %v13518_v40, %v13411_v46 }
 0x22d   :  { %8115 = vmatpush3.bf16.msra.mxu1 %v8774_v0  ;;  %v8784_v0 = vld [vmem:[%s12872_s1 + $0x998] sm:$0xff]  }
 0x22e   :  { %v12201_v48 = vadd.f32 %v1771_v51, %v1006_v5  ;;  %v8354_v35 = vpop.f32.mrf.mxu1  ;;  %8116 = vmatprep.subr.bf16.mxu1 %v8776_v53  ;;  %8095 = vmatpush3.bf16.msra.mxu0 %v8777_v52  ;;  %v13522_v53 = vld [vmem:[#allocation67_spill] sm:$0xff]  ;;  %v4199_v5 = vmul.f32 %v13516_v31, %v13413_v55  ;;  %v4196_v51 = vmul.f32 %v13516_v31, %v13416_v39 }
 0x22f   :  { %8096 = vmatprep.subr.bf16.mxu0 %v8779_v54  ;;  %v4185_v52 = vadd.f32 %v4178_v1, %v13522_v53  ;;  %v4174_v54 = vadd.f32 %v4167_v29, %v4158_v27  ;;  %v8786_v34 = vld [vmem:[%s12872_s1 + $0x958] sm:$0xff]   ;;  %v4215_v35 = vmul.f32 %v13518_v40, %v13484_v62  ;;  %v4212_v29 = vmul.f32 %v13518_v40, %v13421_v11  ;;  %v8795_v53 = vld [vmem:[%s12872_s1 + $0x900] sm:$0xff]  }
 0x231   :  { %8117 = vmatpush3.bf16.msra.mxu1 %v8778_v63  ;;  %v4201_v63 = vadd.f32 %v4194_v6, %v4185_v52  ;;  %v4190_v26 = vadd.f32 %v4183_v47, %v4174_v54  ;;  %v8790_v47 = vld [vmem:[%s12872_s1 + $0x950] sm:$0xff]  }
 0x232   :  { %8118 = vmatprep.subr.bf16.mxu1 %v8780_v4  ;;  %8097 = vmatpush3.bf16.msra.mxu0 %v8781_v56  ;;  %v8788_v4 = vld [vmem:[%s12872_s1 + $0x990] sm:$0xff]  }
 0x233   :  { %8098 = vmatprep.subr.bf16.mxu0 %v8783_v50  ;;  %v8789_v56 = vld [vmem:[%s12872_s1 + $0x8d0] sm:$0xff]   ;;  %v4217_v6 = vadd.f32 %v4210_v24, %v4201_v63  ;;  %v4206_v60 = vadd.f32 %v4199_v5, %v4190_v26  ;;  %v8794_v24 = vld [vmem:[%s12872_s1 + $0x948] sm:$0xff]   ;;  %v8796_v5 = vld [vmem:[%s12872_s1 + $0x980] sm:$0xff]  }
 0x234   :  { %v13523_v50 = vld [vmem:[#allocation74_spill] sm:$0xff]  ;;  %v8799_v26 = vld [vmem:[%s12872_s1 + $0xa38] sm:$0xff]  }
 0x235   :  { %8119 = vmatpush3.bf16.msra.mxu1 %v8782_v58  ;;  %v4187_v1 = vadd.f32 %v4180_v20, %v13523_v50  ;;  %v8791_v58 = vld [vmem:[%s12872_s1 + $0x908] sm:$0xff]   ;;  %v4226_v52 = vadd.f32 %v13519_v43, %v4217_v6  ;;  %v8800_v50 = vld [vmem:[%s12872_s1 + $0x9f8] sm:$0xff]  }
 0x236   :  { %8120 = vmatprep.subr.bf16.mxu1 %v8784_v0  ;;  %8099 = vmatpush3.bf16.msra.mxu0 %v8785_v44  ;;  %v4222_v0 = vadd.f32 %v4215_v35, %v4206_v60  ;;  %v8792_v44 = vld [vmem:[%s12872_s1 + $0x988] sm:$0xff]   ;;  %v8798_v35 = vld [vmem:[%s12872_s1 + $0x940] sm:$0xff]   ;;  %v8801_v60 = vld [vmem:[%s12872_s1 + $0xa78] sm:$0xff]  }
 0x237   :  { %8100 = vmatprep.subr.bf16.mxu0 %v8787_v61  ;;  %v4203_v27 = vadd.f32 %v4196_v51, %v4187_v1  ;;  %v8793_v20 = vld [vmem:[%s12872_s1 + $0x8c8] sm:$0xff]   ;;  %v8797_v51 = vld [vmem:[%s12872_s1 + $0x8c0] sm:$0xff]   ;;  %v4233_v63 = vmax.f32 %v4226_v52, 0.0  ;;  %v8804_v52 = vld [vmem:[%s12872_s1 + $0xa70] sm:$0xff]  }
 0x238   :  { %v4231_v54 = vadd.f32 %v13519_v43, %v4222_v0 }
 0x239   :  { %8121 = vmatpush3.bf16.msra.mxu1 %v8786_v34  ;;  %v4219_v61 = vadd.f32 %v4212_v29, %v4203_v27  ;;  %v4240_v1 = vpack.c.bf16 %v4233_v63, %v4233_v63  ;;  %v8802_v29 = vld [vmem:[%s12872_s1 + $0xa30] sm:$0xff]  }
 0x23a   :  { %8122 = vmatprep.subr.bf16.mxu1 %v8788_v4  ;;  %8101 = vmatpush3.bf16.msra.mxu0 %v8789_v56  ;;  %v4238_v4 = vmax.f32 %v4231_v54, 0.0  ;;  %v8806_v54 = vld [vmem:[%s12872_s1 + $0x9e8] sm:$0xff]  }
 0x23b   :  { %8102 = vmatprep.subr.bf16.mxu0 %v8791_v58  ;;  %v4228_v34 = vadd.f32 %v13519_v43, %v4219_v61 }
 0x23c   :  { %v4245_v6 = vpack.c.bf16 %v4238_v4, %v4238_v4  ;;  %v13524_v4 = vld [vmem:[#allocation59_spill] sm:$0xff] }
 0x23d   :  { %8123 = vmatpush3.bf16.msra.mxu1 %v8790_v47  ;;  %v4235_v56 = vmax.f32 %v4228_v34, 0.0  ;;  %v8803_v47 = vld [vmem:[%s12872_s1 + $0x9f0] sm:$0xff]   ;;  %v8808_v34 = vld [vmem:[%s12872_s1 + $0xa20] sm:$0xff]  }
 0x23e   :  { %8124 = vmatprep.subr.bf16.mxu1 %v8792_v44  ;;  %8103 = vmatpush3.bf16.msra.mxu0 %v8793_v20  ;;  %v8805_v44 = vld [vmem:[%s12872_s1 + $0xa28] sm:$0xff]  }
 0x23f   :  { %8104 = vmatprep.subr.bf16.mxu0 %v8795_v53  ;;  %v4242_v27 = vpack.c.bf16 %v4235_v56, %v4235_v56  ;;  %v4917_v56 = vmul.f32 %v13524_v4, %v13488_v57 }
 0x241   :  { %8125 = vmatpush3.bf16.msra.mxu1 %v8794_v24 }
 0x242   :  { %8126 = vmatprep.subr.bf16.mxu1 %v8796_v5  ;;  %8105 = vmatpush3.bf16.msra.mxu0 %v8797_v51 }
 0x243   :  { %8134 = vmatprep.subr.bf16.mxu0 %v8799_v26 }
 0x245   :  { %8127 = vmatpush3.bf16.msra.mxu1 %v8798_v35  ;;  %v7881_v58 = vpop.f32.mrf.mxu0  ;;  %4729 = vmatmul.mubr.bf16.vlgmr.msra.gmra.mxu0 %v4240_v1  ;;  %v8807_v35 = vld [vmem:[%s12872_s1 + $0xa68] sm:$0xff]   ;;  %v8809_v1 = vld [vmem:[%s12872_s1 + $0x9e0] sm:$0xff]  }
 0x246   :  { %8415 = vmatprep.subr.bf16.mxu1 %v13288_v21  ;;  %8135 = vmatpush3.bf16.msra.mxu0 %v8800_v50 }
 0x247   :  { %4808 = vmatprep.mubr.bf16.mxu0 %v4245_v6  ;;  %v7882_v0 = vpop.f32.mrf.mxu0  ;;  %8136 = vmatprep.subr.bf16.mxu0 %v8802_v29  ;;  %v4182_v29 = vmul.f32 %v13514_v13, %v13490_v3  ;;  %v13525_v6 = vld [vmem:[#allocation30_spill] sm:$0xff]  ;;  %v13526_v13 = vld [vmem:[#allocation52_spill] sm:$0xff] }
 0x248   :  { %v7903_v20 = vpop.f32.mrf.mxu1  ;;  %4769 = vmatmul.mubr.bf16.vlgmr.msra.gmra.mxu1 %v4242_v27  ;;  %v7883_v61 = vadd.f32 %v7882_v0, %v7881_v58  ;;  %v8811_v58 = vld [vmem:[%s12872_s1 + $0xa18] sm:$0xff]   ;;  %v4919_v27 = vmul.f32 %v13524_v4, %v13493_v41  ;;  %v8810_v0 = vld [vmem:[%s12872_s1 + $0xa60] sm:$0xff]  }
 0x249   :  { %8416 = vmatpush3.bf16.msra.mxu1 %v8801_v60  ;;  %v7884_v53 = vpop.f32.mrf.mxu0  ;;  %8431 = vmatprep.mubr.msk.bf16.mxu1 %vm8980_vm8, %v13288_v21  ;;  %v4933_v60 = vmul.f32 %v13525_v6, %v13491_v45 }
 0x24a   :  { %v7904_v24 = vpop.f32.mrf.mxu1  ;;  %8417 = vmatprep.subr.bf16.mxu1 %v13288_v21  ;;  %8137 = vmatpush3.bf16.msra.mxu0 %v8803_v47  ;;  %v4198_v47 = vmul.f32 %v13516_v31, %v13494_v12  ;;  %v8812_v31 = vld [vmem:[%s12872_s1 + $0x9d8] sm:$0xff]   ;;  %v13527_v53 = vld [vmem:[#allocation42_spill] sm:$0xff] }
 0x24b   :  { %v7905_v5 = vadd.f32 %v7904_v24, %v7903_v20  ;;  %v7885_v51 = vpop.f32.mrf.mxu0  ;;  %8138 = vmatprep.subr.bf16.mxu0 %v8805_v44  ;;  %v4924_v44 = vadd.f32 %v4917_v56, %v13526_v13  ;;  %v4949_v20 = vmul.f32 %v11526_v14, %v13496_v15  ;;  %v4214_v24 = vmul.f32 %v13518_v40, %v13500_v59  ;;  %v8813_v40 = vld [vmem:[%s12872_s1 + $0xa58] sm:$0xff]  }
 0x24c   :  { %v7906_v63 = vpop.f32.mrf.mxu1  ;;  %v4965_v51 = vmul.f32 %v11540_v7, %v13501_v25 }
 0x24d   :  { %v12317_v26 = vadd.f32 %v7905_v5, %v7883_v61  ;;  %8418 = vmatpush3.bf16.msra.mxu1 %v8804_v52  ;;  %v4935_v61 = vmul.f32 %v13525_v6, %v13498_v22  ;;  %v4189_v52 = vadd.f32 %v4182_v29, %v13527_v53  ;;  %v4940_v5 = vadd.f32 %v4933_v60, %v4924_v44  ;;  %v8815_v60 = vld [vmem:[%s12872_s1 + $0x9d0] sm:$0xff]   ;;  %v8818_v53 = vld [vmem:[%s12872_s1 + $0x9c8] sm:$0xff]  }
 0x24e   :  { %v7907_v50 = vpop.f32.mrf.mxu1  ;;  %8419 = vmatprep.subr.bf16.mxu1 %v13288_v21  ;;  %8139 = vmatpush3.bf16.msra.mxu0 %v8806_v54  ;;  %v8814_v54 = vld [vmem:[%s12872_s1 + $0xa10] sm:$0xff]   ;;  %v4983_v44 = vmul.f32 %v11556_v30, %v13375_v38 }
 0x24f   :  { %8140 = vmatprep.subr.bf16.mxu0 %v8808_v34  ;;  %v13528_v34 = vld [vmem:[#allocation37_spill] sm:$0xff]  ;;  %v4205_v56 = vadd.f32 %v4198_v47, %v4189_v52  ;;  %v4956_v50 = vadd.f32 %v4949_v20, %v4940_v5  ;;  %v8816_v20 = vld [vmem:[%s12872_s1 + $0xa50] sm:$0xff]   ;;  %v8820_v52 = vld [vmem:[%s12872_s1 + $0xa00] sm:$0xff]  }
 0x250   :  { %v4926_v63 = vadd.f32 %v4919_v27, %v13528_v34  ;;  %v8817_v27 = vld [vmem:[%s12872_s1 + $0xa08] sm:$0xff]   ;;  %v8821_v34 = vld [vmem:[%s12872_s1 + $0x9c0] sm:$0xff]  }
 0x251   :  { %8420 = vmatpush3.bf16.msra.mxu1 %v8807_v35  ;;  %v4951_v35 = vmul.f32 %v11526_v14, %v13504_v8  ;;  %v4221_v47 = vadd.f32 %v4214_v24, %v4205_v56  ;;  %v8819_v5 = vld [vmem:[%s12872_s1 + $0xa48] sm:$0xff]   ;;  %v8822_v56 = vld [vmem:[%s12872_s1 + $0xa40] sm:$0xff]  }
 0x252   :  { %8421 = vmatprep.subr.bf16.mxu1 %v13288_v21  ;;  %8141 = vmatpush3.bf16.msra.mxu0 %v8809_v1  ;;  %v4981_v1 = vmul.f32 %v11556_v30, %v13374_v2  ;;  %v4942_v29 = vadd.f32 %v4935_v61, %v4926_v63 }
 0x253   :  { %8142 = vmatprep.subr.bf16.mxu0 %v8811_v58  ;;  %v4967_v58 = vmul.f32 %v11540_v7, %v13371_v9  ;;  %v4230_v24 = vadd.f32 %v13519_v43, %v4221_v47  ;;  %v8823_v43 = vld [vmem:[%s12872_s1 + $0xaf8] sm:$0xff]   ;;  %v8827_v47 = vld [vmem:[%s12872_s1 + $0xaf0] sm:$0xff]  }
 0x254   :  { %v4958_v13 = vadd.f32 %v4951_v35, %v4942_v29  ;;  %v8824_v29 = vld [vmem:[%s12872_s1 + $0xb78] sm:$0xff]  }
 0x255   :  { %8422 = vmatpush3.bf16.msra.mxu1 %v8810_v0  ;;  %v4972_v0 = vadd.f32 %v4965_v51, %v4956_v50  ;;  %v4237_v63 = vmax.f32 %v4230_v24, 0.0  ;;  %v13529_v50 = vld [vmem:[#allocation100_spill] sm:$0xff]  ;;  %v8831_v24 = vld [vmem:[%s12872_s1 + $0xae8] sm:$0xff]  }
 0x256   :  { %8423 = vmatprep.subr.bf16.mxu1 %v13288_v21  ;;  %8143 = vmatpush3.bf16.msra.mxu0 %v8812_v31  ;;  %v4974_v31 = vadd.f32 %v4967_v58, %v4958_v13  ;;  %v8825_v58 = vld [vmem:[%s12872_s1 + $0xab8] sm:$0xff]  }
 0x257   :  { %8144 = vmatprep.subr.bf16.mxu0 %v8814_v54  ;;  %v4988_v61 = vadd.f32 %v4981_v1, %v4972_v0  ;;  %v4239_v1 = vmax.f32 %v13529_v50, 0.0  ;;  %v8835_v50 = vld [vmem:[%s12872_s1 + $0xae0] sm:$0xff]  }
 0x258   :  { %v4990_v54 = vadd.f32 %v4983_v44, %v4974_v31  ;;  %v8826_v44 = vld [vmem:[%s12872_s1 + $0xb38] sm:$0xff]   ;;  %v8829_v31 = vld [vmem:[%s12872_s1 + $0xab0] sm:$0xff]  }
 0x259   :  { %8424 = vmatpush3.bf16.msra.mxu1 %v8813_v40  ;;  %v4997_v51 = vadd.f32 %v11597_v33, %v4988_v61  ;;  %v8828_v61 = vld [vmem:[%s12872_s1 + $0xb70] sm:$0xff]  }
 0x25a   :  { %8425 = vmatprep.subr.bf16.mxu1 %v13288_v21  ;;  %8145 = vmatpush3.bf16.msra.mxu0 %v8815_v60  ;;  %v4999_v35 = vadd.f32 %v11597_v33, %v4990_v54  ;;  %v4244_v60 = vpack.c.bf16 %v4237_v63, %v4237_v63 }
 0x25b   :  { %8146 = vmatprep.subr.bf16.mxu0 %v8817_v27  ;;  %v5004_v40 = vmax.f32 %v4997_v51, 0.0 }
 0x25c   :  { %v5006_v27 = vmax.f32 %v4999_v35, 0.0  ;;  %v8832_v35 = vld [vmem:[%s12872_s1 + $0xb68] sm:$0xff]  }
 0x25d   :  { %8426 = vmatpush3.bf16.msra.mxu1 %v8816_v20  ;;  %v5011_v13 = vpack.c.bf16 %v5004_v40, %v5004_v40  ;;  %v4246_v20 = vpack.c.bf16 %v4239_v1, %v4239_v1 }
 0x25e   :  { %8427 = vmatprep.subr.bf16.mxu1 %v13288_v21  ;;  %8147 = vmatpush3.bf16.msra.mxu0 %v8818_v53  ;;  %v5013_v53 = vpack.c.bf16 %v5006_v27, %v5006_v27 }
 0x25f   :  { %8148 = vmatprep.subr.bf16.mxu0 %v8820_v52 }
 0x261   :  { %8428 = vmatpush3.bf16.msra.mxu1 %v8819_v5 }
 0x262   :  { %8429 = vmatprep.subr.bf16.mxu1 %v13288_v21  ;;  %8149 = vmatpush3.bf16.msra.mxu0 %v8821_v34  ;;  %v8830_v34 = vld [vmem:[%s12872_s1 + $0xb30] sm:$0xff]  }
 0x263   :  { %8165 = vmatprep.subr.bf16.mxu0 %v8823_v43 }
 0x265   :  { %8430 = vmatpush3.bf16.msra.mxu1 %v8822_v56  ;;  %v7925_v0 = vpop.f32.mrf.mxu0  ;;  %4809 = vmatmul.mubr.bf16.vlgmr.msra.gmra.mxu0 %v4244_v60  ;;  %v8833_v56 = vld [vmem:[%s12872_s1 + $0xaa8] sm:$0xff]  }
 0x266   :  { %8187 = vmatprep.subr.bf16.mxu1 %v8824_v29  ;;  %8166 = vmatpush3.bf16.msra.mxu0 %v8825_v58  ;;  %v4921_v58 = vmul.f32 %v13524_v4, %v13396_v23  ;;  %v4937_v4 = vmul.f32 %v13525_v6, %v13404_v10  ;;  %v8841_v6 = vld [vmem:[%s12872_s1 + $0xa98] sm:$0xff]  }
 0x267   :  { %5498 = vmatprep.mubr.bf16.mxu0 %v5011_v13  ;;  %v7926_v52 = vpop.f32.mrf.mxu0  ;;  %8167 = vmatprep.subr.bf16.mxu0 %v8827_v47  ;;  %v8836_v47 = vld [vmem:[%s12872_s1 + $0xb60] sm:$0xff]   ;;  %v8839_v13 = vld [vmem:[%s12872_s1 + $0xad8] sm:$0xff]  }
 0x268   :  { %v2540_v54 = vpop.f32.mrf.mxu1  ;;  %8432 = vmatmul.mubr.bf16.vlgmr.msra.gmra.mxu1 %v4246_v20  ;;  %v7927_v5 = vadd.f32 %v7926_v52, %v7925_v0  ;;  %v8837_v0 = vld [vmem:[%s12872_s1 + $0xaa0] sm:$0xff]   ;;  %v4964_v20 = vmul.f32 %v11540_v7, %v13406_v17  ;;  %v8840_v52 = vld [vmem:[%s12872_s1 + $0xb58] sm:$0xff]  }
 0x269   :  { %8188 = vmatpush3.bf16.msra.mxu1 %v8826_v44  ;;  %5538 = vmatprep.mubr.bf16.mxu1 %v5013_v53  ;;  %v7928_v51 = vpop.f32.mrf.mxu0  ;;  %v8838_v44 = vld [vmem:[%s12872_s1 + $0xb20] sm:$0xff]   ;;  %v4953_v53 = vmul.f32 %v11526_v14, %v13482_v16 }
 0x26a   :  { %v2501_v63 = vadd.f32 %v7927_v5, %v12317_v26  ;;  %v8373_v43 = vpop.f32.mrf.mxu1  ;;  %8189 = vmatprep.subr.bf16.mxu1 %v8828_v61  ;;  %8168 = vmatpush3.bf16.msra.mxu0 %v8829_v31  ;;  %v8834_v26 = vld [vmem:[%s12872_s1 + $0xb28] sm:$0xff]   ;;  %v13530_v61 = vld [vmem:[#allocation28_spill] sm:$0xff] }
 0x26b   :  { %v7929_v40 = vpop.f32.mrf.mxu0  ;;  %8169 = vmatprep.subr.bf16.mxu0 %v8831_v24  ;;  %v4928_v31 = vadd.f32 %v4921_v58, %v13530_v61  ;;  %v4950_v24 = vmul.f32 %v11526_v14, %v13412_v18  ;;  %v13531_v5 = vld [vmem:[#allocation68_spill] sm:$0xff]  ;;  %v4969_v43 = vmul.f32 %v11540_v7, %v13413_v55  ;;  %v13532_v58 = vld [vmem:[#allocation75_spill] sm:$0xff]  ;;  %v8848_v61 = vld [vmem:[%s12872_s1 + $0xb48] sm:$0xff]  }
 0x26c   :  { %v2541_v1 = vadd.f32 %v2540_v54, %v2501_v63  ;;  %v2543_v29 = vpop.f32.mrf.mxu1  ;;  %v8843_v54 = vld [vmem:[%s12872_s1 + $0xad0] sm:$0xff]  }
 0x26d   :  { %8190 = vmatpush3.bf16.msra.mxu1 %v8830_v34  ;;  %v4980_v34 = vmul.f32 %v11556_v30, %v13411_v46  ;;  %v4944_v63 = vadd.f32 %v4937_v4, %v4928_v31  ;;  %v8844_v29 = vld [vmem:[%s12872_s1 + $0xb50] sm:$0xff]   ;;  %v8849_v31 = vld [vmem:[%s12872_s1 + $0xa88] sm:$0xff]  }
 0x26e   :  { %v12446_v60 = vadd.f32 %v2541_v1, %v12201_v48  ;;  %v8374_v27 = vpop.f32.mrf.mxu1  ;;  %8191 = vmatprep.subr.bf16.mxu1 %v8832_v35  ;;  %8170 = vmatpush3.bf16.msra.mxu0 %v8833_v56  ;;  %v4948_v48 = vmul.f32 %v11526_v14, %v13399_v32  ;;  %v4966_v35 = vmul.f32 %v11540_v7, %v13416_v39  ;;  %v8842_v56 = vld [vmem:[%s12872_s1 + $0xb18] sm:$0xff]  }
 0x26f   :  { %8171 = vmatprep.subr.bf16.mxu0 %v8835_v50  ;;  %v4960_v50 = vadd.f32 %v4953_v53, %v4944_v63  ;;  %v4985_v1 = vmul.f32 %v11556_v30, %v13484_v62  ;;  %v4957_v27 = vadd.f32 %v4950_v24, %v13532_v58  ;;  %v8850_v24 = vld [vmem:[%s12872_s1 + $0xb08] sm:$0xff]  }
 0x270   :  { %v4955_v51 = vadd.f32 %v4948_v48, %v13531_v5  ;;  %v8852_v5 = vld [vmem:[%s12872_s1 + $0xb40] sm:$0xff]  }
 0x271   :  { %8192 = vmatpush3.bf16.msra.mxu1 %v8834_v26  ;;  %v8845_v26 = vld [vmem:[%s12872_s1 + $0xa90] sm:$0xff]   ;;  %v4976_v48 = vadd.f32 %v4969_v43, %v4960_v50  ;;  %v4973_v4 = vadd.f32 %v4966_v35, %v4957_v27  ;;  %v8855_v43 = vld [vmem:[%s12872_s1 + $0xbf8] sm:$0xff]   ;;  %v8854_v35 = vld [vmem:[%s12872_s1 + $0xb00] sm:$0xff]  }
 0x272   :  { %8193 = vmatprep.subr.bf16.mxu1 %v8836_v47  ;;  %8172 = vmatpush3.bf16.msra.mxu0 %v8837_v0  ;;  %v4971_v40 = vadd.f32 %v4964_v20, %v4955_v51  ;;  %v4982_v47 = vmul.f32 %v11556_v30, %v13421_v11  ;;  %v8847_v0 = vld [vmem:[%s12872_s1 + $0xac8] sm:$0xff]   ;;  %v8853_v51 = vld [vmem:[%s12872_s1 + $0xa80] sm:$0xff]   ;;  %v8856_v50 = vld [vmem:[%s12872_s1 + $0xbb8] sm:$0xff]  }
 0x273   :  { %8173 = vmatprep.subr.bf16.mxu0 %v8839_v13  ;;  %v4992_v20 = vadd.f32 %v4985_v1, %v4976_v48  ;;  %v8857_v27 = vld [vmem:[%s12872_s1 + $0xc38] sm:$0xff]   ;;  %v8861_v48 = vld [vmem:[%s12872_s1 + $0xbe8] sm:$0xff]  }
 0x274   :  { %v4987_v13 = vadd.f32 %v4980_v34, %v4971_v40  ;;  %v4989_v53 = vadd.f32 %v4982_v47, %v4973_v4 }
 0x275   :  { %8194 = vmatpush3.bf16.msra.mxu1 %v8838_v44  ;;  %v8846_v44 = vld [vmem:[%s12872_s1 + $0xb10] sm:$0xff]  }
 0x276   :  { %8195 = vmatprep.subr.bf16.mxu1 %v8840_v52  ;;  %8174 = vmatpush3.bf16.msra.mxu0 %v8841_v6  ;;  %v8851_v52 = vld [vmem:[%s12872_s1 + $0xac0] sm:$0xff]   ;;  %v4996_v6 = vadd.f32 %v11597_v33, %v4987_v13  ;;  %v4998_v34 = vadd.f32 %v11597_v33, %v4989_v53  ;;  %v8862_v53 = vld [vmem:[%s12872_s1 + $0xba8] sm:$0xff]  }
 0x277   :  { %8175 = vmatprep.subr.bf16.mxu0 %v8843_v54  ;;  %v5001_v54 = vadd.f32 %v11597_v33, %v4992_v20 }
 0x278   :  { %v5003_v63 = vmax.f32 %v4996_v6, 0.0  ;;  %v5005_v40 = vmax.f32 %v4998_v34, 0.0  ;;  %v5687_v34 = vmul.f32 %v11568_v19, %v13488_v57  ;;  %v5689_v57 = vmul.f32 %v11568_v19, %v13493_v41 }
 0x279   :  { %8196 = vmatpush3.bf16.msra.mxu1 %v8842_v56  ;;  %v5008_v56 = vmax.f32 %v5001_v54, 0.0 }
 0x27a   :  { %8197 = vmatprep.subr.bf16.mxu1 %v8844_v29  ;;  %8176 = vmatpush3.bf16.msra.mxu0 %v8845_v26  ;;  %v5010_v1 = vpack.c.bf16 %v5003_v63, %v5003_v63  ;;  %v8858_v29 = vld [vmem:[%s12872_s1 + $0xbf0] sm:$0xff]   ;;  %v5012_v47 = vpack.c.bf16 %v5005_v40, %v5005_v40  ;;  %v5703_v40 = vmul.f32 %v11585_v37, %v13491_v45  ;;  %v13533_v45 = vld [vmem:[#allocation19_spill] sm:$0xff] }
 0x27b   :  { %8177 = vmatprep.subr.bf16.mxu0 %v8847_v0  ;;  %v5015_v58 = vpack.c.bf16 %v5008_v56, %v5008_v56  ;;  %v8859_v0 = vld [vmem:[%s12872_s1 + $0xbb0] sm:$0xff]   ;;  %v8867_v56 = vld [vmem:[%s12872_s1 + $0xbd8] sm:$0xff]  }
 0x27d   :  { %8198 = vmatpush3.bf16.msra.mxu1 %v8846_v44 }
 0x27e   :  { %8199 = vmatprep.subr.bf16.mxu1 %v8848_v61  ;;  %8178 = vmatpush3.bf16.msra.mxu0 %v8849_v31  ;;  %v8860_v61 = vld [vmem:[%s12872_s1 + $0xc30] sm:$0xff]  }
 0x27f   :  { %8179 = vmatprep.subr.bf16.mxu0 %v8851_v52 }
 0x281   :  { %8200 = vmatpush3.bf16.msra.mxu1 %v8850_v24  ;;  %v8864_v24 = vld [vmem:[%s12872_s1 + $0xbe0] sm:$0xff]  }
 0x282   :  { %8201 = vmatprep.subr.bf16.mxu1 %v8852_v5  ;;  %8180 = vmatpush3.bf16.msra.mxu0 %v8853_v51  ;;  %v8863_v51 = vld [vmem:[%s12872_s1 + $0xc28] sm:$0xff]  }
 0x283   :  { %8209 = vmatprep.subr.bf16.mxu0 %v8855_v43  ;;  %v8865_v43 = vld [vmem:[%s12872_s1 + $0xba0] sm:$0xff]  }
 0x285   :  { %8202 = vmatpush3.bf16.msra.mxu1 %v8854_v35  ;;  %v7956_v26 = vpop.f32.mrf.mxu0  ;;  %5499 = vmatmul.mubr.bf16.vlgmr.msra.gmra.mxu0 %v5010_v1  ;;  %v4952_v35 = vmul.f32 %v11526_v14, %v13490_v3  ;;  %v8866_v1 = vld [vmem:[%s12872_s1 + $0xc20] sm:$0xff]   ;;  %v5694_v14 = vadd.f32 %v5687_v34, %v11577_v28  ;;  %v8870_v28 = vld [vmem:[%s12872_s1 + $0xbd0] sm:$0xff]  }
 0x286   :  { %8435 = vmatprep.subr.bf16.mxu1 %v13288_v21  ;;  %8210 = vmatpush3.bf16.msra.mxu0 %v8856_v50  ;;  %v4968_v50 = vmul.f32 %v11540_v7, %v13494_v12  ;;  %v8868_v7 = vld [vmem:[%s12872_s1 + $0xb98] sm:$0xff]   ;;  %v13535_v34 = vld [vmem:[#allocation96_spill] sm:$0xff] }
 0x287   :  { %5578 = vmatprep.mubr.bf16.mxu0 %v5015_v58  ;;  %v7957_v13 = vpop.f32.mrf.mxu0  ;;  %8211 = vmatprep.subr.bf16.mxu0 %v8858_v29  ;;  %v5719_v29 = vmul.f32 %v11685_v36, %v13496_v15  ;;  %v4959_v41 = vadd.f32 %v4952_v35, %v13533_v45  ;;  %v4984_v58 = vmul.f32 %v11556_v30, %v13500_v59  ;;  %v8869_v30 = vld [vmem:[%s12872_s1 + $0xc18] sm:$0xff]   ;;  %v8883_v45 = vld [vmem:[%s12872_s1 + $0xcb0] sm:$0xff]  }
 0x288   :  { %v7978_v4 = vpop.f32.mrf.mxu1  ;;  %5539 = vmatmul.mubr.bf16.vlgmr.msra.gmra.mxu1 %v5012_v47  ;;  %v7958_v44 = vadd.f32 %v7957_v13, %v7956_v26  ;;  %v5705_v26 = vmul.f32 %v11585_v37, %v13498_v22  ;;  %v5710_v15 = vadd.f32 %v5703_v40, %v5694_v14  ;;  %v5735_v22 = vmul.f32 %v11691_v49, %v13501_v25  ;;  %v8878_v40 = vld [vmem:[%s12872_s1 + $0xc00] sm:$0xff]   ;;  %v8880_v14 = vld [vmem:[%s12872_s1 + $0xd38] sm:$0xff]  }
 0x289   :  { %8436 = vmatpush3.bf16.msra.mxu1 %v8857_v27  ;;  %v7959_v20 = vpop.f32.mrf.mxu0  ;;  %8451 = vmatprep.mubr.msk.bf16.mxu1 %vm8980_vm8, %v13288_v21  ;;  %v5696_v27 = vadd.f32 %v5689_v57, %v11611_v42  ;;  %v5721_v47 = vmul.f32 %v11685_v36, %v13504_v8  ;;  %v8871_v42 = vld [vmem:[%s12872_s1 + $0xb90] sm:$0xff]   ;;  %v8873_v8 = vld [vmem:[%s12872_s1 + $0xbc8] sm:$0xff]  }
 0x28a   :  { %v7979_v31 = vpop.f32.mrf.mxu1  ;;  %8437 = vmatprep.subr.bf16.mxu1 %v13288_v21  ;;  %8212 = vmatpush3.bf16.msra.mxu0 %v8859_v0  ;;  %v4975_v0 = vadd.f32 %v4968_v50, %v4959_v41  ;;  %v5726_v13 = vadd.f32 %v5719_v29, %v5710_v15  ;;  %v5737_v20 = vmul.f32 %v11691_v49, %v13371_v9  ;;  %v8872_v9 = vld [vmem:[%s12872_s1 + $0xc10] sm:$0xff]   ;;  %v13536_v50 = vld [vmem:[#allocation43_spill] sm:$0xff] }
 0x28b   :  { %v7980_v52 = vadd.f32 %v7979_v31, %v7978_v4  ;;  %v7960_v6 = vpop.f32.mrf.mxu0  ;;  %8213 = vmatprep.subr.bf16.mxu0 %v8861_v48  ;;  %v13534_v48 = vld [vmem:[#allocation47_spill] sm:$0xff] }
 0x28c   :  { %v7981_v54 = vpop.f32.mrf.mxu1  ;;  %v5751_v4 = vmul.f32 %v13534_v48, %v13374_v2  ;;  %v4991_v25 = vadd.f32 %v4984_v58, %v4975_v0  ;;  %v5753_v2 = vmul.f32 %v13534_v48, %v13375_v38  ;;  %v8874_v6 = vld [vmem:[%s12872_s1 + $0xb88] sm:$0xff]   ;;  %v8881_v29 = vld [vmem:[%s12872_s1 + $0xc78] sm:$0xff]  }
 0x28d   :  { %v12562_v5 = vadd.f32 %v7980_v52, %v7958_v44  ;;  %8438 = vmatpush3.bf16.msra.mxu1 %v8860_v61  ;;  %v5712_v44 = vadd.f32 %v5705_v26, %v5696_v27  ;;  %v5742_v61 = vadd.f32 %v5735_v22, %v5726_v13  ;;  %v8884_v22 = vld [vmem:[%s12872_s1 + $0xd30] sm:$0xff]  }
 0x28e   :  { %v7982_v63 = vpop.f32.mrf.mxu1  ;;  %8439 = vmatprep.subr.bf16.mxu1 %v13288_v21  ;;  %8214 = vmatpush3.bf16.msra.mxu0 %v8862_v53  ;;  %v5000_v38 = vadd.f32 %v11597_v33, %v4991_v25  ;;  %v8879_v33 = vld [vmem:[%s12872_s1 + $0xcb8] sm:$0xff]   ;;  %v8885_v27 = vld [vmem:[%s12872_s1 + $0xc70] sm:$0xff]   ;;  %v8888_v25 = vld [vmem:[%s12872_s1 + $0xd28] sm:$0xff]  }
 0x28f   :  { %8215 = vmatprep.subr.bf16.mxu0 %v8864_v24  ;;  %v5728_v31 = vadd.f32 %v5721_v47, %v5712_v44  ;;  %v5758_v53 = vadd.f32 %v5751_v4, %v5742_v61  ;;  %v8876_v24 = vld [vmem:[%s12872_s1 + $0xbc0] sm:$0xff]   ;;  %v8889_v61 = vld [vmem:[%s12872_s1 + $0xc68] sm:$0xff]  }
 0x290   :  { %v5007_v35 = vmax.f32 %v5000_v38, 0.0  ;;  %v8892_v38 = vld [vmem:[%s12872_s1 + $0xd20] sm:$0xff]  }
 0x291   :  { %8440 = vmatpush3.bf16.msra.mxu1 %v8863_v51  ;;  %v5744_v52 = vadd.f32 %v5737_v20, %v5728_v31  ;;  %v8875_v51 = vld [vmem:[%s12872_s1 + $0xc08] sm:$0xff]   ;;  %v5767_v63 = vadd.f32 %v13535_v34, %v5758_v53  ;;  %v8886_v20 = vld [vmem:[%s12872_s1 + $0xcf0] sm:$0xff]  }
 0x292   :  { %8441 = vmatprep.subr.bf16.mxu1 %v13288_v21  ;;  %8216 = vmatpush3.bf16.msra.mxu0 %v8865_v43  ;;  %v8877_v43 = vld [vmem:[%s12872_s1 + $0xb80] sm:$0xff]   ;;  %v5014_v26 = vpack.c.bf16 %v5007_v35, %v5007_v35 }
 0x293   :  { %8217 = vmatprep.subr.bf16.mxu0 %v8867_v56  ;;  %v5760_v54 = vadd.f32 %v5753_v2, %v5744_v52  ;;  %v5774_v57 = vmax.f32 %v5767_v63, 0.0  ;;  %v8891_v2 = vld [vmem:[%s12872_s1 + $0xca0] sm:$0xff]   ;;  %v5691_v52 = vmul.f32 %v11568_v19, %v13396_v23  ;;  %v5718_v23 = vmul.f32 %v11685_v36, %v13399_v32  ;;  %v8896_v32 = vld [vmem:[%s12872_s1 + $0xd18] sm:$0xff]  }
 0x294   :  { %v5707_v19 = vmul.f32 %v11585_v37, %v13404_v10  ;;  %v5734_v63 = vmul.f32 %v11691_v49, %v13406_v17  ;;  %v8897_v10 = vld [vmem:[%s12872_s1 + $0xc58] sm:$0xff]   ;;  %v5720_v37 = vmul.f32 %v11685_v36, %v13412_v18  ;;  %v8899_v17 = vld [vmem:[%s12872_s1 + $0xc90] sm:$0xff]  }
 0x295   :  { %8442 = vmatpush3.bf16.msra.mxu1 %v8866_v1  ;;  %v5769_v56 = vadd.f32 %v13535_v34, %v5760_v54  ;;  %v5009_v1 = vmax.f32 %v13536_v50, 0.0  ;;  %v5781_v58 = vpack.c.bf16 %v5774_v57, %v5774_v57  ;;  %v8893_v54 = vld [vmem:[%s12872_s1 + $0xc60] sm:$0xff]   ;;  %v5739_v50 = vmul.f32 %v11691_v49, %v13413_v55  ;;  %v8898_v18 = vld [vmem:[%s12872_s1 + $0xcd8] sm:$0xff]   ;;  %v8901_v55 = vld [vmem:[%s12872_s1 + $0xc50] sm:$0xff]  }
 0x296   :  { %8443 = vmatprep.subr.bf16.mxu1 %v13288_v21  ;;  %8218 = vmatpush3.bf16.msra.mxu0 %v8868_v7 }
 0x297   :  { %8219 = vmatprep.subr.bf16.mxu0 %v8870_v28  ;;  %v5776_v7 = vmax.f32 %v5769_v56, 0.0  ;;  %v8882_v28 = vld [vmem:[%s12872_s1 + $0xcf8] sm:$0xff]   ;;  %v5016_v15 = vpack.c.bf16 %v5009_v1, %v5009_v1  ;;  %v13538_v56 = vld [vmem:[#allocation48_spill] sm:$0xff]  ;;  %v5736_v1 = vmul.f32 %v11691_v49, %v13416_v39  ;;  %v13539_v39 = vld [vmem:[#allocation62_spill] sm:$0xff] }
 0x299   :  { %8444 = vmatpush3.bf16.msra.mxu1 %v8869_v30  ;;  %v5783_v47 = vpack.c.bf16 %v5776_v7, %v5776_v7  ;;  %v8887_v30 = vld [vmem:[%s12872_s1 + $0xca8] sm:$0xff]   ;;  %v5727_v7 = vadd.f32 %v5720_v37, %v13539_v39  ;;  %v8927_v39 = vld [vmem:[%s12872_s1 + $0xd50] sm:$0xff]  }
 0x29a   :  { %8445 = vmatprep.subr.bf16.mxu1 %v13288_v21  ;;  %8220 = vmatpush3.bf16.msra.mxu0 %v8871_v42 }
 0x29b   :  { %8221 = vmatprep.subr.bf16.mxu0 %v8873_v8 }
 0x29d   :  { %8446 = vmatpush3.bf16.msra.mxu1 %v8872_v9 }
 0x29e   :  { %8447 = vmatprep.subr.bf16.mxu1 %v13288_v21  ;;  %8222 = vmatpush3.bf16.msra.mxu0 %v8874_v6 }
 0x29f   :  { %8223 = vmatprep.subr.bf16.mxu0 %v8876_v24 }
 0x2a1   :  { %8448 = vmatpush3.bf16.msra.mxu1 %v8875_v51  ;;  %v8895_v51 = vld [vmem:[%s12872_s1 + $0xc98] sm:$0xff]  }
 0x2a2   :  { %8449 = vmatprep.subr.bf16.mxu1 %v13288_v21  ;;  %8224 = vmatpush3.bf16.msra.mxu0 %v8877_v43  ;;  %v13537_v43 = vld [vmem:[#allocation53_spill] sm:$0xff] }
 0x2a3   :  { %8240 = vmatprep.subr.bf16.mxu0 %v8879_v33  ;;  %v5698_v35 = vadd.f32 %v5691_v52, %v13537_v43  ;;  %v5723_v33 = vmul.f32 %v11685_v36, %v13482_v16  ;;  %v5725_v16 = vadd.f32 %v5718_v23, %v13538_v56 }
 0x2a5   :  { %8450 = vmatpush3.bf16.msra.mxu1 %v8878_v40  ;;  %v8000_v41 = vpop.f32.mrf.mxu0  ;;  %5579 = vmatmul.mubr.bf16.vlgmr.msra.gmra.mxu0 %v5014_v26  ;;  %v5750_v40 = vmul.f32 %v13534_v48, %v13411_v46  ;;  %v5714_v57 = vadd.f32 %v5707_v19, %v5698_v35  ;;  %v5755_v26 = vmul.f32 %v13534_v48, %v13484_v62  ;;  %v8900_v46 = vld [vmem:[%s12872_s1 + $0xd10] sm:$0xff]   ;;  %v8903_v62 = vld [vmem:[%s12872_s1 + $0xc88] sm:$0xff]  }
 0x2a6   :  { %8262 = vmatprep.subr.bf16.mxu1 %v8880_v14  ;;  %8241 = vmatpush3.bf16.msra.mxu0 %v8881_v29  ;;  %v5741_v14 = vadd.f32 %v5734_v63, %v5725_v16  ;;  %v8917_v19 = vld [vmem:[%s12872_s1 + $0xda8] sm:$0xff]   ;;  %v8916_v35 = vld [vmem:[%s12872_s1 + $0xdf0] sm:$0xff]  }
 0x2a7   :  { %6268 = vmatprep.mubr.bf16.mxu0 %v5781_v58  ;;  %v8001_v0 = vpop.f32.mrf.mxu0  ;;  %8242 = vmatprep.subr.bf16.mxu0 %v8883_v45  ;;  %v5730_v29 = vadd.f32 %v5723_v33, %v5714_v57  ;;  %v5752_v45 = vmul.f32 %v13534_v48, %v13421_v11  ;;  %v8904_v11 = vld [vmem:[%s12872_s1 + $0xd08] sm:$0xff]  }
 0x2a8   :  { %v3310_v13 = vpop.f32.mrf.mxu1  ;;  %8452 = vmatmul.mubr.bf16.vlgmr.msra.gmra.mxu1 %v5016_v15  ;;  %v8002_v4 = vadd.f32 %v8001_v0, %v8000_v41  ;;  %v5757_v41 = vadd.f32 %v5750_v40, %v5741_v14  ;;  %v8902_v15 = vld [vmem:[%s12872_s1 + $0xcd0] sm:$0xff]   ;;  %v8907_v0 = vld [vmem:[%s12872_s1 + $0xc80] sm:$0xff]   ;;  %v8919_v40 = vld [vmem:[%s12872_s1 + $0xde8] sm:$0xff]  }
 0x2a9   :  { %8263 = vmatpush3.bf16.msra.mxu1 %v8882_v28  ;;  %6308 = vmatprep.mubr.bf16.mxu1 %v5783_v47  ;;  %v8003_v44 = vpop.f32.mrf.mxu0  ;;  %v5746_v58 = vadd.f32 %v5739_v50, %v5730_v29  ;;  %v5743_v28 = vadd.f32 %v5736_v1, %v5727_v7  ;;  %v8921_v50 = vld [vmem:[%s12872_s1 + $0xd60] sm:$0xff]   ;;  %v8923_v1 = vld [vmem:[%s12872_s1 + $0xd98] sm:$0xff]   ;;  %v5738_v29 = vmul.f32 %v11691_v49, %v13494_v12  ;;  %v8929_v7 = vld [vmem:[%s12872_s1 + $0xd88] sm:$0xff]  }
 0x2aa   :  { %v3271_v42 = vadd.f32 %v8002_v4, %v12562_v5  ;;  %v8393_v8 = vpop.f32.mrf.mxu1  ;;  %8264 = vmatprep.subr.bf16.mxu1 %v8884_v22  ;;  %8243 = vmatpush3.bf16.msra.mxu0 %v8885_v27  ;;  %v8890_v5 = vld [vmem:[%s12872_s1 + $0xce8] sm:$0xff]   ;;  %v8908_v44 = vld [vmem:[%s12872_s1 + $0xd00] sm:$0xff]   ;;  %v8925_v49 = vld [vmem:[%s12872_s1 + $0xdd8] sm:$0xff]  }
 0x2ab   :  { %v8004_v31 = vpop.f32.mrf.mxu0  ;;  %8244 = vmatprep.subr.bf16.mxu0 %v8887_v30  ;;  %v5762_v22 = vadd.f32 %v5755_v26, %v5746_v58  ;;  %v8905_v27 = vld [vmem:[%s12872_s1 + $0xc48] sm:$0xff]   ;;  %v5759_v47 = vadd.f32 %v5752_v45, %v5743_v28  ;;  %v5766_v30 = vadd.f32 %v13535_v34, %v5757_v41  ;;  %v8922_v14 = vld [vmem:[%s12872_s1 + $0xde0] sm:$0xff]   ;;  %v8924_v26 = vld [vmem:[%s12872_s1 + $0xd58] sm:$0xff]  }
 0x2ac   :  { %v3311_v9 = vadd.f32 %v3310_v13, %v3271_v42  ;;  %v3313_v53 = vpop.f32.mrf.mxu1  ;;  %v8906_v13 = vld [vmem:[%s12872_s1 + $0xcc8] sm:$0xff]   ;;  %v8933_v28 = vld [vmem:[%s12872_s1 + $0xd40] sm:$0xff]  }
 0x2ad   :  { %8265 = vmatpush3.bf16.msra.mxu1 %v8886_v20  ;;  %v5771_v4 = vadd.f32 %v13535_v34, %v5762_v22  ;;  %v8909_v20 = vld [vmem:[%s12872_s1 + $0xc40] sm:$0xff]   ;;  %v5768_v42 = vadd.f32 %v13535_v34, %v5759_v47  ;;  %v5773_v8 = vmax.f32 %v5766_v30, 0.0  ;;  %v8931_v58 = vld [vmem:[%s12872_s1 + $0xdc8] sm:$0xff]  }
 0x2ae   :  { %v12691_v6 = vadd.f32 %v3311_v9, %v12446_v60  ;;  %v8394_v24 = vpop.f32.mrf.mxu1  ;;  %8266 = vmatprep.subr.bf16.mxu1 %v8888_v25  ;;  %8245 = vmatpush3.bf16.msra.mxu0 %v8889_v61  ;;  %v8894_v60 = vld [vmem:[%s12872_s1 + $0xce0] sm:$0xff]   ;;  %v8911_v25 = vld [vmem:[%s12872_s1 + $0xdb8] sm:$0xff]  }
 0x2af   :  { %8246 = vmatprep.subr.bf16.mxu0 %v8891_v2  ;;  %v8910_v61 = vld [vmem:[%s12872_s1 + $0xcc0] sm:$0xff]   ;;  %v5778_v31 = vmax.f32 %v5771_v4, 0.0  ;;  %v5775_v2 = vmax.f32 %v5768_v42, 0.0  ;;  %v8912_v9 = vld [vmem:[%s12872_s1 + $0xd78] sm:$0xff]   ;;  %v5780_v53 = vpack.c.bf16 %v5773_v8, %v5773_v8 }
 0x2b0   :  { %v8934_v22 = vld [vmem:[%s12872_s1 + $0xdc0] sm:$0xff]  }
 0x2b1   :  { %8267 = vmatpush3.bf16.msra.mxu1 %v8890_v5  ;;  %v8914_v5 = vld [vmem:[%s12872_s1 + $0xdb0] sm:$0xff]   ;;  %v5785_v24 = vpack.c.bf16 %v5778_v31, %v5778_v31 }
 0x2b2   :  { %8268 = vmatprep.subr.bf16.mxu1 %v8892_v38  ;;  %8247 = vmatpush3.bf16.msra.mxu0 %v8893_v54  ;;  %v8913_v38 = vld [vmem:[%s12872_s1 + $0xdf8] sm:$0xff]   ;;  %v5782_v54 = vpack.c.bf16 %v5775_v2, %v5775_v2 }
 0x2b3   :  { %8248 = vmatprep.subr.bf16.mxu0 %v8895_v51  ;;  %v8915_v51 = vld [vmem:[%s12872_s1 + $0xd70] sm:$0xff]  }
 0x2b5   :  { %8269 = vmatpush3.bf16.msra.mxu1 %v8894_v60 }
 0x2b6   :  { %8270 = vmatprep.subr.bf16.mxu1 %v8896_v32  ;;  %8249 = vmatpush3.bf16.msra.mxu0 %v8897_v10  ;;  %v8918_v32 = vld [vmem:[%s12872_s1 + $0xd68] sm:$0xff]  }
 0x2b7   :  { %8250 = vmatprep.subr.bf16.mxu0 %v8899_v17  ;;  %v8920_v17 = vld [vmem:[%s12872_s1 + $0xda0] sm:$0xff]  }
 0x2b9   :  { %8271 = vmatpush3.bf16.msra.mxu1 %v8898_v18  ;;  %v5722_v18 = vmul.f32 %v11685_v36, %v13490_v3  ;;  %v8926_v36 = vld [vmem:[%s12872_s1 + $0xd90] sm:$0xff]   ;;  %v13540_v3 = vld [vmem:[#allocation36_spill] sm:$0xff] }
 0x2ba   :  { %8272 = vmatprep.subr.bf16.mxu1 %v8900_v46  ;;  %8251 = vmatpush3.bf16.msra.mxu0 %v8901_v55  ;;  %v5754_v55 = vmul.f32 %v13534_v48, %v13500_v59  ;;  %v8928_v59 = vld [vmem:[%s12872_s1 + $0xdd0] sm:$0xff]   ;;  %v8930_v48 = vld [vmem:[%s12872_s1 + $0xd48] sm:$0xff]  }
 0x2bb   :  { %8252 = vmatprep.subr.bf16.mxu0 %v8903_v62  ;;  %v5729_v46 = vadd.f32 %v5722_v18, %v13540_v3  ;;  %v8932_v62 = vld [vmem:[%s12872_s1 + $0xd80] sm:$0xff]  }
 0x2bd   :  { %8273 = vmatpush3.bf16.msra.mxu1 %v8902_v15  ;;  %v5745_v12 = vadd.f32 %v5738_v29, %v5729_v46 }
 0x2be   :  { %8274 = vmatprep.subr.bf16.mxu1 %v8904_v11  ;;  %8253 = vmatpush3.bf16.msra.mxu0 %v8905_v27 }
 0x2bf   :  { %8254 = vmatprep.subr.bf16.mxu0 %v8907_v0  ;;  %v5761_v45 = vadd.f32 %v5754_v55, %v5745_v12 }
 0x2c1   :  { %8275 = vmatpush3.bf16.msra.mxu1 %v8906_v13  ;;  %v5770_v41 = vadd.f32 %v13535_v34, %v5761_v45  ;;  %v13541_v34 = vld [vmem:[#allocation93_spill] sm:$0xff] }
 0x2c2   :  { %8276 = vmatprep.subr.bf16.mxu1 %v8908_v44  ;;  %8255 = vmatpush3.bf16.msra.mxu0 %v8909_v20  ;;  %v5779_v11 = vmax.f32 %v13541_v34, 0.0 }
 0x2c3   :  { %8284 = vmatprep.subr.bf16.mxu0 %v8911_v25  ;;  %v5777_v15 = vmax.f32 %v5770_v41, 0.0 }
 0x2c4   :  { %v5786_v0 = vpack.c.bf16 %v5779_v11, %v5779_v11 }
 0x2c5   :  { %8277 = vmatpush3.bf16.msra.mxu1 %v8910_v61  ;;  %v8031_v52 = vpop.f32.mrf.mxu0  ;;  %6269 = vmatmul.mubr.bf16.vlgmr.msra.gmra.mxu0 %v5780_v53  ;;  %v5784_v27 = vpack.c.bf16 %v5777_v15, %v5777_v15 }
 0x2c6   :  { %8455 = vmatprep.subr.bf16.mxu1 %v13288_v21  ;;  %8285 = vmatpush3.bf16.msra.mxu0 %v8912_v9 }
 0x2c7   :  { %6348 = vmatprep.mubr.bf16.mxu0 %v5785_v24  ;;  %v8032_v23 = vpop.f32.mrf.mxu0  ;;  %8286 = vmatprep.subr.bf16.mxu0 %v8914_v5 }
 0x2c8   :  { %v8053_v60 = vpop.f32.mrf.mxu1  ;;  %6309 = vmatmul.mubr.bf16.vlgmr.msra.gmra.mxu1 %v5782_v54  ;;  %v8033_v63 = vadd.f32 %v8032_v23, %v8031_v52 }
 0x2c9   :  { %8456 = vmatpush3.bf16.msra.mxu1 %v8913_v38  ;;  %v8034_v43 = vpop.f32.mrf.mxu0  ;;  %8471 = vmatprep.mubr.msk.bf16.mxu1 %vm8980_vm8, %v13288_v21 }
 0x2ca   :  { %v8054_v33 = vpop.f32.mrf.mxu1  ;;  %8457 = vmatprep.subr.bf16.mxu1 %v13288_v21  ;;  %8287 = vmatpush3.bf16.msra.mxu0 %v8915_v51 }
 0x2cb   :  { %v8055_v10 = vadd.f32 %v8054_v33, %v8053_v60  ;;  %v8035_v37 = vpop.f32.mrf.mxu0  ;;  %8288 = vmatprep.subr.bf16.mxu0 %v8917_v19 }
 0x2cc   :  { %v8056_v56 = vpop.f32.mrf.mxu1 }
 0x2cd   :  { %v4001_v16 = vadd.f32 %v8055_v10, %v8033_v63  ;;  %8458 = vmatpush3.bf16.msra.mxu1 %v8916_v35 }
 0x2ce   :  { %v8057_v57 = vpop.f32.mrf.mxu1  ;;  %8459 = vmatprep.subr.bf16.mxu1 %v13288_v21  ;;  %8289 = vmatpush3.bf16.msra.mxu0 %v8918_v32 }
 0x2cf   :  { %8290 = vmatprep.subr.bf16.mxu0 %v8920_v17 }
 0x2d1   :  { %8460 = vmatpush3.bf16.msra.mxu1 %v8919_v40 }
 0x2d2   :  { %8461 = vmatprep.subr.bf16.mxu1 %v13288_v21  ;;  %8291 = vmatpush3.bf16.msra.mxu0 %v8921_v50 }
 0x2d3   :  { %8292 = vmatprep.subr.bf16.mxu0 %v8923_v1 }
 0x2d5   :  { %8462 = vmatpush3.bf16.msra.mxu1 %v8922_v14 }
 0x2d6   :  { %8463 = vmatprep.subr.bf16.mxu1 %v13288_v21  ;;  %8293 = vmatpush3.bf16.msra.mxu0 %v8924_v26 }
 0x2d7   :  { %8294 = vmatprep.subr.bf16.mxu0 %v8926_v36 }
 0x2d9   :  { %8464 = vmatpush3.bf16.msra.mxu1 %v8925_v49 }
 0x2da   :  { %8465 = vmatprep.subr.bf16.mxu1 %v13288_v21  ;;  %8295 = vmatpush3.bf16.msra.mxu0 %v8927_v39 }
 0x2db   :  { %8296 = vmatprep.subr.bf16.mxu0 %v8929_v7 }
 0x2dd   :  { %8466 = vmatpush3.bf16.msra.mxu1 %v8928_v59 }
 0x2de   :  { %8467 = vmatprep.subr.bf16.mxu1 %v13288_v21  ;;  %8297 = vmatpush3.bf16.msra.mxu0 %v8930_v48 }
 0x2df   :  { %8298 = vmatprep.subr.bf16.mxu0 %v8932_v62 }
 0x2e1   :  { %8468 = vmatpush3.bf16.msra.mxu1 %v8931_v58 }
 0x2e2   :  { %8469 = vmatprep.subr.bf16.mxu1 %v13288_v21  ;;  %8299 = vmatpush3.bf16.msra.mxu0 %v8933_v28 }
 0x2e5   :  { %8470 = vmatpush3.bf16.msra.mxu1 %v8934_v22  ;;  %v8075_v47 = vpop.f32.mrf.mxu0  ;;  %6349 = vmatmul.mubr.bf16.vlgmr.msra.gmra.mxu0 %v5784_v27 }
 0x2e7   :  { %v8076_v30 = vpop.f32.mrf.mxu0 }
 0x2e8   :  { %v4080_v13 = vpop.f32.mrf.mxu1  ;;  %8472 = vmatmul.mubr.bf16.vlgmr.msra.gmra.mxu1 %v5786_v0  ;;  %v8077_v4 = vadd.f32 %v8076_v30, %v8075_v47 }
 0x2e9   :  { %v8078_v44 = vpop.f32.mrf.mxu0 }
 0x2ea   :  { %v4041_v20 = vadd.f32 %v8077_v4, %v4001_v16  ;;  %v8413_v42 = vpop.f32.mrf.mxu1 }
 0x2eb   :  { %v8079_v8 = vpop.f32.mrf.mxu0 }
 0x2ec   :  { %v4081_v25 = vadd.f32 %v4080_v13, %v4041_v20  ;;  %v4083_v61 = vpop.f32.mrf.mxu1 }
 0x2ee   :  { %v4086_v21 = vadd.f32 %v4081_v25, %v12691_v6  ;;  %v8414_v31 = vpop.f32.mrf.mxu1 }
 0x305   :  { %v8106_v2 = vpop.f32.mrf.mxu0 }
 0x307   :  { %v8107_v9 = vpop.f32.mrf.mxu0 }
 0x308   :  { %v8128_v53 = vpop.f32.mrf.mxu1  ;;  %v8108_v5 = vadd.f32 %v8107_v9, %v8106_v2 }
 0x309   :  { %v8109_v52 = vpop.f32.mrf.mxu0 }
 0x30a   :  { %v8129_v24 = vpop.f32.mrf.mxu1 }
 0x30b   :  { %v8130_v38 = vadd.f32 %v8129_v24, %v8128_v53  ;;  %v8110_v54 = vpop.f32.mrf.mxu0 }
 0x30c   :  { %v8131_v51 = vpop.f32.mrf.mxu1 }
 0x30d   :  { %v4771_v23 = vadd.f32 %v8130_v38, %v8108_v5 }
 0x30e   :  { %v8132_v19 = vpop.f32.mrf.mxu1 }
 0x325   :  { %v8150_v60 = vpop.f32.mrf.mxu0 }
 0x327   :  { %v8151_v63 = vpop.f32.mrf.mxu0 }
 0x328   :  { %v4850_v43 = vpop.f32.mrf.mxu1  ;;  %v8152_v35 = vadd.f32 %v8151_v63, %v8150_v60 }
 0x329   :  { %v8153_v33 = vpop.f32.mrf.mxu0 }
 0x32a   :  { %v4811_v32 = vadd.f32 %v8152_v35, %v4771_v23  ;;  %v8433_v10 = vpop.f32.mrf.mxu1 }
 0x32b   :  { %v8154_v6 = vpop.f32.mrf.mxu0 }
 0x32c   :  { %v4851_v37 = vadd.f32 %v4850_v43, %v4811_v32  ;;  %v4853_v17 = vpop.f32.mrf.mxu1 }
 0x32e   :  { %v4856_v56 = vadd.f32 %v4851_v37, %v4086_v21  ;;  %v8434_v16 = vpop.f32.mrf.mxu1 }
 0x345   :  { %v8181_v40 = vpop.f32.mrf.mxu0 }
 0x347   :  { %v8182_v57 = vpop.f32.mrf.mxu0 }
 0x348   :  { %v8203_v50 = vpop.f32.mrf.mxu1  ;;  %v8183_v1 = vadd.f32 %v8182_v57, %v8181_v40 }
 0x349   :  { %v8184_v18 = vpop.f32.mrf.mxu0 }
 0x34a   :  { %v8204_v14 = vpop.f32.mrf.mxu1 }
 0x34b   :  { %v8205_v29 = vadd.f32 %v8204_v14, %v8203_v50  ;;  %v8185_v26 = vpop.f32.mrf.mxu0 }
 0x34c   :  { %v8206_v36 = vpop.f32.mrf.mxu1 }
 0x34d   :  { %v5541_v3 = vadd.f32 %v8205_v29, %v8183_v1 }
 0x34e   :  { %v8207_v46 = vpop.f32.mrf.mxu1 }
 0x365   :  { %v8225_v55 = vpop.f32.mrf.mxu0 }
 0x367   :  { %v8226_v49 = vpop.f32.mrf.mxu0 }
 0x368   :  { %v5620_v12 = vpop.f32.mrf.mxu1  ;;  %v8227_v39 = vadd.f32 %v8226_v49, %v8225_v55 }
 0x369   :  { %v8228_v7 = vpop.f32.mrf.mxu0 }
 0x36a   :  { %v5581_v45 = vadd.f32 %v8227_v39, %v5541_v3  ;;  %v8453_v59 = vpop.f32.mrf.mxu1 }
 0x36b   :  { %v8229_v48 = vpop.f32.mrf.mxu0 }
 0x36c   :  { %v5621_v62 = vadd.f32 %v5620_v12, %v5581_v45  ;;  %v5623_v41 = vpop.f32.mrf.mxu1 }
 0x36e   :  { %v5626_v58 = vadd.f32 %v5621_v62, %v4856_v56  ;;  %v8454_v28 = vpop.f32.mrf.mxu1 }
 0x385   :  { %v8256_v15 = vpop.f32.mrf.mxu0 }
 0x387   :  { %v8257_v22 = vpop.f32.mrf.mxu0 }
 0x388   :  { %v8278_v34 = vpop.f32.mrf.mxu1  ;;  %v8258_v13 = vadd.f32 %v8257_v22, %v8256_v15 }
 0x389   :  { %v8259_v11 = vpop.f32.mrf.mxu0 }
 0x38a   :  { %v8279_v27 = vpop.f32.mrf.mxu1 }
 0x38b   :  { %v8260_v47 = vpop.f32.mrf.mxu0  ;;  %v8280_v4 = vadd.f32 %v8279_v27, %v8278_v34 }
 0x38c   :  { %v8281_v0 = vpop.f32.mrf.mxu1 }
 0x38d   :  { %v6311_v42 = vadd.f32 %v8280_v4, %v8258_v13 }
 0x38e   :  { %v8282_v30 = vpop.f32.mrf.mxu1 }
 0x3a5   :  { %v8300_v44 = vpop.f32.mrf.mxu0 }
 0x3a7   :  { %v8301_v20 = vpop.f32.mrf.mxu0 }
 0x3a8   :  { %v6390_v8 = vpop.f32.mrf.mxu1  ;;  %v8302_v25 = vadd.f32 %v8301_v20, %v8300_v44 }
 0x3a9   :  { %v8303_v61 = vpop.f32.mrf.mxu0 }
 0x3aa   :  { %v6351_v21 = vadd.f32 %v8302_v25, %v6311_v42  ;;  %v8473_v31 = vpop.f32.mrf.mxu1 }
 0x3ab   :  { %v8304_v2 = vpop.f32.mrf.mxu0 }
 0x3ac   :  { %v6391_v9 = vadd.f32 %v6390_v8, %v6351_v21  ;;  %v6393_v53 = vpop.f32.mrf.mxu1 }
 0x3ae   :  { %v6396_v5 = vadd.f32 %v6391_v9, %v5626_v58  ;;  %v8474_v52 = vpop.f32.mrf.mxu1 }
 0x3b0   :  { %6397 = vst [vmem:[%s12876_s5] sm:$0xff] %v6396_v5 }
 0x3b1   :  { %6402 = vsyncpa [#allocation3], 1 }
 0x3b2   :  { %6403 = vsyncpa [#allocation5], 1 }

</bundles_post_ra>
